<compile_context>
chip_gen: v7x
topology: tpu7x:2x2x1
jax: 0.10.0
libtpu: 0.0.40
codegen_flags: <defaults>
</compile_context>

<pallas_src>
import numpy as np
import jax
import jax.numpy as jnp
from jax.experimental import pallas as pl
from jax.experimental.pallas import tpu as pltpu

_VMEM_LIMIT = 32 * 1024 * 1024  # safe on v5e / v6e / v7x


def _round_up(x, m):
    return ((x + m - 1) // m) * m


def _pick_row_tile(n, max_tile=512):
    """Largest row tile <= max_tile that divides n and is a multiple of 8."""
    if n <= max_tile:
        return n
    t = max_tile - (max_tile % 8)
    while t >= 8:
        if n % t == 0:
            return t
        t -= 8
    return n


# ----------------------------------------------------------------------------
# Kernel 1: fused input-to-hidden projection for BOTH directions at once
#   res = x @ [W_ih_f^T | W_ih_b^T] + [b_f | b_b]   ->  (xf, xb)
# ----------------------------------------------------------------------------
def proj_kernel(x_ref, w_ref, b_ref, outf_ref, outb_ref):
    g = w_ref.shape[1] // 2
    res = (jnp.dot(x_ref[...], w_ref[...], preferred_element_type=jnp.float32)
           + b_ref[...])
    outf_ref[...] = res[:, :g]
    outb_ref[...] = res[:, g:]


def fused_input_projection(x_flat, w_proj, bias):
    # x_flat: [N, E], w_proj: [E, 8H], bias: [1, 8H] -> (xf [N,4H], xb [N,4H])
    N, E = x_flat.shape
    G2 = w_proj.shape[1]
    G = G2 // 2
    tile = _pick_row_tile(N)
    return pl.pallas_call(
        proj_kernel,
        out_shape=(jax.ShapeDtypeStruct((N, G), jnp.float32),
                   jax.ShapeDtypeStruct((N, G), jnp.float32)),
        grid_spec=pltpu.PrefetchScalarGridSpec(
            num_scalar_prefetch=0,
            grid=(N // tile,),
            in_specs=[
                pl.BlockSpec((tile, E), lambda i: (i, 0)),
                pl.BlockSpec((E, G2), lambda i: (0, 0)),
                pl.BlockSpec((1, G2), lambda i: (0, 0)),
            ],
            out_specs=(
                pl.BlockSpec((tile, G), lambda i: (i, 0)),
                pl.BlockSpec((tile, G), lambda i: (i, 0)),
            ),
        ),
        compiler_params=pltpu.CompilerParams(
            dimension_semantics=("parallel",),
            vmem_limit_bytes=_VMEM_LIMIT),
    )(x_flat, w_proj, bias)


# ----------------------------------------------------------------------------
# Kernel 2: fused bidirectional LSTM recurrence, chunked over time.
#   grid=(L/T_CHUNK,), sequential.  Forward direction reads chunk c, backward
#   reads chunk (n_chunks-1-c) via the index_map.  One block-diagonal matmul
#   [B,2H]@[2H,8H] per timestep drives both directions.
# ----------------------------------------------------------------------------
def bilstm_kernel(xf_ref, xb_ref, len_ref, wblk_ref, hf_ref, hb_ref,
                  h_scr, c_scr):
    c_idx = pl.program_id(0)
    n_chunks = pl.num_programs(0)
    B = xf_ref.shape[0]
    TC = xf_ref.shape[1]
    G = xf_ref.shape[2]
    H = G // 4
    L = n_chunks * TC

    @pl.when(c_idx == 0)
    def _():
        h_scr[...] = jnp.zeros_like(h_scr)
        c_scr[...] = jnp.zeros_like(c_scr)

    lens = len_ref[...]          # [B, 1] int32
    w = wblk_ref[...]            # [2H, 8H] block-diagonal recurrent weights

    h = h_scr[...]               # [B, 2H]  = [h_fwd | h_bwd]
    c = c_scr[...]               # [B, 2H]

    # TC is a static Python int -> the loop is fully unrolled with static
    # indices (cheap, gives the scheduler a straight-line chunk body).
    for k in range(TC):
        t_f = c_idx * TC + k          # forward global time
        t_b = L - 1 - t_f             # backward global time
        kb = TC - 1 - k               # local index inside the backward block

        x_f = xf_ref[:, k, :]         # [B, 4H]
        x_b = xb_ref[:, kb, :]        # [B, 4H]
        x = jnp.concatenate([x_f, x_b], axis=-1)     # [B, 8H]

        gates = x + jnp.dot(h, w, preferred_element_type=jnp.float32)
        # TODO(synk): for H >= 128 (real model sizes), reorder gate columns so
        # the i/f/g/o slices below land on 128-lane boundaries.
        gf = gates[:, :4 * H]
        gb = gates[:, 4 * H:]

        def one_dir(g4, c_prev):
            i = jax.nn.sigmoid(g4[:, 0 * H:1 * H])
            f = jax.nn.sigmoid(g4[:, 1 * H:2 * H])
            g_ = jnp.tanh(g4[:, 2 * H:3 * H])
            o = jax.nn.sigmoid(g4[:, 3 * H:4 * H])
            c_new = f * c_prev + i * g_
            h_new = o * jnp.tanh(c_new)
            return h_new, c_new

        hf_new, cf_new = one_dir(gf, c[:, :H])
        hb_new, cb_new = one_dir(gb, c[:, H:])

        # pack_padded emulation: padded steps emit 0 and do not advance state.
        m_f = (lens > t_f).astype(jnp.float32)       # [B, 1]
        m_b = (lens > t_b).astype(jnp.float32)       # [B, 1]

        hf_ref[:, k, :] = m_f * hf_new
        hb_ref[:, kb, :] = m_b * hb_new

        h = jnp.concatenate(
            [m_f * hf_new + (1.0 - m_f) * h[:, :H],
             m_b * hb_new + (1.0 - m_b) * h[:, H:]], axis=-1)
        c = jnp.concatenate(
            [m_f * cf_new + (1.0 - m_f) * c[:, :H],
             m_b * cb_new + (1.0 - m_b) * c[:, H:]], axis=-1)

    h_scr[...] = h
    c_scr[...] = c


def run_bilstm(xf, xb, lens_2d, wblk, t_chunk):
    # xf, xb: [B, L_pad, 4H] batch-major; lens_2d: [B, 1] int32; wblk: [2H, 8H]
    B, L_pad, G = xf.shape
    H = G // 4
    n_chunks = L_pad // t_chunk
    return pl.pallas_call(
        bilstm_kernel,
        out_shape=(jax.ShapeDtypeStruct((B, L_pad, H), jnp.float32),
                   jax.ShapeDtypeStruct((B, L_pad, H), jnp.float32)),
        grid_spec=pltpu.PrefetchScalarGridSpec(
            num_scalar_prefetch=0,
            grid=(n_chunks,),
            in_specs=[
                pl.BlockSpec((B, t_chunk, G), lambda c: (0, c, 0)),
                pl.BlockSpec((B, t_chunk, G),
                             lambda c: (0, n_chunks - 1 - c, 0)),
                pl.BlockSpec((B, 1), lambda c: (0, 0)),
                pl.BlockSpec((2 * H, 8 * H), lambda c: (0, 0)),
            ],
            out_specs=(
                pl.BlockSpec((B, t_chunk, H), lambda c: (0, c, 0)),
                pl.BlockSpec((B, t_chunk, H),
                             lambda c: (0, n_chunks - 1 - c, 0)),
            ),
            scratch_shapes=[
                pltpu.VMEM((B, 2 * H), jnp.float32),   # h state (fwd|bwd)
                pltpu.VMEM((B, 2 * H), jnp.float32),   # c state (fwd|bwd)
            ],
        ),
        compiler_params=pltpu.CompilerParams(
            dimension_semantics=("arbitrary",),
            vmem_limit_bytes=_VMEM_LIMIT),
    )(xf, xb, lens_2d, wblk)


# ----------------------------------------------------------------------------
# Kernel 3: output linear + CRF score broadcast, lane-dense output
#   em = hf @ Wf + hb @ Wb + b ;  out[n, i*T+j] = em[n, j] + transition[i, j]
# ----------------------------------------------------------------------------
def crf_kernel(hf_ref, hb_ref, wf_ref, wb_ref, b_ref, trans_ref, out_ref):
    em = (jnp.dot(hf_ref[...], wf_ref[...], preferred_element_type=jnp.float32)
          + jnp.dot(hb_ref[...], wb_ref[...], preferred_element_type=jnp.float32)
          + b_ref[...])                                  # [tile, T]
    T = b_ref.shape[1]
    # lane-dense [tile, T*T] store: column i*T+j holds em[:, j] + trans[i, j]
    out_ref[...] = jnp.concatenate([em] * T, axis=-1) + trans_ref[...]


def crf_scores_call(hf_bl, hb_bl, wf, wb, blin, trans_flat):
    N, H = hf_bl.shape
    T = wf.shape[1]
    TT = T * T
    tile = _pick_row_tile(N)
    return pl.pallas_call(
        crf_kernel,
        out_shape=jax.ShapeDtypeStruct((N, TT), jnp.float32),
        grid_spec=pltpu.PrefetchScalarGridSpec(
            num_scalar_prefetch=0,
            grid=(N // tile,),
            in_specs=[
                pl.BlockSpec((tile, H), lambda i: (i, 0)),
                pl.BlockSpec((tile, H), lambda i: (i, 0)),
                pl.BlockSpec((H, T), lambda i: (0, 0)),
                pl.BlockSpec((H, T), lambda i: (0, 0)),
                pl.BlockSpec((1, T), lambda i: (0, 0)),
                pl.BlockSpec((1, TT), lambda i: (0, 0)),
            ],
            out_specs=pl.BlockSpec((tile, TT), lambda i: (i, 0)),
        ),
        compiler_params=pltpu.CompilerParams(
            dimension_semantics=("parallel",),
            vmem_limit_bytes=_VMEM_LIMIT),
    )(hf_bl, hb_bl, wf, wb, blin, trans_flat)


# ----------------------------------------------------------------------------
# Full forward (glue in plain JAX, hot paths in Pallas)
# ----------------------------------------------------------------------------
def bilstm_crf_forward(sents, lengths, p, t_chunk=8):
    B, L = sents.shape
    H = p["W_hh_f"].shape[1]
    E = p["emb"].shape[1]
    T = p["transition"].shape[0]
    L_pad = _round_up(L, t_chunk)

    emb = p["emb"][sents]                               # [B, L, E] gather (glue)
    if L_pad != L:
        emb = jnp.pad(emb, ((0, 0), (0, L_pad - L), (0, 0)))
    x_flat = emb.reshape(B * L_pad, E)                  # batch-major, free reshape

    # fused fwd+bwd input projection (x read from HBM once)
    w_proj = jnp.concatenate([p["W_ih_f"].T, p["W_ih_b"].T], axis=1)   # [E, 8H]
    bias = jnp.concatenate([p["b_ih_f"] + p["b_hh_f"],
                            p["b_ih_b"] + p["b_hh_b"]])[None, :]       # [1, 8H]
    xf_flat, xb_flat = fused_input_projection(x_flat, w_proj, bias)
    xf = xf_flat.reshape(B, L_pad, 4 * H)
    xb = xb_flat.reshape(B, L_pad, 4 * H)

    # block-diagonal recurrent weight: one matmul drives both directions
    wblk = jnp.zeros((2 * H, 8 * H), jnp.float32)
    wblk = wblk.at[:H, :4 * H].set(p["W_hh_f"].T)
    wblk = wblk.at[H:, 4 * H:].set(p["W_hh_b"].T)

    lens_2d = lengths.astype(jnp.int32).reshape(B, 1)

    h_f, h_b = run_bilstm(xf, xb, lens_2d, wblk, t_chunk)   # [B, L_pad, H] each
    if L_pad != L:
        h_f = h_f[:, :L, :]
        h_b = h_b[:, :L, :]
    hf_bl = h_f.reshape(B * L, H)
    hb_bl = h_b.reshape(B * L, H)

    # TODO(synk): module semantics require materializing [B,L,T,T]; a fused
    # CRF-loss/Viterbi kernel could consume emissions [B,L,T] directly instead.
    wf = p["W_lin"][:, :H].T                             # [H, T]
    wb = p["W_lin"][:, H:].T                             # [H, T]
    trans_flat = p["transition"].reshape(1, T * T)
    crf = crf_scores_call(hf_bl, hb_bl, wf, wb, p["b_lin"][None, :], trans_flat)
    return crf.reshape(B, L, T, T)


# ----------------------------------------------------------------------------
# Pure-JAX reference (correctness check)
# ----------------------------------------------------------------------------
def reference_forward(sents, lengths, p):
    B, L = sents.shape
    H = p["W_hh_f"].shape[1]
    emb = p["emb"][sents]

    def run_dir(W_ih, W_hh, b, reverse):
        def step(carry, inp):
            h, c = carry
            x_t, m_t = inp
            gates = x_t @ W_ih.T + h @ W_hh.T + b
            i, f, g, o = jnp.split(gates, 4, axis=-1)
            i, f, o = jax.nn.sigmoid(i), jax.nn.sigmoid(f), jax.nn.sigmoid(o)
            g = jnp.tanh(g)
            c_new = f * c + i * g
            h_new = o * jnp.tanh(c_new)
            h2 = m_t * h_new + (1.0 - m_t) * h
            c2 = m_t * c_new + (1.0 - m_t) * c
            return (h2, c2), m_t * h_new

        xs = jnp.transpose(emb, (1, 0, 2))
        ms = (jnp.arange(L)[:, None] < lengths[None, :]).astype(jnp.float32)[:, :, None]
        if reverse:
            xs, ms = xs[::-1], ms[::-1]
        init = (jnp.zeros((B, H), jnp.float32), jnp.zeros((B, H), jnp.float32))
        _, outs = jax.lax.scan(step, init, (xs, ms))
        if reverse:
            outs = outs[::-1]
        return outs

    h_f = run_dir(p["W_ih_f"], p["W_hh_f"], p["b_ih_f"] + p["b_hh_f"], False)
    h_b = run_dir(p["W_ih_b"], p["W_hh_b"], p["b_ih_b"] + p["b_hh_b"], True)
    rnn = jnp.transpose(jnp.concatenate([h_f, h_b], -1), (1, 0, 2))   # [B, L, 2H]
    em = rnn @ p["W_lin"].T + p["b_lin"]
    return em[:, :, None, :] + p["transition"][None, None, :, :]


if __name__ == "__main__":
    vocab_size, emb_size, hidden_size, out_size = 50, 16, 32, 8
    B, L = 2, 8

    key = jax.random.PRNGKey(0)
    ks = jax.random.split(key, 12)
    s = 1.0 / (hidden_size ** 0.5)
    u = lambda k, shape: jax.random.uniform(k, shape, jnp.float32, -s, s)

    p = {
        "emb": jax.random.normal(ks[0], (vocab_size, emb_size), jnp.float32),
        "W_ih_f": u(ks[1], (4 * hidden_size, emb_size)),
        "W_hh_f": u(ks[2], (4 * hidden_size, hidden_size)),
        "b_ih_f": u(ks[3], (4 * hidden_size,)),
        "b_hh_f": u(ks[4], (4 * hidden_size,)),
        "W_ih_b": u(ks[5], (4 * hidden_size, emb_size)),
        "W_hh_b": u(ks[6], (4 * hidden_size, hidden_size)),
        "b_ih_b": u(ks[7], (4 * hidden_size,)),
        "b_hh_b": u(ks[8], (4 * hidden_size,)),
        "W_lin": u(ks[9], (out_size, 2 * hidden_size)),
        "b_lin": u(ks[10], (out_size,)),
        "transition": jnp.ones((out_size, out_size), jnp.float32) / out_size,
    }

    sents = jax.random.randint(ks[11], (B, L), 0, vocab_size, dtype=jnp.int32)
    lengths = jnp.array([L, L - 2], dtype=jnp.int32)  # descending (pack_padded)

    crf = jax.jit(bilstm_crf_forward)(sents, lengths, p)
    crf = jax.block_until_ready(crf)
    assert crf.shape == (B, L, out_size, out_size)

    ref = reference_forward(sents, lengths, p)
    assert np.allclose(np.asarray(crf), np.asarray(ref), atol=1e-4, rtol=1e-4), (
        float(np.max(np.abs(np.asarray(crf) - np.asarray(ref)))))

    print("KERNEL_OK")
</pallas_src>

<mosaic_0001>
module attributes {stable_mosaic.version = 11 : i64} {
  func.func @proj_kernel(%arg0: i32, %arg1: memref<16x16xf32, #tpu.memory_space<vmem>>, %arg2: memref<16x256xf32, #tpu.memory_space<vmem>>, %arg3: memref<1x256xf32, #tpu.memory_space<vmem>>, %arg4: memref<16x128xf32, #tpu.memory_space<vmem>>, %arg5: memref<16x128xf32, #tpu.memory_space<vmem>>) attributes {dimension_semantics = [#tpu.dimension_semantics<parallel>], iteration_bounds = array<i64: 1>, scalar_prefetch = 0 : i64, scratch_operands = 0 : i64, tpu.core_type = #tpu.core_type<tc>, window_params = [{transform_indices = @transform_0, window_bounds = array<i64: 16, 16>}, {pipeline_mode = #tpu.pipeline_mode<synchronous>, transform_indices = @transform_1, window_bounds = array<i64: 16, 256>}, {pipeline_mode = #tpu.pipeline_mode<synchronous>, transform_indices = @transform_2, window_bounds = array<i64: 1, 256>}, {transform_indices = @transform_3, window_bounds = array<i64: 16, 128>}, {transform_indices = @transform_4, window_bounds = array<i64: 16, 128>}]} {
    %c0 = arith.constant 0 : index
    %c0_0 = arith.constant 0 : index
    %0 = vector.load %arg1[%c0, %c0_0] : memref<16x16xf32, #tpu.memory_space<vmem>>, vector<16x16xf32>
    %c0_1 = arith.constant 0 : index
    %c0_2 = arith.constant 0 : index
    %1 = vector.load %arg2[%c0_1, %c0_2] : memref<16x256xf32, #tpu.memory_space<vmem>>, vector<16x256xf32>
    %cst = arith.constant dense<0.000000e+00> : vector<16x256xf32>
    %2 = tpu.matmul %0, %1, %cst {dimension_numbers = #tpu.dot_dimension_numbers<[1], [0], [0], [1], [0, 0, 1, 1], [], []>} : vector<16x16xf32>, vector<16x256xf32>, vector<16x256xf32> -> vector<16x256xf32>
    %c0_3 = arith.constant 0 : index
    %c0_4 = arith.constant 0 : index
    %3 = vector.load %arg3[%c0_3, %c0_4] : memref<1x256xf32, #tpu.memory_space<vmem>>, vector<1x256xf32>
    %4 = vector.broadcast %3 : vector<1x256xf32> to vector<16x256xf32>
    %5 = arith.addf %2, %4 : vector<16x256xf32>
    %6 = vector.extract_strided_slice %5 {offsets = [0, 0], sizes = [16, 128], strides = [1, 1]} : vector<16x256xf32> to vector<16x128xf32>
    %c0_5 = arith.constant 0 : index
    %c0_6 = arith.constant 0 : index
    %7 = vector.load %arg4[%c0_5, %c0_6] : memref<16x128xf32, #tpu.memory_space<vmem>>, vector<16x128xf32>
    tpu.vector_store %arg4[%c0_5, %c0_6], %6 {strides = array<i32>} : memref<16x128xf32, #tpu.memory_space<vmem>>, vector<16x128xf32>,
    %8 = vector.extract_strided_slice %5 {offsets = [0, 128], sizes = [16, 128], strides = [1, 1]} : vector<16x256xf32> to vector<16x128xf32>
    %c0_7 = arith.constant 0 : index
    %c0_8 = arith.constant 0 : index
    %9 = vector.load %arg5[%c0_7, %c0_8] : memref<16x128xf32, #tpu.memory_space<vmem>>, vector<16x128xf32>
    tpu.vector_store %arg5[%c0_7, %c0_8], %8 {strides = array<i32>} : memref<16x128xf32, #tpu.memory_space<vmem>>, vector<16x128xf32>,
    return
  }
  func.func @transform_0(%arg0: i32) -> (i32, i32) {
    %c0_i32 = arith.constant 0 : i32
    %c0_i32_0 = arith.constant 0 : i32
    return %arg0, %c0_i32 : i32, i32
  }
  func.func @transform_1(%arg0: i32) -> (i32, i32) {
    %c0_i32 = arith.constant 0 : i32
    %c0_i32_0 = arith.constant 0 : i32
    %c0_i32_1 = arith.constant 0 : i32
    return %c0_i32, %c0_i32_0 : i32, i32
  }
  func.func @transform_2(%arg0: i32) -> (i32, i32) {
    %c0_i32 = arith.constant 0 : i32
    %c0_i32_0 = arith.constant 0 : i32
    %c0_i32_1 = arith.constant 0 : i32
    return %c0_i32, %c0_i32_0 : i32, i32
  }
  func.func @transform_3(%arg0: i32) -> (i32, i32) {
    %c0_i32 = arith.constant 0 : i32
    %c0_i32_0 = arith.constant 0 : i32
    return %arg0, %c0_i32 : i32, i32
  }
  func.func @transform_4(%arg0: i32) -> (i32, i32) {
    %c0_i32 = arith.constant 0 : i32
    %c0_i32_0 = arith.constant 0 : i32
    return %arg0, %c0_i32 : i32, i32
  }
}

module attributes {stable_mosaic.version = 11 : i64} {
  func.func @crf_kernel(%arg0: i32, %arg1: memref<16x32xf32, #tpu.memory_space<vmem>>, %arg2: memref<16x32xf32, #tpu.memory_space<vmem>>, %arg3: memref<32x8xf32, #tpu.memory_space<vmem>>, %arg4: memref<32x8xf32, #tpu.memory_space<vmem>>, %arg5: memref<1x8xf32, #tpu.memory_space<vmem>>, %arg6: memref<1x64xf32, #tpu.memory_space<vmem>>, %arg7: memref<16x64xf32, #tpu.memory_space<vmem>>) attributes {dimension_semantics = [#tpu.dimension_semantics<parallel>], iteration_bounds = array<i64: 1>, scalar_prefetch = 0 : i64, scratch_operands = 0 : i64, tpu.core_type = #tpu.core_type<tc>, window_params = [{transform_indices = @transform_0, window_bounds = array<i64: 16, 32>}, {transform_indices = @transform_1, window_bounds = array<i64: 16, 32>}, {pipeline_mode = #tpu.pipeline_mode<synchronous>, transform_indices = @transform_2, window_bounds = array<i64: 32, 8>}, {pipeline_mode = #tpu.pipeline_mode<synchronous>, transform_indices = @transform_3, window_bounds = array<i64: 32, 8>}, {pipeline_mode = #tpu.pipeline_mode<synchronous>, transform_indices = @transform_4, window_bounds = array<i64: 1, 8>}, {pipeline_mode = #tpu.pipeline_mode<synchronous>, transform_indices = @transform_5, window_bounds = array<i64: 1, 64>}, {transform_indices = @transform_6, window_bounds = array<i64: 16, 64>}]} {
    %c0 = arith.constant 0 : index
    %c0_0 = arith.constant 0 : index
    %0 = vector.load %arg1[%c0, %c0_0] : memref<16x32xf32, #tpu.memory_space<vmem>>, vector<16x32xf32>
    %c0_1 = arith.constant 0 : index
    %c0_2 = arith.constant 0 : index
    %1 = vector.load %arg3[%c0_1, %c0_2] : memref<32x8xf32, #tpu.memory_space<vmem>>, vector<32x8xf32>
    %cst = arith.constant dense<0.000000e+00> : vector<16x8xf32>
    %2 = tpu.matmul %0, %1, %cst {dimension_numbers = #tpu.dot_dimension_numbers<[1], [0], [0], [1], [0, 0, 1, 1], [], []>} : vector<16x32xf32>, vector<32x8xf32>, vector<16x8xf32> -> vector<16x8xf32>
    %c0_3 = arith.constant 0 : index
    %c0_4 = arith.constant 0 : index
    %3 = vector.load %arg2[%c0_3, %c0_4] : memref<16x32xf32, #tpu.memory_space<vmem>>, vector<16x32xf32>
    %c0_5 = arith.constant 0 : index
    %c0_6 = arith.constant 0 : index
    %4 = vector.load %arg4[%c0_5, %c0_6] : memref<32x8xf32, #tpu.memory_space<vmem>>, vector<32x8xf32>
    %cst_7 = arith.constant dense<0.000000e+00> : vector<16x8xf32>
    %5 = tpu.matmul %3, %4, %cst_7 {dimension_numbers = #tpu.dot_dimension_numbers<[1], [0], [0], [1], [0, 0, 1, 1], [], []>} : vector<16x32xf32>, vector<32x8xf32>, vector<16x8xf32> -> vector<16x8xf32>
    %6 = arith.addf %2, %5 : vector<16x8xf32>
    %c0_8 = arith.constant 0 : index
    %c0_9 = arith.constant 0 : index
    %7 = vector.load %arg5[%c0_8, %c0_9] : memref<1x8xf32, #tpu.memory_space<vmem>>, vector<1x8xf32>
    %8 = vector.broadcast %7 : vector<1x8xf32> to vector<16x8xf32>
    %9 = arith.addf %6, %8 : vector<16x8xf32>
    %10 = tpu.concatenate %9, %9, %9, %9, %9, %9, %9, %9 in 1 : vector<16x8xf32>, vector<16x8xf32>, vector<16x8xf32>, vector<16x8xf32>, vector<16x8xf32>, vector<16x8xf32>, vector<16x8xf32>, vector<16x8xf32> -> vector<16x64xf32>
    %c0_10 = arith.constant 0 : index
    %c0_11 = arith.constant 0 : index
    %11 = vector.load %arg6[%c0_10, %c0_11] : memref<1x64xf32, #tpu.memory_space<vmem>>, vector<1x64xf32>
    %12 = vector.broadcast %11 : vector<1x64xf32> to vector<16x64xf32>
    %13 = arith.addf %10, %12 : vector<16x64xf32>
    %c0_12 = arith.constant 0 : index
    %c0_13 = arith.constant 0 : index
    %14 = vector.load %arg7[%c0_12, %c0_13] : memref<16x64xf32, #tpu.memory_space<vmem>>, vector<16x64xf32>
    tpu.vector_store %arg7[%c0_12, %c0_13], %13 {strides = array<i32>} : memref<16x64xf32, #tpu.memory_space<vmem>>, vector<16x64xf32>,
    return
  }
  func.func @transform_0(%arg0: i32) -> (i32, i32) {
    %c0_i32 = arith.constant 0 : i32
    %c0_i32_0 = arith.constant 0 : i32
    return %arg0, %c0_i32 : i32, i32
  }
  func.func @transform_1(%arg0: i32) -> (i32, i32) {
    %c0_i32 = arith.constant 0 : i32
    %c0_i32_0 = arith.constant 0 : i32
    return %arg0, %c0_i32 : i32, i32
  }
  func.func @transform_2(%arg0: i32) -> (i32, i32) {
    %c0_i32 = arith.constant 0 : i32
    %c0_i32_0 = arith.constant 0 : i32
    %c0_i32_1 = arith.constant 0 : i32
    return %c0_i32, %c0_i32_0 : i32, i32
  }
  func.func @transform_3(%arg0: i32) -> (i32, i32) {
    %c0_i32 = arith.constant 0 : i32
    %c0_i32_0 = arith.constant 0 : i32
    %c0_i32_1 = arith.constant 0 : i32
    return %c0_i32, %c0_i32_0 : i32, i32
  }
  func.func @transform_4(%arg0: i32) -> (i32, i32) {
    %c0_i32 = arith.constant 0 : i32
    %c0_i32_0 = arith.constant 0 : i32
    %c0_i32_1 = arith.constant 0 : i32
    return %c0_i32, %c0_i32_0 : i32, i32
  }
  func.func @transform_5(%arg0: i32) -> (i32, i32) {
    %c0_i32 = arith.constant 0 : i32
    %c0_i32_0 = arith.constant 0 : i32
    %c0_i32_1 = arith.constant 0 : i32
    return %c0_i32, %c0_i32_0 : i32, i32
  }
  func.func @transform_6(%arg0: i32) -> (i32, i32) {
    %c0_i32 = arith.constant 0 : i32
    %c0_i32_0 = arith.constant 0 : i32
    return %arg0, %c0_i32 : i32, i32
  }
}

module attributes {stable_mosaic.version = 11 : i64} {
  func.func @bilstm_kernel(%arg0: i32, %arg1: memref<2x8x128xf32, #tpu.memory_space<vmem>>, %arg2: memref<2x8x128xf32, #tpu.memory_space<vmem>>, %arg3: memref<2x1xi32, #tpu.memory_space<vmem>>, %arg4: memref<64x256xf32, #tpu.memory_space<vmem>>, %arg5: memref<2x8x32xf32, #tpu.memory_space<vmem>>, %arg6: memref<2x8x32xf32, #tpu.memory_space<vmem>>, %arg7: memref<2x64xf32, #tpu.memory_space<vmem>>, %arg8: memref<2x64xf32, #tpu.memory_space<vmem>>) attributes {dimension_semantics = [#tpu.dimension_semantics<arbitrary>], iteration_bounds = array<i64: 1>, scalar_prefetch = 0 : i64, scratch_operands = 2 : i64, tpu.core_type = #tpu.core_type<tc>, window_params = [{transform_indices = @transform_0, window_bounds = array<i64: 2, 8, 128>}, {transform_indices = @transform_1, window_bounds = array<i64: 2, 8, 128>}, {pipeline_mode = #tpu.pipeline_mode<synchronous>, transform_indices = @transform_2, window_bounds = array<i64: 2, 1>}, {pipeline_mode = #tpu.pipeline_mode<synchronous>, transform_indices = @transform_3, window_bounds = array<i64: 64, 256>}, {transform_indices = @transform_4, window_bounds = array<i64: 2, 8, 32>}, {transform_indices = @transform_5, window_bounds = array<i64: 2, 8, 32>}]} {
    %c0_i32 = arith.constant 0 : i32
    %0 = arith.cmpi eq, %arg0, %c0_i32 : i32
    %1 = arith.extui %0 : i1 to i32
    %c0_i32_0 = arith.constant 0 : i32
    %2 = arith.cmpi ne, %1, %c0_i32_0 : i32
    scf.if %2 {
      %cst_204 = arith.constant 0.000000e+00 : f32
      %937 = vector.broadcast %cst_204 : f32 to vector<2x64xf32>
      %c0_205 = arith.constant 0 : index
      %c0_206 = arith.constant 0 : index
      %938 = vector.load %arg7[%c0_205, %c0_206] : memref<2x64xf32, #tpu.memory_space<vmem>>, vector<2x64xf32>
      tpu.vector_store %arg7[%c0_205, %c0_206], %937 {strides = array<i32>} : memref<2x64xf32, #tpu.memory_space<vmem>>, vector<2x64xf32>,
      %cst_207 = arith.constant 0.000000e+00 : f32
      %939 = vector.broadcast %cst_207 : f32 to vector<2x64xf32>
      %c0_208 = arith.constant 0 : index
      %c0_209 = arith.constant 0 : index
      %940 = vector.load %arg8[%c0_208, %c0_209] : memref<2x64xf32, #tpu.memory_space<vmem>>, vector<2x64xf32>
      tpu.vector_store %arg8[%c0_208, %c0_209], %939 {strides = array<i32>} : memref<2x64xf32, #tpu.memory_space<vmem>>, vector<2x64xf32>,
    } else {
    }
    %c0 = arith.constant 0 : index
    %c0_1 = arith.constant 0 : index
    %3 = vector.load %arg3[%c0, %c0_1] : memref<2x1xi32, #tpu.memory_space<vmem>>, vector<2x1xi32>
    %c0_2 = arith.constant 0 : index
    %c0_3 = arith.constant 0 : index
    %4 = vector.load %arg4[%c0_2, %c0_3] : memref<64x256xf32, #tpu.memory_space<vmem>>, vector<64x256xf32>
    %c0_4 = arith.constant 0 : index
    %c0_5 = arith.constant 0 : index
    %5 = vector.load %arg7[%c0_4, %c0_5] : memref<2x64xf32, #tpu.memory_space<vmem>>, vector<2x64xf32>
    %c0_6 = arith.constant 0 : index
    %c0_7 = arith.constant 0 : index
    %6 = vector.load %arg8[%c0_6, %c0_7] : memref<2x64xf32, #tpu.memory_space<vmem>>, vector<2x64xf32>
    %c8_i32 = arith.constant 8 : i32
    %7 = arith.muli %arg0, %c8_i32 : i32
    %c0_i32_8 = arith.constant 0 : i32
    %8 = arith.addi %7, %c0_i32_8 : i32
    %c7_i32 = arith.constant 7 : i32
    %9 = arith.subi %c7_i32, %8 : i32
    %c0_9 = arith.constant 0 : index
    %c0_10 = arith.constant 0 : index
    %c0_11 = arith.constant 0 : index
    %10 = vector.load %arg1[%c0_9, %c0_10, %c0_11] : memref<2x8x128xf32, #tpu.memory_space<vmem>>, vector<2x1x128xf32>
    %11 = vector.shape_cast %10 : vector<2x1x128xf32> to vector<2x128xf32>
    %c0_12 = arith.constant 0 : index
    %c7 = arith.constant 7 : index
    %c0_13 = arith.constant 0 : index
    %12 = vector.load %arg2[%c0_12, %c7, %c0_13] : memref<2x8x128xf32, #tpu.memory_space<vmem>>, vector<2x1x128xf32>
    %13 = vector.shape_cast %12 : vector<2x1x128xf32> to vector<2x128xf32>
    %14 = tpu.concatenate %11, %13 in 1 : vector<2x128xf32>, vector<2x128xf32> -> vector<2x256xf32>
    %cst = arith.constant dense<0.000000e+00> : vector<2x256xf32>
    %15 = tpu.matmul %5, %4, %cst {dimension_numbers = #tpu.dot_dimension_numbers<[1], [0], [0], [1], [0, 0, 1, 1], [], []>} : vector<2x64xf32>, vector<64x256xf32>, vector<2x256xf32> -> vector<2x256xf32>
    %16 = arith.addf %14, %15 : vector<2x256xf32>
    %17 = vector.extract_strided_slice %16 {offsets = [0, 0], sizes = [2, 128], strides = [1, 1]} : vector<2x256xf32> to vector<2x128xf32>
    %18 = vector.extract_strided_slice %16 {offsets = [0, 128], sizes = [2, 128], strides = [1, 1]} : vector<2x256xf32> to vector<2x128xf32>
    %19 = vector.extract_strided_slice %6 {offsets = [0, 0], sizes = [2, 32], strides = [1, 1]} : vector<2x64xf32> to vector<2x32xf32>
    %20 = vector.extract_strided_slice %17 {offsets = [0, 0], sizes = [2, 32], strides = [1, 1]} : vector<2x128xf32> to vector<2x32xf32>
    %21 = arith.negf %20 : vector<2x32xf32>
    %22 = math.exp %21 : vector<2x32xf32>
    %cst_14 = arith.constant 1.000000e+00 : f32
    %23 = vector.broadcast %cst_14 : f32 to vector<2x32xf32>
    %24 = arith.addf %23, %22 : vector<2x32xf32>
    %25 = arith.divf %23, %24 : vector<2x32xf32>
    %26 = vector.extract_strided_slice %17 {offsets = [0, 32], sizes = [2, 32], strides = [1, 1]} : vector<2x128xf32> to vector<2x32xf32>
    %27 = arith.negf %26 : vector<2x32xf32>
    %28 = math.exp %27 : vector<2x32xf32>
    %cst_15 = arith.constant 1.000000e+00 : f32
    %29 = vector.broadcast %cst_15 : f32 to vector<2x32xf32>
    %30 = arith.addf %29, %28 : vector<2x32xf32>
    %31 = arith.divf %29, %30 : vector<2x32xf32>
    %32 = vector.extract_strided_slice %17 {offsets = [0, 64], sizes = [2, 32], strides = [1, 1]} : vector<2x128xf32> to vector<2x32xf32>
    %33 = math.tanh %32 : vector<2x32xf32>
    %34 = vector.extract_strided_slice %17 {offsets = [0, 96], sizes = [2, 32], strides = [1, 1]} : vector<2x128xf32> to vector<2x32xf32>
    %35 = arith.negf %34 : vector<2x32xf32>
    %36 = math.exp %35 : vector<2x32xf32>
    %cst_16 = arith.constant 1.000000e+00 : f32
    %37 = vector.broadcast %cst_16 : f32 to vector<2x32xf32>
    %38 = arith.addf %37, %36 : vector<2x32xf32>
    %39 = arith.divf %37, %38 : vector<2x32xf32>
    %40 = arith.mulf %31, %19 : vector<2x32xf32>
    %41 = arith.mulf %25, %33 : vector<2x32xf32>
    %42 = arith.addf %40, %41 : vector<2x32xf32>
    %43 = math.tanh %42 : vector<2x32xf32>
    %44 = arith.mulf %39, %43 : vector<2x32xf32>
    %45 = vector.extract_strided_slice %6 {offsets = [0, 32], sizes = [2, 32], strides = [1, 1]} : vector<2x64xf32> to vector<2x32xf32>
    %46 = vector.extract_strided_slice %18 {offsets = [0, 0], sizes = [2, 32], strides = [1, 1]} : vector<2x128xf32> to vector<2x32xf32>
    %47 = arith.negf %46 : vector<2x32xf32>
    %48 = math.exp %47 : vector<2x32xf32>
    %cst_17 = arith.constant 1.000000e+00 : f32
    %49 = vector.broadcast %cst_17 : f32 to vector<2x32xf32>
    %50 = arith.addf %49, %48 : vector<2x32xf32>
    %51 = arith.divf %49, %50 : vector<2x32xf32>
    %52 = vector.extract_strided_slice %18 {offsets = [0, 32], sizes = [2, 32], strides = [1, 1]} : vector<2x128xf32> to vector<2x32xf32>
    %53 = arith.negf %52 : vector<2x32xf32>
    %54 = math.exp %53 : vector<2x32xf32>
    %cst_18 = arith.constant 1.000000e+00 : f32
    %55 = vector.broadcast %cst_18 : f32 to vector<2x32xf32>
    %56 = arith.addf %55, %54 : vector<2x32xf32>
    %57 = arith.divf %55, %56 : vector<2x32xf32>
    %58 = vector.extract_strided_slice %18 {offsets = [0, 64], sizes = [2, 32], strides = [1, 1]} : vector<2x128xf32> to vector<2x32xf32>
    %59 = math.tanh %58 : vector<2x32xf32>
    %60 = vector.extract_strided_slice %18 {offsets = [0, 96], sizes = [2, 32], strides = [1, 1]} : vector<2x128xf32> to vector<2x32xf32>
    %61 = arith.negf %60 : vector<2x32xf32>
    %62 = math.exp %61 : vector<2x32xf32>
    %cst_19 = arith.constant 1.000000e+00 : f32
    %63 = vector.broadcast %cst_19 : f32 to vector<2x32xf32>
    %64 = arith.addf %63, %62 : vector<2x32xf32>
    %65 = arith.divf %63, %64 : vector<2x32xf32>
    %66 = arith.mulf %57, %45 : vector<2x32xf32>
    %67 = arith.mulf %51, %59 : vector<2x32xf32>
    %68 = arith.addf %66, %67 : vector<2x32xf32>
    %69 = math.tanh %68 : vector<2x32xf32>
    %70 = arith.mulf %65, %69 : vector<2x32xf32>
    %71 = vector.broadcast %8 : i32 to vector<2x1xi32>
    %72 = arith.cmpi sgt, %3, %71 : vector<2x1xi32>
    %73 = arith.extui %72 : vector<2x1xi1> to vector<2x1xi32>
    %74 = arith.sitofp %73 : vector<2x1xi32> to vector<2x1xf32>
    %75 = vector.broadcast %9 : i32 to vector<2x1xi32>
    %76 = arith.cmpi sgt, %3, %75 : vector<2x1xi32>
    %77 = arith.extui %76 : vector<2x1xi1> to vector<2x1xi32>
    %78 = arith.sitofp %77 : vector<2x1xi32> to vector<2x1xf32>
    %79 = vector.broadcast %74 : vector<2x1xf32> to vector<2x32xf32>
    %80 = arith.mulf %79, %44 : vector<2x32xf32>
    %c0_20 = arith.constant 0 : index
    %c0_21 = arith.constant 0 : index
    %c0_22 = arith.constant 0 : index
    %81 = vector.load %arg5[%c0_20, %c0_21, %c0_22] : memref<2x8x32xf32, #tpu.memory_space<vmem>>, vector<2x1x32xf32>
    %82 = vector.shape_cast %81 : vector<2x1x32xf32> to vector<2x32xf32>
    %83 = vector.shape_cast %80 : vector<2x32xf32> to vector<2x1x32xf32>
    tpu.vector_store %arg5[%c0_20, %c0_21, %c0_22], %83 {strides = array<i32>} : memref<2x8x32xf32, #tpu.memory_space<vmem>>, vector<2x1x32xf32>,
    %84 = vector.broadcast %78 : vector<2x1xf32> to vector<2x32xf32>
    %85 = arith.mulf %84, %70 : vector<2x32xf32>
    %c0_23 = arith.constant 0 : index
    %c7_24 = arith.constant 7 : index
    %c0_25 = arith.constant 0 : index
    %86 = vector.load %arg6[%c0_23, %c7_24, %c0_25] : memref<2x8x32xf32, #tpu.memory_space<vmem>>, vector<2x1x32xf32>
    %87 = vector.shape_cast %86 : vector<2x1x32xf32> to vector<2x32xf32>
    %88 = vector.shape_cast %85 : vector<2x32xf32> to vector<2x1x32xf32>
    tpu.vector_store %arg6[%c0_23, %c7_24, %c0_25], %88 {strides = array<i32>} : memref<2x8x32xf32, #tpu.memory_space<vmem>>, vector<2x1x32xf32>,
    %89 = vector.broadcast %74 : vector<2x1xf32> to vector<2x32xf32>
    %90 = arith.mulf %89, %44 : vector<2x32xf32>
    %cst_26 = arith.constant 1.000000e+00 : f32
    %91 = vector.broadcast %cst_26 : f32 to vector<2x1xf32>
    %92 = arith.subf %91, %74 : vector<2x1xf32>
    %93 = vector.extract_strided_slice %5 {offsets = [0, 0], sizes = [2, 32], strides = [1, 1]} : vector<2x64xf32> to vector<2x32xf32>
    %94 = vector.broadcast %92 : vector<2x1xf32> to vector<2x32xf32>
    %95 = arith.mulf %94, %93 : vector<2x32xf32>
    %96 = arith.addf %90, %95 : vector<2x32xf32>
    %97 = vector.broadcast %78 : vector<2x1xf32> to vector<2x32xf32>
    %98 = arith.mulf %97, %70 : vector<2x32xf32>
    %cst_27 = arith.constant 1.000000e+00 : f32
    %99 = vector.broadcast %cst_27 : f32 to vector<2x1xf32>
    %100 = arith.subf %99, %78 : vector<2x1xf32>
    %101 = vector.extract_strided_slice %5 {offsets = [0, 32], sizes = [2, 32], strides = [1, 1]} : vector<2x64xf32> to vector<2x32xf32>
    %102 = vector.broadcast %100 : vector<2x1xf32> to vector<2x32xf32>
    %103 = arith.mulf %102, %101 : vector<2x32xf32>
    %104 = arith.addf %98, %103 : vector<2x32xf32>
    %105 = tpu.concatenate %96, %104 in 1 : vector<2x32xf32>, vector<2x32xf32> -> vector<2x64xf32>
    %106 = vector.broadcast %74 : vector<2x1xf32> to vector<2x32xf32>
    %107 = arith.mulf %106, %42 : vector<2x32xf32>
    %cst_28 = arith.constant 1.000000e+00 : f32
    %108 = vector.broadcast %cst_28 : f32 to vector<2x1xf32>
    %109 = arith.subf %108, %74 : vector<2x1xf32>
    %110 = vector.extract_strided_slice %6 {offsets = [0, 0], sizes = [2, 32], strides = [1, 1]} : vector<2x64xf32> to vector<2x32xf32>
    %111 = vector.broadcast %109 : vector<2x1xf32> to vector<2x32xf32>
    %112 = arith.mulf %111, %110 : vector<2x32xf32>
    %113 = arith.addf %107, %112 : vector<2x32xf32>
    %114 = vector.broadcast %78 : vector<2x1xf32> to vector<2x32xf32>
    %115 = arith.mulf %114, %68 : vector<2x32xf32>
    %cst_29 = arith.constant 1.000000e+00 : f32
    %116 = vector.broadcast %cst_29 : f32 to vector<2x1xf32>
    %117 = arith.subf %116, %78 : vector<2x1xf32>
    %118 = vector.extract_strided_slice %6 {offsets = [0, 32], sizes = [2, 32], strides = [1, 1]} : vector<2x64xf32> to vector<2x32xf32>
    %119 = vector.broadcast %117 : vector<2x1xf32> to vector<2x32xf32>
    %120 = arith.mulf %119, %118 : vector<2x32xf32>
    %121 = arith.addf %115, %120 : vector<2x32xf32>
    %122 = tpu.concatenate %113, %121 in 1 : vector<2x32xf32>, vector<2x32xf32> -> vector<2x64xf32>
    %c8_i32_30 = arith.constant 8 : i32
    %123 = arith.muli %arg0, %c8_i32_30 : i32
    %c1_i32 = arith.constant 1 : i32
    %124 = arith.addi %123, %c1_i32 : i32
    %c7_i32_31 = arith.constant 7 : i32
    %125 = arith.subi %c7_i32_31, %124 : i32
    %c0_32 = arith.constant 0 : index
    %c1 = arith.constant 1 : index
    %c0_33 = arith.constant 0 : index
    %126 = vector.load %arg1[%c0_32, %c1, %c0_33] : memref<2x8x128xf32, #tpu.memory_space<vmem>>, vector<2x1x128xf32>
    %127 = vector.shape_cast %126 : vector<2x1x128xf32> to vector<2x128xf32>
    %c0_34 = arith.constant 0 : index
    %c6 = arith.constant 6 : index
    %c0_35 = arith.constant 0 : index
    %128 = vector.load %arg2[%c0_34, %c6, %c0_35] : memref<2x8x128xf32, #tpu.memory_space<vmem>>, vector<2x1x128xf32>
    %129 = vector.shape_cast %128 : vector<2x1x128xf32> to vector<2x128xf32>
    %130 = tpu.concatenate %127, %129 in 1 : vector<2x128xf32>, vector<2x128xf32> -> vector<2x256xf32>
    %cst_36 = arith.constant dense<0.000000e+00> : vector<2x256xf32>
    %131 = tpu.matmul %105, %4, %cst_36 {dimension_numbers = #tpu.dot_dimension_numbers<[1], [0], [0], [1], [0, 0, 1, 1], [], []>} : vector<2x64xf32>, vector<64x256xf32>, vector<2x256xf32> -> vector<2x256xf32>
    %132 = arith.addf %130, %131 : vector<2x256xf32>
    %133 = vector.extract_strided_slice %132 {offsets = [0, 0], sizes = [2, 128], strides = [1, 1]} : vector<2x256xf32> to vector<2x128xf32>
    %134 = vector.extract_strided_slice %132 {offsets = [0, 128], sizes = [2, 128], strides = [1, 1]} : vector<2x256xf32> to vector<2x128xf32>
    %135 = vector.extract_strided_slice %122 {offsets = [0, 0], sizes = [2, 32], strides = [1, 1]} : vector<2x64xf32> to vector<2x32xf32>
    %136 = vector.extract_strided_slice %133 {offsets = [0, 0], sizes = [2, 32], strides = [1, 1]} : vector<2x128xf32> to vector<2x32xf32>
    %137 = arith.negf %136 : vector<2x32xf32>
    %138 = math.exp %137 : vector<2x32xf32>
    %cst_37 = arith.constant 1.000000e+00 : f32
    %139 = vector.broadcast %cst_37 : f32 to vector<2x32xf32>
    %140 = arith.addf %139, %138 : vector<2x32xf32>
    %141 = arith.divf %139, %140 : vector<2x32xf32>
    %142 = vector.extract_strided_slice %133 {offsets = [0, 32], sizes = [2, 32], strides = [1, 1]} : vector<2x128xf32> to vector<2x32xf32>
    %143 = arith.negf %142 : vector<2x32xf32>
    %144 = math.exp %143 : vector<2x32xf32>
    %cst_38 = arith.constant 1.000000e+00 : f32
    %145 = vector.broadcast %cst_38 : f32 to vector<2x32xf32>
    %146 = arith.addf %145, %144 : vector<2x32xf32>
    %147 = arith.divf %145, %146 : vector<2x32xf32>
    %148 = vector.extract_strided_slice %133 {offsets = [0, 64], sizes = [2, 32], strides = [1, 1]} : vector<2x128xf32> to vector<2x32xf32>
    %149 = math.tanh %148 : vector<2x32xf32>
    %150 = vector.extract_strided_slice %133 {offsets = [0, 96], sizes = [2, 32], strides = [1, 1]} : vector<2x128xf32> to vector<2x32xf32>
    %151 = arith.negf %150 : vector<2x32xf32>
    %152 = math.exp %151 : vector<2x32xf32>
    %cst_39 = arith.constant 1.000000e+00 : f32
    %153 = vector.broadcast %cst_39 : f32 to vector<2x32xf32>
    %154 = arith.addf %153, %152 : vector<2x32xf32>
    %155 = arith.divf %153, %154 : vector<2x32xf32>
    %156 = arith.mulf %147, %135 : vector<2x32xf32>
    %157 = arith.mulf %141, %149 : vector<2x32xf32>
    %158 = arith.addf %156, %157 : vector<2x32xf32>
    %159 = math.tanh %158 : vector<2x32xf32>
    %160 = arith.mulf %155, %159 : vector<2x32xf32>
    %161 = vector.extract_strided_slice %122 {offsets = [0, 32], sizes = [2, 32], strides = [1, 1]} : vector<2x64xf32> to vector<2x32xf32>
    %162 = vector.extract_strided_slice %134 {offsets = [0, 0], sizes = [2, 32], strides = [1, 1]} : vector<2x128xf32> to vector<2x32xf32>
    %163 = arith.negf %162 : vector<2x32xf32>
    %164 = math.exp %163 : vector<2x32xf32>
    %cst_40 = arith.constant 1.000000e+00 : f32
    %165 = vector.broadcast %cst_40 : f32 to vector<2x32xf32>
    %166 = arith.addf %165, %164 : vector<2x32xf32>
    %167 = arith.divf %165, %166 : vector<2x32xf32>
    %168 = vector.extract_strided_slice %134 {offsets = [0, 32], sizes = [2, 32], strides = [1, 1]} : vector<2x128xf32> to vector<2x32xf32>
    %169 = arith.negf %168 : vector<2x32xf32>
    %170 = math.exp %169 : vector<2x32xf32>
    %cst_41 = arith.constant 1.000000e+00 : f32
    %171 = vector.broadcast %cst_41 : f32 to vector<2x32xf32>
    %172 = arith.addf %171, %170 : vector<2x32xf32>
    %173 = arith.divf %171, %172 : vector<2x32xf32>
    %174 = vector.extract_strided_slice %134 {offsets = [0, 64], sizes = [2, 32], strides = [1, 1]} : vector<2x128xf32> to vector<2x32xf32>
    %175 = math.tanh %174 : vector<2x32xf32>
    %176 = vector.extract_strided_slice %134 {offsets = [0, 96], sizes = [2, 32], strides = [1, 1]} : vector<2x128xf32> to vector<2x32xf32>
    %177 = arith.negf %176 : vector<2x32xf32>
    %178 = math.exp %177 : vector<2x32xf32>
    %cst_42 = arith.constant 1.000000e+00 : f32
    %179 = vector.broadcast %cst_42 : f32 to vector<2x32xf32>
    %180 = arith.addf %179, %178 : vector<2x32xf32>
    %181 = arith.divf %179, %180 : vector<2x32xf32>
    %182 = arith.mulf %173, %161 : vector<2x32xf32>
    %183 = arith.mulf %167, %175 : vector<2x32xf32>
    %184 = arith.addf %182, %183 : vector<2x32xf32>
    %185 = math.tanh %184 : vector<2x32xf32>
    %186 = arith.mulf %181, %185 : vector<2x32xf32>
    %187 = vector.broadcast %124 : i32 to vector<2x1xi32>
    %188 = arith.cmpi sgt, %3, %187 : vector<2x1xi32>
    %189 = arith.extui %188 : vector<2x1xi1> to vector<2x1xi32>
    %190 = arith.sitofp %189 : vector<2x1xi32> to vector<2x1xf32>
    %191 = vector.broadcast %125 : i32 to vector<2x1xi32>
    %192 = arith.cmpi sgt, %3, %191 : vector<2x1xi32>
    %193 = arith.extui %192 : vector<2x1xi1> to vector<2x1xi32>
    %194 = arith.sitofp %193 : vector<2x1xi32> to vector<2x1xf32>
    %195 = vector.broadcast %190 : vector<2x1xf32> to vector<2x32xf32>
    %196 = arith.mulf %195, %160 : vector<2x32xf32>
    %c0_43 = arith.constant 0 : index
    %c1_44 = arith.constant 1 : index
    %c0_45 = arith.constant 0 : index
    %197 = vector.load %arg5[%c0_43, %c1_44, %c0_45] : memref<2x8x32xf32, #tpu.memory_space<vmem>>, vector<2x1x32xf32>
    %198 = vector.shape_cast %197 : vector<2x1x32xf32> to vector<2x32xf32>
    %199 = vector.shape_cast %196 : vector<2x32xf32> to vector<2x1x32xf32>
    tpu.vector_store %arg5[%c0_43, %c1_44, %c0_45], %199 {strides = array<i32>} : memref<2x8x32xf32, #tpu.memory_space<vmem>>, vector<2x1x32xf32>,
    %200 = vector.broadcast %194 : vector<2x1xf32> to vector<2x32xf32>
    %201 = arith.mulf %200, %186 : vector<2x32xf32>
    %c0_46 = arith.constant 0 : index
    %c6_47 = arith.constant 6 : index
    %c0_48 = arith.constant 0 : index
    %202 = vector.load %arg6[%c0_46, %c6_47, %c0_48] : memref<2x8x32xf32, #tpu.memory_space<vmem>>, vector<2x1x32xf32>
    %203 = vector.shape_cast %202 : vector<2x1x32xf32> to vector<2x32xf32>
    %204 = vector.shape_cast %201 : vector<2x32xf32> to vector<2x1x32xf32>
    tpu.vector_store %arg6[%c0_46, %c6_47, %c0_48], %204 {strides = array<i32>} : memref<2x8x32xf32, #tpu.memory_space<vmem>>, vector<2x1x32xf32>,
    %205 = vector.broadcast %190 : vector<2x1xf32> to vector<2x32xf32>
    %206 = arith.mulf %205, %160 : vector<2x32xf32>
    %cst_49 = arith.constant 1.000000e+00 : f32
    %207 = vector.broadcast %cst_49 : f32 to vector<2x1xf32>
    %208 = arith.subf %207, %190 : vector<2x1xf32>
    %209 = vector.extract_strided_slice %105 {offsets = [0, 0], sizes = [2, 32], strides = [1, 1]} : vector<2x64xf32> to vector<2x32xf32>
    %210 = vector.broadcast %208 : vector<2x1xf32> to vector<2x32xf32>
    %211 = arith.mulf %210, %209 : vector<2x32xf32>
    %212 = arith.addf %206, %211 : vector<2x32xf32>
    %213 = vector.broadcast %194 : vector<2x1xf32> to vector<2x32xf32>
    %214 = arith.mulf %213, %186 : vector<2x32xf32>
    %cst_50 = arith.constant 1.000000e+00 : f32
    %215 = vector.broadcast %cst_50 : f32 to vector<2x1xf32>
    %216 = arith.subf %215, %194 : vector<2x1xf32>
    %217 = vector.extract_strided_slice %105 {offsets = [0, 32], sizes = [2, 32], strides = [1, 1]} : vector<2x64xf32> to vector<2x32xf32>
    %218 = vector.broadcast %216 : vector<2x1xf32> to vector<2x32xf32>
    %219 = arith.mulf %218, %217 : vector<2x32xf32>
    %220 = arith.addf %214, %219 : vector<2x32xf32>
    %221 = tpu.concatenate %212, %220 in 1 : vector<2x32xf32>, vector<2x32xf32> -> vector<2x64xf32>
    %222 = vector.broadcast %190 : vector<2x1xf32> to vector<2x32xf32>
    %223 = arith.mulf %222, %158 : vector<2x32xf32>
    %cst_51 = arith.constant 1.000000e+00 : f32
    %224 = vector.broadcast %cst_51 : f32 to vector<2x1xf32>
    %225 = arith.subf %224, %190 : vector<2x1xf32>
    %226 = vector.extract_strided_slice %122 {offsets = [0, 0], sizes = [2, 32], strides = [1, 1]} : vector<2x64xf32> to vector<2x32xf32>
    %227 = vector.broadcast %225 : vector<2x1xf32> to vector<2x32xf32>
    %228 = arith.mulf %227, %226 : vector<2x32xf32>
    %229 = arith.addf %223, %228 : vector<2x32xf32>
    %230 = vector.broadcast %194 : vector<2x1xf32> to vector<2x32xf32>
    %231 = arith.mulf %230, %184 : vector<2x32xf32>
    %cst_52 = arith.constant 1.000000e+00 : f32
    %232 = vector.broadcast %cst_52 : f32 to vector<2x1xf32>
    %233 = arith.subf %232, %194 : vector<2x1xf32>
    %234 = vector.extract_strided_slice %122 {offsets = [0, 32], sizes = [2, 32], strides = [1, 1]} : vector<2x64xf32> to vector<2x32xf32>
    %235 = vector.broadcast %233 : vector<2x1xf32> to vector<2x32xf32>
    %236 = arith.mulf %235, %234 : vector<2x32xf32>
    %237 = arith.addf %231, %236 : vector<2x32xf32>
    %238 = tpu.concatenate %229, %237 in 1 : vector<2x32xf32>, vector<2x32xf32> -> vector<2x64xf32>
    %c8_i32_53 = arith.constant 8 : i32
    %239 = arith.muli %arg0, %c8_i32_53 : i32
    %c2_i32 = arith.constant 2 : i32
    %240 = arith.addi %239, %c2_i32 : i32
    %c7_i32_54 = arith.constant 7 : i32
    %241 = arith.subi %c7_i32_54, %240 : i32
    %c0_55 = arith.constant 0 : index
    %c2 = arith.constant 2 : index
    %c0_56 = arith.constant 0 : index
    %242 = vector.load %arg1[%c0_55, %c2, %c0_56] : memref<2x8x128xf32, #tpu.memory_space<vmem>>, vector<2x1x128xf32>
    %243 = vector.shape_cast %242 : vector<2x1x128xf32> to vector<2x128xf32>
    %c0_57 = arith.constant 0 : index
    %c5 = arith.constant 5 : index
    %c0_58 = arith.constant 0 : index
    %244 = vector.load %arg2[%c0_57, %c5, %c0_58] : memref<2x8x128xf32, #tpu.memory_space<vmem>>, vector<2x1x128xf32>
    %245 = vector.shape_cast %244 : vector<2x1x128xf32> to vector<2x128xf32>
    %246 = tpu.concatenate %243, %245 in 1 : vector<2x128xf32>, vector<2x128xf32> -> vector<2x256xf32>
    %cst_59 = arith.constant dense<0.000000e+00> : vector<2x256xf32>
    %247 = tpu.matmul %221, %4, %cst_59 {dimension_numbers = #tpu.dot_dimension_numbers<[1], [0], [0], [1], [0, 0, 1, 1], [], []>} : vector<2x64xf32>, vector<64x256xf32>, vector<2x256xf32> -> vector<2x256xf32>
    %248 = arith.addf %246, %247 : vector<2x256xf32>
    %249 = vector.extract_strided_slice %248 {offsets = [0, 0], sizes = [2, 128], strides = [1, 1]} : vector<2x256xf32> to vector<2x128xf32>
    %250 = vector.extract_strided_slice %248 {offsets = [0, 128], sizes = [2, 128], strides = [1, 1]} : vector<2x256xf32> to vector<2x128xf32>
    %251 = vector.extract_strided_slice %238 {offsets = [0, 0], sizes = [2, 32], strides = [1, 1]} : vector<2x64xf32> to vector<2x32xf32>
    %252 = vector.extract_strided_slice %249 {offsets = [0, 0], sizes = [2, 32], strides = [1, 1]} : vector<2x128xf32> to vector<2x32xf32>
    %253 = arith.negf %252 : vector<2x32xf32>
    %254 = math.exp %253 : vector<2x32xf32>
    %cst_60 = arith.constant 1.000000e+00 : f32
    %255 = vector.broadcast %cst_60 : f32 to vector<2x32xf32>
    %256 = arith.addf %255, %254 : vector<2x32xf32>
    %257 = arith.divf %255, %256 : vector<2x32xf32>
    %258 = vector.extract_strided_slice %249 {offsets = [0, 32], sizes = [2, 32], strides = [1, 1]} : vector<2x128xf32> to vector<2x32xf32>
    %259 = arith.negf %258 : vector<2x32xf32>
    %260 = math.exp %259 : vector<2x32xf32>
    %cst_61 = arith.constant 1.000000e+00 : f32
    %261 = vector.broadcast %cst_61 : f32 to vector<2x32xf32>
    %262 = arith.addf %261, %260 : vector<2x32xf32>
    %263 = arith.divf %261, %262 : vector<2x32xf32>
    %264 = vector.extract_strided_slice %249 {offsets = [0, 64], sizes = [2, 32], strides = [1, 1]} : vector<2x128xf32> to vector<2x32xf32>
    %265 = math.tanh %264 : vector<2x32xf32>
    %266 = vector.extract_strided_slice %249 {offsets = [0, 96], sizes = [2, 32], strides = [1, 1]} : vector<2x128xf32> to vector<2x32xf32>
    %267 = arith.negf %266 : vector<2x32xf32>
    %268 = math.exp %267 : vector<2x32xf32>
    %cst_62 = arith.constant 1.000000e+00 : f32
    %269 = vector.broadcast %cst_62 : f32 to vector<2x32xf32>
    %270 = arith.addf %269, %268 : vector<2x32xf32>
    %271 = arith.divf %269, %270 : vector<2x32xf32>
    %272 = arith.mulf %263, %251 : vector<2x32xf32>
    %273 = arith.mulf %257, %265 : vector<2x32xf32>
    %274 = arith.addf %272, %273 : vector<2x32xf32>
    %275 = math.tanh %274 : vector<2x32xf32>
    %276 = arith.mulf %271, %275 : vector<2x32xf32>
    %277 = vector.extract_strided_slice %238 {offsets = [0, 32], sizes = [2, 32], strides = [1, 1]} : vector<2x64xf32> to vector<2x32xf32>
    %278 = vector.extract_strided_slice %250 {offsets = [0, 0], sizes = [2, 32], strides = [1, 1]} : vector<2x128xf32> to vector<2x32xf32>
    %279 = arith.negf %278 : vector<2x32xf32>
    %280 = math.exp %279 : vector<2x32xf32>
    %cst_63 = arith.constant 1.000000e+00 : f32
    %281 = vector.broadcast %cst_63 : f32 to vector<2x32xf32>
    %282 = arith.addf %281, %280 : vector<2x32xf32>
    %283 = arith.divf %281, %282 : vector<2x32xf32>
    %284 = vector.extract_strided_slice %250 {offsets = [0, 32], sizes = [2, 32], strides = [1, 1]} : vector<2x128xf32> to vector<2x32xf32>
    %285 = arith.negf %284 : vector<2x32xf32>
    %286 = math.exp %285 : vector<2x32xf32>
    %cst_64 = arith.constant 1.000000e+00 : f32
    %287 = vector.broadcast %cst_64 : f32 to vector<2x32xf32>
    %288 = arith.addf %287, %286 : vector<2x32xf32>
    %289 = arith.divf %287, %288 : vector<2x32xf32>
    %290 = vector.extract_strided_slice %250 {offsets = [0, 64], sizes = [2, 32], strides = [1, 1]} : vector<2x128xf32> to vector<2x32xf32>
    %291 = math.tanh %290 : vector<2x32xf32>
    %292 = vector.extract_strided_slice %250 {offsets = [0, 96], sizes = [2, 32], strides = [1, 1]} : vector<2x128xf32> to vector<2x32xf32>
    %293 = arith.negf %292 : vector<2x32xf32>
    %294 = math.exp %293 : vector<2x32xf32>
    %cst_65 = arith.constant 1.000000e+00 : f32
    %295 = vector.broadcast %cst_65 : f32 to vector<2x32xf32>
    %296 = arith.addf %295, %294 : vector<2x32xf32>
    %297 = arith.divf %295, %296 : vector<2x32xf32>
    %298 = arith.mulf %289, %277 : vector<2x32xf32>
    %299 = arith.mulf %283, %291 : vector<2x32xf32>
    %300 = arith.addf %298, %299 : vector<2x32xf32>
    %301 = math.tanh %300 : vector<2x32xf32>
    %302 = arith.mulf %297, %301 : vector<2x32xf32>
    %303 = vector.broadcast %240 : i32 to vector<2x1xi32>
    %304 = arith.cmpi sgt, %3, %303 : vector<2x1xi32>
    %305 = arith.extui %304 : vector<2x1xi1> to vector<2x1xi32>
    %306 = arith.sitofp %305 : vector<2x1xi32> to vector<2x1xf32>
    %307 = vector.broadcast %241 : i32 to vector<2x1xi32>
    %308 = arith.cmpi sgt, %3, %307 : vector<2x1xi32>
    %309 = arith.extui %308 : vector<2x1xi1> to vector<2x1xi32>
    %310 = arith.sitofp %309 : vector<2x1xi32> to vector<2x1xf32>
    %311 = vector.broadcast %306 : vector<2x1xf32> to vector<2x32xf32>
    %312 = arith.mulf %311, %276 : vector<2x32xf32>
    %c0_66 = arith.constant 0 : index
    %c2_67 = arith.constant 2 : index
    %c0_68 = arith.constant 0 : index
    %313 = vector.load %arg5[%c0_66, %c2_67, %c0_68] : memref<2x8x32xf32, #tpu.memory_space<vmem>>, vector<2x1x32xf32>
    %314 = vector.shape_cast %313 : vector<2x1x32xf32> to vector<2x32xf32>
    %315 = vector.shape_cast %312 : vector<2x32xf32> to vector<2x1x32xf32>
    tpu.vector_store %arg5[%c0_66, %c2_67, %c0_68], %315 {strides = array<i32>} : memref<2x8x32xf32, #tpu.memory_space<vmem>>, vector<2x1x32xf32>,
    %316 = vector.broadcast %310 : vector<2x1xf32> to vector<2x32xf32>
    %317 = arith.mulf %316, %302 : vector<2x32xf32>
    %c0_69 = arith.constant 0 : index
    %c5_70 = arith.constant 5 : index
    %c0_71 = arith.constant 0 : index
    %318 = vector.load %arg6[%c0_69, %c5_70, %c0_71] : memref<2x8x32xf32, #tpu.memory_space<vmem>>, vector<2x1x32xf32>
    %319 = vector.shape_cast %318 : vector<2x1x32xf32> to vector<2x32xf32>
    %320 = vector.shape_cast %317 : vector<2x32xf32> to vector<2x1x32xf32>
    tpu.vector_store %arg6[%c0_69, %c5_70, %c0_71], %320 {strides = array<i32>} : memref<2x8x32xf32, #tpu.memory_space<vmem>>, vector<2x1x32xf32>,
    %321 = vector.broadcast %306 : vector<2x1xf32> to vector<2x32xf32>
    %322 = arith.mulf %321, %276 : vector<2x32xf32>
    %cst_72 = arith.constant 1.000000e+00 : f32
    %323 = vector.broadcast %cst_72 : f32 to vector<2x1xf32>
    %324 = arith.subf %323, %306 : vector<2x1xf32>
    %325 = vector.extract_strided_slice %221 {offsets = [0, 0], sizes = [2, 32], strides = [1, 1]} : vector<2x64xf32> to vector<2x32xf32>
    %326 = vector.broadcast %324 : vector<2x1xf32> to vector<2x32xf32>
    %327 = arith.mulf %326, %325 : vector<2x32xf32>
    %328 = arith.addf %322, %327 : vector<2x32xf32>
    %329 = vector.broadcast %310 : vector<2x1xf32> to vector<2x32xf32>
    %330 = arith.mulf %329, %302 : vector<2x32xf32>
    %cst_73 = arith.constant 1.000000e+00 : f32
    %331 = vector.broadcast %cst_73 : f32 to vector<2x1xf32>
    %332 = arith.subf %331, %310 : vector<2x1xf32>
    %333 = vector.extract_strided_slice %221 {offsets = [0, 32], sizes = [2, 32], strides = [1, 1]} : vector<2x64xf32> to vector<2x32xf32>
    %334 = vector.broadcast %332 : vector<2x1xf32> to vector<2x32xf32>
    %335 = arith.mulf %334, %333 : vector<2x32xf32>
    %336 = arith.addf %330, %335 : vector<2x32xf32>
    %337 = tpu.concatenate %328, %336 in 1 : vector<2x32xf32>, vector<2x32xf32> -> vector<2x64xf32>
    %338 = vector.broadcast %306 : vector<2x1xf32> to vector<2x32xf32>
    %339 = arith.mulf %338, %274 : vector<2x32xf32>
    %cst_74 = arith.constant 1.000000e+00 : f32
    %340 = vector.broadcast %cst_74 : f32 to vector<2x1xf32>
    %341 = arith.subf %340, %306 : vector<2x1xf32>
    %342 = vector.extract_strided_slice %238 {offsets = [0, 0], sizes = [2, 32], strides = [1, 1]} : vector<2x64xf32> to vector<2x32xf32>
    %343 = vector.broadcast %341 : vector<2x1xf32> to vector<2x32xf32>
    %344 = arith.mulf %343, %342 : vector<2x32xf32>
    %345 = arith.addf %339, %344 : vector<2x32xf32>
    %346 = vector.broadcast %310 : vector<2x1xf32> to vector<2x32xf32>
    %347 = arith.mulf %346, %300 : vector<2x32xf32>
    %cst_75 = arith.constant 1.000000e+00 : f32
    %348 = vector.broadcast %cst_75 : f32 to vector<2x1xf32>
    %349 = arith.subf %348, %310 : vector<2x1xf32>
    %350 = vector.extract_strided_slice %238 {offsets = [0, 32], sizes = [2, 32], strides = [1, 1]} : vector<2x64xf32> to vector<2x32xf32>
    %351 = vector.broadcast %349 : vector<2x1xf32> to vector<2x32xf32>
    %352 = arith.mulf %351, %350 : vector<2x32xf32>
    %353 = arith.addf %347, %352 : vector<2x32xf32>
    %354 = tpu.concatenate %345, %353 in 1 : vector<2x32xf32>, vector<2x32xf32> -> vector<2x64xf32>
    %c8_i32_76 = arith.constant 8 : i32
    %355 = arith.muli %arg0, %c8_i32_76 : i32
    %c3_i32 = arith.constant 3 : i32
    %356 = arith.addi %355, %c3_i32 : i32
    %c7_i32_77 = arith.constant 7 : i32
    %357 = arith.subi %c7_i32_77, %356 : i32
    %c0_78 = arith.constant 0 : index
    %c3 = arith.constant 3 : index
    %c0_79 = arith.constant 0 : index
    %358 = vector.load %arg1[%c0_78, %c3, %c0_79] : memref<2x8x128xf32, #tpu.memory_space<vmem>>, vector<2x1x128xf32>
    %359 = vector.shape_cast %358 : vector<2x1x128xf32> to vector<2x128xf32>
    %c0_80 = arith.constant 0 : index
    %c4 = arith.constant 4 : index
    %c0_81 = arith.constant 0 : index
    %360 = vector.load %arg2[%c0_80, %c4, %c0_81] : memref<2x8x128xf32, #tpu.memory_space<vmem>>, vector<2x1x128xf32>
    %361 = vector.shape_cast %360 : vector<2x1x128xf32> to vector<2x128xf32>
    %362 = tpu.concatenate %359, %361 in 1 : vector<2x128xf32>, vector<2x128xf32> -> vector<2x256xf32>
    %cst_82 = arith.constant dense<0.000000e+00> : vector<2x256xf32>
    %363 = tpu.matmul %337, %4, %cst_82 {dimension_numbers = #tpu.dot_dimension_numbers<[1], [0], [0], [1], [0, 0, 1, 1], [], []>} : vector<2x64xf32>, vector<64x256xf32>, vector<2x256xf32> -> vector<2x256xf32>
    %364 = arith.addf %362, %363 : vector<2x256xf32>
    %365 = vector.extract_strided_slice %364 {offsets = [0, 0], sizes = [2, 128], strides = [1, 1]} : vector<2x256xf32> to vector<2x128xf32>
    %366 = vector.extract_strided_slice %364 {offsets = [0, 128], sizes = [2, 128], strides = [1, 1]} : vector<2x256xf32> to vector<2x128xf32>
    %367 = vector.extract_strided_slice %354 {offsets = [0, 0], sizes = [2, 32], strides = [1, 1]} : vector<2x64xf32> to vector<2x32xf32>
    %368 = vector.extract_strided_slice %365 {offsets = [0, 0], sizes = [2, 32], strides = [1, 1]} : vector<2x128xf32> to vector<2x32xf32>
    %369 = arith.negf %368 : vector<2x32xf32>
    %370 = math.exp %369 : vector<2x32xf32>
    %cst_83 = arith.constant 1.000000e+00 : f32
    %371 = vector.broadcast %cst_83 : f32 to vector<2x32xf32>
    %372 = arith.addf %371, %370 : vector<2x32xf32>
    %373 = arith.divf %371, %372 : vector<2x32xf32>
    %374 = vector.extract_strided_slice %365 {offsets = [0, 32], sizes = [2, 32], strides = [1, 1]} : vector<2x128xf32> to vector<2x32xf32>
    %375 = arith.negf %374 : vector<2x32xf32>
    %376 = math.exp %375 : vector<2x32xf32>
    %cst_84 = arith.constant 1.000000e+00 : f32
    %377 = vector.broadcast %cst_84 : f32 to vector<2x32xf32>
    %378 = arith.addf %377, %376 : vector<2x32xf32>
    %379 = arith.divf %377, %378 : vector<2x32xf32>
    %380 = vector.extract_strided_slice %365 {offsets = [0, 64], sizes = [2, 32], strides = [1, 1]} : vector<2x128xf32> to vector<2x32xf32>
    %381 = math.tanh %380 : vector<2x32xf32>
    %382 = vector.extract_strided_slice %365 {offsets = [0, 96], sizes = [2, 32], strides = [1, 1]} : vector<2x128xf32> to vector<2x32xf32>
    %383 = arith.negf %382 : vector<2x32xf32>
    %384 = math.exp %383 : vector<2x32xf32>
    %cst_85 = arith.constant 1.000000e+00 : f32
    %385 = vector.broadcast %cst_85 : f32 to vector<2x32xf32>
    %386 = arith.addf %385, %384 : vector<2x32xf32>
    %387 = arith.divf %385, %386 : vector<2x32xf32>
    %388 = arith.mulf %379, %367 : vector<2x32xf32>
    %389 = arith.mulf %373, %381 : vector<2x32xf32>
    %390 = arith.addf %388, %389 : vector<2x32xf32>
    %391 = math.tanh %390 : vector<2x32xf32>
    %392 = arith.mulf %387, %391 : vector<2x32xf32>
    %393 = vector.extract_strided_slice %354 {offsets = [0, 32], sizes = [2, 32], strides = [1, 1]} : vector<2x64xf32> to vector<2x32xf32>
    %394 = vector.extract_strided_slice %366 {offsets = [0, 0], sizes = [2, 32], strides = [1, 1]} : vector<2x128xf32> to vector<2x32xf32>
    %395 = arith.negf %394 : vector<2x32xf32>
    %396 = math.exp %395 : vector<2x32xf32>
    %cst_86 = arith.constant 1.000000e+00 : f32
    %397 = vector.broadcast %cst_86 : f32 to vector<2x32xf32>
    %398 = arith.addf %397, %396 : vector<2x32xf32>
    %399 = arith.divf %397, %398 : vector<2x32xf32>
    %400 = vector.extract_strided_slice %366 {offsets = [0, 32], sizes = [2, 32], strides = [1, 1]} : vector<2x128xf32> to vector<2x32xf32>
    %401 = arith.negf %400 : vector<2x32xf32>
    %402 = math.exp %401 : vector<2x32xf32>
    %cst_87 = arith.constant 1.000000e+00 : f32
    %403 = vector.broadcast %cst_87 : f32 to vector<2x32xf32>
    %404 = arith.addf %403, %402 : vector<2x32xf32>
    %405 = arith.divf %403, %404 : vector<2x32xf32>
    %406 = vector.extract_strided_slice %366 {offsets = [0, 64], sizes = [2, 32], strides = [1, 1]} : vector<2x128xf32> to vector<2x32xf32>
    %407 = math.tanh %406 : vector<2x32xf32>
    %408 = vector.extract_strided_slice %366 {offsets = [0, 96], sizes = [2, 32], strides = [1, 1]} : vector<2x128xf32> to vector<2x32xf32>
    %409 = arith.negf %408 : vector<2x32xf32>
    %410 = math.exp %409 : vector<2x32xf32>
    %cst_88 = arith.constant 1.000000e+00 : f32
    %411 = vector.broadcast %cst_88 : f32 to vector<2x32xf32>
    %412 = arith.addf %411, %410 : vector<2x32xf32>
    %413 = arith.divf %411, %412 : vector<2x32xf32>
    %414 = arith.mulf %405, %393 : vector<2x32xf32>
    %415 = arith.mulf %399, %407 : vector<2x32xf32>
    %416 = arith.addf %414, %415 : vector<2x32xf32>
    %417 = math.tanh %416 : vector<2x32xf32>
    %418 = arith.mulf %413, %417 : vector<2x32xf32>
    %419 = vector.broadcast %356 : i32 to vector<2x1xi32>
    %420 = arith.cmpi sgt, %3, %419 : vector<2x1xi32>
    %421 = arith.extui %420 : vector<2x1xi1> to vector<2x1xi32>
    %422 = arith.sitofp %421 : vector<2x1xi32> to vector<2x1xf32>
    %423 = vector.broadcast %357 : i32 to vector<2x1xi32>
    %424 = arith.cmpi sgt, %3, %423 : vector<2x1xi32>
    %425 = arith.extui %424 : vector<2x1xi1> to vector<2x1xi32>
    %426 = arith.sitofp %425 : vector<2x1xi32> to vector<2x1xf32>
    %427 = vector.broadcast %422 : vector<2x1xf32> to vector<2x32xf32>
    %428 = arith.mulf %427, %392 : vector<2x32xf32>
    %c0_89 = arith.constant 0 : index
    %c3_90 = arith.constant 3 : index
    %c0_91 = arith.constant 0 : index
    %429 = vector.load %arg5[%c0_89, %c3_90, %c0_91] : memref<2x8x32xf32, #tpu.memory_space<vmem>>, vector<2x1x32xf32>
    %430 = vector.shape_cast %429 : vector<2x1x32xf32> to vector<2x32xf32>
    %431 = vector.shape_cast %428 : vector<2x32xf32> to vector<2x1x32xf32>
    tpu.vector_store %arg5[%c0_89, %c3_90, %c0_91], %431 {strides = array<i32>} : memref<2x8x32xf32, #tpu.memory_space<vmem>>, vector<2x1x32xf32>,
    %432 = vector.broadcast %426 : vector<2x1xf32> to vector<2x32xf32>
    %433 = arith.mulf %432, %418 : vector<2x32xf32>
    %c0_92 = arith.constant 0 : index
    %c4_93 = arith.constant 4 : index
    %c0_94 = arith.constant 0 : index
    %434 = vector.load %arg6[%c0_92, %c4_93, %c0_94] : memref<2x8x32xf32, #tpu.memory_space<vmem>>, vector<2x1x32xf32>
    %435 = vector.shape_cast %434 : vector<2x1x32xf32> to vector<2x32xf32>
    %436 = vector.shape_cast %433 : vector<2x32xf32> to vector<2x1x32xf32>
    tpu.vector_store %arg6[%c0_92, %c4_93, %c0_94], %436 {strides = array<i32>} : memref<2x8x32xf32, #tpu.memory_space<vmem>>, vector<2x1x32xf32>,
    %437 = vector.broadcast %422 : vector<2x1xf32> to vector<2x32xf32>
    %438 = arith.mulf %437, %392 : vector<2x32xf32>
    %cst_95 = arith.constant 1.000000e+00 : f32
    %439 = vector.broadcast %cst_95 : f32 to vector<2x1xf32>
    %440 = arith.subf %439, %422 : vector<2x1xf32>
    %441 = vector.extract_strided_slice %337 {offsets = [0, 0], sizes = [2, 32], strides = [1, 1]} : vector<2x64xf32> to vector<2x32xf32>
    %442 = vector.broadcast %440 : vector<2x1xf32> to vector<2x32xf32>
    %443 = arith.mulf %442, %441 : vector<2x32xf32>
    %444 = arith.addf %438, %443 : vector<2x32xf32>
    %445 = vector.broadcast %426 : vector<2x1xf32> to vector<2x32xf32>
    %446 = arith.mulf %445, %418 : vector<2x32xf32>
    %cst_96 = arith.constant 1.000000e+00 : f32
    %447 = vector.broadcast %cst_96 : f32 to vector<2x1xf32>
    %448 = arith.subf %447, %426 : vector<2x1xf32>
    %449 = vector.extract_strided_slice %337 {offsets = [0, 32], sizes = [2, 32], strides = [1, 1]} : vector<2x64xf32> to vector<2x32xf32>
    %450 = vector.broadcast %448 : vector<2x1xf32> to vector<2x32xf32>
    %451 = arith.mulf %450, %449 : vector<2x32xf32>
    %452 = arith.addf %446, %451 : vector<2x32xf32>
    %453 = tpu.concatenate %444, %452 in 1 : vector<2x32xf32>, vector<2x32xf32> -> vector<2x64xf32>
    %454 = vector.broadcast %422 : vector<2x1xf32> to vector<2x32xf32>
    %455 = arith.mulf %454, %390 : vector<2x32xf32>
    %cst_97 = arith.constant 1.000000e+00 : f32
    %456 = vector.broadcast %cst_97 : f32 to vector<2x1xf32>
    %457 = arith.subf %456, %422 : vector<2x1xf32>
    %458 = vector.extract_strided_slice %354 {offsets = [0, 0], sizes = [2, 32], strides = [1, 1]} : vector<2x64xf32> to vector<2x32xf32>
    %459 = vector.broadcast %457 : vector<2x1xf32> to vector<2x32xf32>
    %460 = arith.mulf %459, %458 : vector<2x32xf32>
    %461 = arith.addf %455, %460 : vector<2x32xf32>
    %462 = vector.broadcast %426 : vector<2x1xf32> to vector<2x32xf32>
    %463 = arith.mulf %462, %416 : vector<2x32xf32>
    %cst_98 = arith.constant 1.000000e+00 : f32
    %464 = vector.broadcast %cst_98 : f32 to vector<2x1xf32>
    %465 = arith.subf %464, %426 : vector<2x1xf32>
    %466 = vector.extract_strided_slice %354 {offsets = [0, 32], sizes = [2, 32], strides = [1, 1]} : vector<2x64xf32> to vector<2x32xf32>
    %467 = vector.broadcast %465 : vector<2x1xf32> to vector<2x32xf32>
    %468 = arith.mulf %467, %466 : vector<2x32xf32>
    %469 = arith.addf %463, %468 : vector<2x32xf32>
    %470 = tpu.concatenate %461, %469 in 1 : vector<2x32xf32>, vector<2x32xf32> -> vector<2x64xf32>
    %c8_i32_99 = arith.constant 8 : i32
    %471 = arith.muli %arg0, %c8_i32_99 : i32
    %c4_i32 = arith.constant 4 : i32
    %472 = arith.addi %471, %c4_i32 : i32
    %c7_i32_100 = arith.constant 7 : i32
    %473 = arith.subi %c7_i32_100, %472 : i32
    %c0_101 = arith.constant 0 : index
    %c4_102 = arith.constant 4 : index
    %c0_103 = arith.constant 0 : index
    %474 = vector.load %arg1[%c0_101, %c4_102, %c0_103] : memref<2x8x128xf32, #tpu.memory_space<vmem>>, vector<2x1x128xf32>
    %475 = vector.shape_cast %474 : vector<2x1x128xf32> to vector<2x128xf32>
    %c0_104 = arith.constant 0 : index
    %c3_105 = arith.constant 3 : index
    %c0_106 = arith.constant 0 : index
    %476 = vector.load %arg2[%c0_104, %c3_105, %c0_106] : memref<2x8x128xf32, #tpu.memory_space<vmem>>, vector<2x1x128xf32>
    %477 = vector.shape_cast %476 : vector<2x1x128xf32> to vector<2x128xf32>
    %478 = tpu.concatenate %475, %477 in 1 : vector<2x128xf32>, vector<2x128xf32> -> vector<2x256xf32>
    %cst_107 = arith.constant dense<0.000000e+00> : vector<2x256xf32>
    %479 = tpu.matmul %453, %4, %cst_107 {dimension_numbers = #tpu.dot_dimension_numbers<[1], [0], [0], [1], [0, 0, 1, 1], [], []>} : vector<2x64xf32>, vector<64x256xf32>, vector<2x256xf32> -> vector<2x256xf32>
    %480 = arith.addf %478, %479 : vector<2x256xf32>
    %481 = vector.extract_strided_slice %480 {offsets = [0, 0], sizes = [2, 128], strides = [1, 1]} : vector<2x256xf32> to vector<2x128xf32>
    %482 = vector.extract_strided_slice %480 {offsets = [0, 128], sizes = [2, 128], strides = [1, 1]} : vector<2x256xf32> to vector<2x128xf32>
    %483 = vector.extract_strided_slice %470 {offsets = [0, 0], sizes = [2, 32], strides = [1, 1]} : vector<2x64xf32> to vector<2x32xf32>
    %484 = vector.extract_strided_slice %481 {offsets = [0, 0], sizes = [2, 32], strides = [1, 1]} : vector<2x128xf32> to vector<2x32xf32>
    %485 = arith.negf %484 : vector<2x32xf32>
    %486 = math.exp %485 : vector<2x32xf32>
    %cst_108 = arith.constant 1.000000e+00 : f32
    %487 = vector.broadcast %cst_108 : f32 to vector<2x32xf32>
    %488 = arith.addf %487, %486 : vector<2x32xf32>
    %489 = arith.divf %487, %488 : vector<2x32xf32>
    %490 = vector.extract_strided_slice %481 {offsets = [0, 32], sizes = [2, 32], strides = [1, 1]} : vector<2x128xf32> to vector<2x32xf32>
    %491 = arith.negf %490 : vector<2x32xf32>
    %492 = math.exp %491 : vector<2x32xf32>
    %cst_109 = arith.constant 1.000000e+00 : f32
    %493 = vector.broadcast %cst_109 : f32 to vector<2x32xf32>
    %494 = arith.addf %493, %492 : vector<2x32xf32>
    %495 = arith.divf %493, %494 : vector<2x32xf32>
    %496 = vector.extract_strided_slice %481 {offsets = [0, 64], sizes = [2, 32], strides = [1, 1]} : vector<2x128xf32> to vector<2x32xf32>
    %497 = math.tanh %496 : vector<2x32xf32>
    %498 = vector.extract_strided_slice %481 {offsets = [0, 96], sizes = [2, 32], strides = [1, 1]} : vector<2x128xf32> to vector<2x32xf32>
    %499 = arith.negf %498 : vector<2x32xf32>
    %500 = math.exp %499 : vector<2x32xf32>
    %cst_110 = arith.constant 1.000000e+00 : f32
    %501 = vector.broadcast %cst_110 : f32 to vector<2x32xf32>
    %502 = arith.addf %501, %500 : vector<2x32xf32>
    %503 = arith.divf %501, %502 : vector<2x32xf32>
    %504 = arith.mulf %495, %483 : vector<2x32xf32>
    %505 = arith.mulf %489, %497 : vector<2x32xf32>
    %506 = arith.addf %504, %505 : vector<2x32xf32>
    %507 = math.tanh %506 : vector<2x32xf32>
    %508 = arith.mulf %503, %507 : vector<2x32xf32>
    %509 = vector.extract_strided_slice %470 {offsets = [0, 32], sizes = [2, 32], strides = [1, 1]} : vector<2x64xf32> to vector<2x32xf32>
    %510 = vector.extract_strided_slice %482 {offsets = [0, 0], sizes = [2, 32], strides = [1, 1]} : vector<2x128xf32> to vector<2x32xf32>
    %511 = arith.negf %510 : vector<2x32xf32>
    %512 = math.exp %511 : vector<2x32xf32>
    %cst_111 = arith.constant 1.000000e+00 : f32
    %513 = vector.broadcast %cst_111 : f32 to vector<2x32xf32>
    %514 = arith.addf %513, %512 : vector<2x32xf32>
    %515 = arith.divf %513, %514 : vector<2x32xf32>
    %516 = vector.extract_strided_slice %482 {offsets = [0, 32], sizes = [2, 32], strides = [1, 1]} : vector<2x128xf32> to vector<2x32xf32>
    %517 = arith.negf %516 : vector<2x32xf32>
    %518 = math.exp %517 : vector<2x32xf32>
    %cst_112 = arith.constant 1.000000e+00 : f32
    %519 = vector.broadcast %cst_112 : f32 to vector<2x32xf32>
    %520 = arith.addf %519, %518 : vector<2x32xf32>
    %521 = arith.divf %519, %520 : vector<2x32xf32>
    %522 = vector.extract_strided_slice %482 {offsets = [0, 64], sizes = [2, 32], strides = [1, 1]} : vector<2x128xf32> to vector<2x32xf32>
    %523 = math.tanh %522 : vector<2x32xf32>
    %524 = vector.extract_strided_slice %482 {offsets = [0, 96], sizes = [2, 32], strides = [1, 1]} : vector<2x128xf32> to vector<2x32xf32>
    %525 = arith.negf %524 : vector<2x32xf32>
    %526 = math.exp %525 : vector<2x32xf32>
    %cst_113 = arith.constant 1.000000e+00 : f32
    %527 = vector.broadcast %cst_113 : f32 to vector<2x32xf32>
    %528 = arith.addf %527, %526 : vector<2x32xf32>
    %529 = arith.divf %527, %528 : vector<2x32xf32>
    %530 = arith.mulf %521, %509 : vector<2x32xf32>
    %531 = arith.mulf %515, %523 : vector<2x32xf32>
    %532 = arith.addf %530, %531 : vector<2x32xf32>
    %533 = math.tanh %532 : vector<2x32xf32>
    %534 = arith.mulf %529, %533 : vector<2x32xf32>
    %535 = vector.broadcast %472 : i32 to vector<2x1xi32>
    %536 = arith.cmpi sgt, %3, %535 : vector<2x1xi32>
    %537 = arith.extui %536 : vector<2x1xi1> to vector<2x1xi32>
    %538 = arith.sitofp %537 : vector<2x1xi32> to vector<2x1xf32>
    %539 = vector.broadcast %473 : i32 to vector<2x1xi32>
    %540 = arith.cmpi sgt, %3, %539 : vector<2x1xi32>
    %541 = arith.extui %540 : vector<2x1xi1> to vector<2x1xi32>
    %542 = arith.sitofp %541 : vector<2x1xi32> to vector<2x1xf32>
    %543 = vector.broadcast %538 : vector<2x1xf32> to vector<2x32xf32>
    %544 = arith.mulf %543, %508 : vector<2x32xf32>
    %c0_114 = arith.constant 0 : index
    %c4_115 = arith.constant 4 : index
    %c0_116 = arith.constant 0 : index
    %545 = vector.load %arg5[%c0_114, %c4_115, %c0_116] : memref<2x8x32xf32, #tpu.memory_space<vmem>>, vector<2x1x32xf32>
    %546 = vector.shape_cast %545 : vector<2x1x32xf32> to vector<2x32xf32>
    %547 = vector.shape_cast %544 : vector<2x32xf32> to vector<2x1x32xf32>
    tpu.vector_store %arg5[%c0_114, %c4_115, %c0_116], %547 {strides = array<i32>} : memref<2x8x32xf32, #tpu.memory_space<vmem>>, vector<2x1x32xf32>,
    %548 = vector.broadcast %542 : vector<2x1xf32> to vector<2x32xf32>
    %549 = arith.mulf %548, %534 : vector<2x32xf32>
    %c0_117 = arith.constant 0 : index
    %c3_118 = arith.constant 3 : index
    %c0_119 = arith.constant 0 : index
    %550 = vector.load %arg6[%c0_117, %c3_118, %c0_119] : memref<2x8x32xf32, #tpu.memory_space<vmem>>, vector<2x1x32xf32>
    %551 = vector.shape_cast %550 : vector<2x1x32xf32> to vector<2x32xf32>
    %552 = vector.shape_cast %549 : vector<2x32xf32> to vector<2x1x32xf32>
    tpu.vector_store %arg6[%c0_117, %c3_118, %c0_119], %552 {strides = array<i32>} : memref<2x8x32xf32, #tpu.memory_space<vmem>>, vector<2x1x32xf32>,
    %553 = vector.broadcast %538 : vector<2x1xf32> to vector<2x32xf32>
    %554 = arith.mulf %553, %508 : vector<2x32xf32>
    %cst_120 = arith.constant 1.000000e+00 : f32
    %555 = vector.broadcast %cst_120 : f32 to vector<2x1xf32>
    %556 = arith.subf %555, %538 : vector<2x1xf32>
    %557 = vector.extract_strided_slice %453 {offsets = [0, 0], sizes = [2, 32], strides = [1, 1]} : vector<2x64xf32> to vector<2x32xf32>
    %558 = vector.broadcast %556 : vector<2x1xf32> to vector<2x32xf32>
    %559 = arith.mulf %558, %557 : vector<2x32xf32>
    %560 = arith.addf %554, %559 : vector<2x32xf32>
    %561 = vector.broadcast %542 : vector<2x1xf32> to vector<2x32xf32>
    %562 = arith.mulf %561, %534 : vector<2x32xf32>
    %cst_121 = arith.constant 1.000000e+00 : f32
    %563 = vector.broadcast %cst_121 : f32 to vector<2x1xf32>
    %564 = arith.subf %563, %542 : vector<2x1xf32>
    %565 = vector.extract_strided_slice %453 {offsets = [0, 32], sizes = [2, 32], strides = [1, 1]} : vector<2x64xf32> to vector<2x32xf32>
    %566 = vector.broadcast %564 : vector<2x1xf32> to vector<2x32xf32>
    %567 = arith.mulf %566, %565 : vector<2x32xf32>
    %568 = arith.addf %562, %567 : vector<2x32xf32>
    %569 = tpu.concatenate %560, %568 in 1 : vector<2x32xf32>, vector<2x32xf32> -> vector<2x64xf32>
    %570 = vector.broadcast %538 : vector<2x1xf32> to vector<2x32xf32>
    %571 = arith.mulf %570, %506 : vector<2x32xf32>
    %cst_122 = arith.constant 1.000000e+00 : f32
    %572 = vector.broadcast %cst_122 : f32 to vector<2x1xf32>
    %573 = arith.subf %572, %538 : vector<2x1xf32>
    %574 = vector.extract_strided_slice %470 {offsets = [0, 0], sizes = [2, 32], strides = [1, 1]} : vector<2x64xf32> to vector<2x32xf32>
    %575 = vector.broadcast %573 : vector<2x1xf32> to vector<2x32xf32>
    %576 = arith.mulf %575, %574 : vector<2x32xf32>
    %577 = arith.addf %571, %576 : vector<2x32xf32>
    %578 = vector.broadcast %542 : vector<2x1xf32> to vector<2x32xf32>
    %579 = arith.mulf %578, %532 : vector<2x32xf32>
    %cst_123 = arith.constant 1.000000e+00 : f32
    %580 = vector.broadcast %cst_123 : f32 to vector<2x1xf32>
    %581 = arith.subf %580, %542 : vector<2x1xf32>
    %582 = vector.extract_strided_slice %470 {offsets = [0, 32], sizes = [2, 32], strides = [1, 1]} : vector<2x64xf32> to vector<2x32xf32>
    %583 = vector.broadcast %581 : vector<2x1xf32> to vector<2x32xf32>
    %584 = arith.mulf %583, %582 : vector<2x32xf32>
    %585 = arith.addf %579, %584 : vector<2x32xf32>
    %586 = tpu.concatenate %577, %585 in 1 : vector<2x32xf32>, vector<2x32xf32> -> vector<2x64xf32>
    %c8_i32_124 = arith.constant 8 : i32
    %587 = arith.muli %arg0, %c8_i32_124 : i32
    %c5_i32 = arith.constant 5 : i32
    %588 = arith.addi %587, %c5_i32 : i32
    %c7_i32_125 = arith.constant 7 : i32
    %589 = arith.subi %c7_i32_125, %588 : i32
    %c0_126 = arith.constant 0 : index
    %c5_127 = arith.constant 5 : index
    %c0_128 = arith.constant 0 : index
    %590 = vector.load %arg1[%c0_126, %c5_127, %c0_128] : memref<2x8x128xf32, #tpu.memory_space<vmem>>, vector<2x1x128xf32>
    %591 = vector.shape_cast %590 : vector<2x1x128xf32> to vector<2x128xf32>
    %c0_129 = arith.constant 0 : index
    %c2_130 = arith.constant 2 : index
    %c0_131 = arith.constant 0 : index
    %592 = vector.load %arg2[%c0_129, %c2_130, %c0_131] : memref<2x8x128xf32, #tpu.memory_space<vmem>>, vector<2x1x128xf32>
    %593 = vector.shape_cast %592 : vector<2x1x128xf32> to vector<2x128xf32>
    %594 = tpu.concatenate %591, %593 in 1 : vector<2x128xf32>, vector<2x128xf32> -> vector<2x256xf32>
    %cst_132 = arith.constant dense<0.000000e+00> : vector<2x256xf32>
    %595 = tpu.matmul %569, %4, %cst_132 {dimension_numbers = #tpu.dot_dimension_numbers<[1], [0], [0], [1], [0, 0, 1, 1], [], []>} : vector<2x64xf32>, vector<64x256xf32>, vector<2x256xf32> -> vector<2x256xf32>
    %596 = arith.addf %594, %595 : vector<2x256xf32>
    %597 = vector.extract_strided_slice %596 {offsets = [0, 0], sizes = [2, 128], strides = [1, 1]} : vector<2x256xf32> to vector<2x128xf32>
    %598 = vector.extract_strided_slice %596 {offsets = [0, 128], sizes = [2, 128], strides = [1, 1]} : vector<2x256xf32> to vector<2x128xf32>
    %599 = vector.extract_strided_slice %586 {offsets = [0, 0], sizes = [2, 32], strides = [1, 1]} : vector<2x64xf32> to vector<2x32xf32>
    %600 = vector.extract_strided_slice %597 {offsets = [0, 0], sizes = [2, 32], strides = [1, 1]} : vector<2x128xf32> to vector<2x32xf32>
    %601 = arith.negf %600 : vector<2x32xf32>
    %602 = math.exp %601 : vector<2x32xf32>
    %cst_133 = arith.constant 1.000000e+00 : f32
    %603 = vector.broadcast %cst_133 : f32 to vector<2x32xf32>
    %604 = arith.addf %603, %602 : vector<2x32xf32>
    %605 = arith.divf %603, %604 : vector<2x32xf32>
    %606 = vector.extract_strided_slice %597 {offsets = [0, 32], sizes = [2, 32], strides = [1, 1]} : vector<2x128xf32> to vector<2x32xf32>
    %607 = arith.negf %606 : vector<2x32xf32>
    %608 = math.exp %607 : vector<2x32xf32>
    %cst_134 = arith.constant 1.000000e+00 : f32
    %609 = vector.broadcast %cst_134 : f32 to vector<2x32xf32>
    %610 = arith.addf %609, %608 : vector<2x32xf32>
    %611 = arith.divf %609, %610 : vector<2x32xf32>
    %612 = vector.extract_strided_slice %597 {offsets = [0, 64], sizes = [2, 32], strides = [1, 1]} : vector<2x128xf32> to vector<2x32xf32>
    %613 = math.tanh %612 : vector<2x32xf32>
    %614 = vector.extract_strided_slice %597 {offsets = [0, 96], sizes = [2, 32], strides = [1, 1]} : vector<2x128xf32> to vector<2x32xf32>
    %615 = arith.negf %614 : vector<2x32xf32>
    %616 = math.exp %615 : vector<2x32xf32>
    %cst_135 = arith.constant 1.000000e+00 : f32
    %617 = vector.broadcast %cst_135 : f32 to vector<2x32xf32>
    %618 = arith.addf %617, %616 : vector<2x32xf32>
    %619 = arith.divf %617, %618 : vector<2x32xf32>
    %620 = arith.mulf %611, %599 : vector<2x32xf32>
    %621 = arith.mulf %605, %613 : vector<2x32xf32>
    %622 = arith.addf %620, %621 : vector<2x32xf32>
    %623 = math.tanh %622 : vector<2x32xf32>
    %624 = arith.mulf %619, %623 : vector<2x32xf32>
    %625 = vector.extract_strided_slice %586 {offsets = [0, 32], sizes = [2, 32], strides = [1, 1]} : vector<2x64xf32> to vector<2x32xf32>
    %626 = vector.extract_strided_slice %598 {offsets = [0, 0], sizes = [2, 32], strides = [1, 1]} : vector<2x128xf32> to vector<2x32xf32>
    %627 = arith.negf %626 : vector<2x32xf32>
    %628 = math.exp %627 : vector<2x32xf32>
    %cst_136 = arith.constant 1.000000e+00 : f32
    %629 = vector.broadcast %cst_136 : f32 to vector<2x32xf32>
    %630 = arith.addf %629, %628 : vector<2x32xf32>
    %631 = arith.divf %629, %630 : vector<2x32xf32>
    %632 = vector.extract_strided_slice %598 {offsets = [0, 32], sizes = [2, 32], strides = [1, 1]} : vector<2x128xf32> to vector<2x32xf32>
    %633 = arith.negf %632 : vector<2x32xf32>
    %634 = math.exp %633 : vector<2x32xf32>
    %cst_137 = arith.constant 1.000000e+00 : f32
    %635 = vector.broadcast %cst_137 : f32 to vector<2x32xf32>
    %636 = arith.addf %635, %634 : vector<2x32xf32>
    %637 = arith.divf %635, %636 : vector<2x32xf32>
    %638 = vector.extract_strided_slice %598 {offsets = [0, 64], sizes = [2, 32], strides = [1, 1]} : vector<2x128xf32> to vector<2x32xf32>
    %639 = math.tanh %638 : vector<2x32xf32>
    %640 = vector.extract_strided_slice %598 {offsets = [0, 96], sizes = [2, 32], strides = [1, 1]} : vector<2x128xf32> to vector<2x32xf32>
    %641 = arith.negf %640 : vector<2x32xf32>
    %642 = math.exp %641 : vector<2x32xf32>
    %cst_138 = arith.constant 1.000000e+00 : f32
    %643 = vector.broadcast %cst_138 : f32 to vector<2x32xf32>
    %644 = arith.addf %643, %642 : vector<2x32xf32>
    %645 = arith.divf %643, %644 : vector<2x32xf32>
    %646 = arith.mulf %637, %625 : vector<2x32xf32>
    %647 = arith.mulf %631, %639 : vector<2x32xf32>
    %648 = arith.addf %646, %647 : vector<2x32xf32>
    %649 = math.tanh %648 : vector<2x32xf32>
    %650 = arith.mulf %645, %649 : vector<2x32xf32>
    %651 = vector.broadcast %588 : i32 to vector<2x1xi32>
    %652 = arith.cmpi sgt, %3, %651 : vector<2x1xi32>
    %653 = arith.extui %652 : vector<2x1xi1> to vector<2x1xi32>
    %654 = arith.sitofp %653 : vector<2x1xi32> to vector<2x1xf32>
    %655 = vector.broadcast %589 : i32 to vector<2x1xi32>
    %656 = arith.cmpi sgt, %3, %655 : vector<2x1xi32>
    %657 = arith.extui %656 : vector<2x1xi1> to vector<2x1xi32>
    %658 = arith.sitofp %657 : vector<2x1xi32> to vector<2x1xf32>
    %659 = vector.broadcast %654 : vector<2x1xf32> to vector<2x32xf32>
    %660 = arith.mulf %659, %624 : vector<2x32xf32>
    %c0_139 = arith.constant 0 : index
    %c5_140 = arith.constant 5 : index
    %c0_141 = arith.constant 0 : index
    %661 = vector.load %arg5[%c0_139, %c5_140, %c0_141] : memref<2x8x32xf32, #tpu.memory_space<vmem>>, vector<2x1x32xf32>
    %662 = vector.shape_cast %661 : vector<2x1x32xf32> to vector<2x32xf32>
    %663 = vector.shape_cast %660 : vector<2x32xf32> to vector<2x1x32xf32>
    tpu.vector_store %arg5[%c0_139, %c5_140, %c0_141], %663 {strides = array<i32>} : memref<2x8x32xf32, #tpu.memory_space<vmem>>, vector<2x1x32xf32>,
    %664 = vector.broadcast %658 : vector<2x1xf32> to vector<2x32xf32>
    %665 = arith.mulf %664, %650 : vector<2x32xf32>
    %c0_142 = arith.constant 0 : index
    %c2_143 = arith.constant 2 : index
    %c0_144 = arith.constant 0 : index
    %666 = vector.load %arg6[%c0_142, %c2_143, %c0_144] : memref<2x8x32xf32, #tpu.memory_space<vmem>>, vector<2x1x32xf32>
    %667 = vector.shape_cast %666 : vector<2x1x32xf32> to vector<2x32xf32>
    %668 = vector.shape_cast %665 : vector<2x32xf32> to vector<2x1x32xf32>
    tpu.vector_store %arg6[%c0_142, %c2_143, %c0_144], %668 {strides = array<i32>} : memref<2x8x32xf32, #tpu.memory_space<vmem>>, vector<2x1x32xf32>,
    %669 = vector.broadcast %654 : vector<2x1xf32> to vector<2x32xf32>
    %670 = arith.mulf %669, %624 : vector<2x32xf32>
    %cst_145 = arith.constant 1.000000e+00 : f32
    %671 = vector.broadcast %cst_145 : f32 to vector<2x1xf32>
    %672 = arith.subf %671, %654 : vector<2x1xf32>
    %673 = vector.extract_strided_slice %569 {offsets = [0, 0], sizes = [2, 32], strides = [1, 1]} : vector<2x64xf32> to vector<2x32xf32>
    %674 = vector.broadcast %672 : vector<2x1xf32> to vector<2x32xf32>
    %675 = arith.mulf %674, %673 : vector<2x32xf32>
    %676 = arith.addf %670, %675 : vector<2x32xf32>
    %677 = vector.broadcast %658 : vector<2x1xf32> to vector<2x32xf32>
    %678 = arith.mulf %677, %650 : vector<2x32xf32>
    %cst_146 = arith.constant 1.000000e+00 : f32
    %679 = vector.broadcast %cst_146 : f32 to vector<2x1xf32>
    %680 = arith.subf %679, %658 : vector<2x1xf32>
    %681 = vector.extract_strided_slice %569 {offsets = [0, 32], sizes = [2, 32], strides = [1, 1]} : vector<2x64xf32> to vector<2x32xf32>
    %682 = vector.broadcast %680 : vector<2x1xf32> to vector<2x32xf32>
    %683 = arith.mulf %682, %681 : vector<2x32xf32>
    %684 = arith.addf %678, %683 : vector<2x32xf32>
    %685 = tpu.concatenate %676, %684 in 1 : vector<2x32xf32>, vector<2x32xf32> -> vector<2x64xf32>
    %686 = vector.broadcast %654 : vector<2x1xf32> to vector<2x32xf32>
    %687 = arith.mulf %686, %622 : vector<2x32xf32>
    %cst_147 = arith.constant 1.000000e+00 : f32
    %688 = vector.broadcast %cst_147 : f32 to vector<2x1xf32>
    %689 = arith.subf %688, %654 : vector<2x1xf32>
    %690 = vector.extract_strided_slice %586 {offsets = [0, 0], sizes = [2, 32], strides = [1, 1]} : vector<2x64xf32> to vector<2x32xf32>
    %691 = vector.broadcast %689 : vector<2x1xf32> to vector<2x32xf32>
    %692 = arith.mulf %691, %690 : vector<2x32xf32>
    %693 = arith.addf %687, %692 : vector<2x32xf32>
    %694 = vector.broadcast %658 : vector<2x1xf32> to vector<2x32xf32>
    %695 = arith.mulf %694, %648 : vector<2x32xf32>
    %cst_148 = arith.constant 1.000000e+00 : f32
    %696 = vector.broadcast %cst_148 : f32 to vector<2x1xf32>
    %697 = arith.subf %696, %658 : vector<2x1xf32>
    %698 = vector.extract_strided_slice %586 {offsets = [0, 32], sizes = [2, 32], strides = [1, 1]} : vector<2x64xf32> to vector<2x32xf32>
    %699 = vector.broadcast %697 : vector<2x1xf32> to vector<2x32xf32>
    %700 = arith.mulf %699, %698 : vector<2x32xf32>
    %701 = arith.addf %695, %700 : vector<2x32xf32>
    %702 = tpu.concatenate %693, %701 in 1 : vector<2x32xf32>, vector<2x32xf32> -> vector<2x64xf32>
    %c8_i32_149 = arith.constant 8 : i32
    %703 = arith.muli %arg0, %c8_i32_149 : i32
    %c6_i32 = arith.constant 6 : i32
    %704 = arith.addi %703, %c6_i32 : i32
    %c7_i32_150 = arith.constant 7 : i32
    %705 = arith.subi %c7_i32_150, %704 : i32
    %c0_151 = arith.constant 0 : index
    %c6_152 = arith.constant 6 : index
    %c0_153 = arith.constant 0 : index
    %706 = vector.load %arg1[%c0_151, %c6_152, %c0_153] : memref<2x8x128xf32, #tpu.memory_space<vmem>>, vector<2x1x128xf32>
    %707 = vector.shape_cast %706 : vector<2x1x128xf32> to vector<2x128xf32>
    %c0_154 = arith.constant 0 : index
    %c1_155 = arith.constant 1 : index
    %c0_156 = arith.constant 0 : index
    %708 = vector.load %arg2[%c0_154, %c1_155, %c0_156] : memref<2x8x128xf32, #tpu.memory_space<vmem>>, vector<2x1x128xf32>
    %709 = vector.shape_cast %708 : vector<2x1x128xf32> to vector<2x128xf32>
    %710 = tpu.concatenate %707, %709 in 1 : vector<2x128xf32>, vector<2x128xf32> -> vector<2x256xf32>
    %cst_157 = arith.constant dense<0.000000e+00> : vector<2x256xf32>
    %711 = tpu.matmul %685, %4, %cst_157 {dimension_numbers = #tpu.dot_dimension_numbers<[1], [0], [0], [1], [0, 0, 1, 1], [], []>} : vector<2x64xf32>, vector<64x256xf32>, vector<2x256xf32> -> vector<2x256xf32>
    %712 = arith.addf %710, %711 : vector<2x256xf32>
    %713 = vector.extract_strided_slice %712 {offsets = [0, 0], sizes = [2, 128], strides = [1, 1]} : vector<2x256xf32> to vector<2x128xf32>
    %714 = vector.extract_strided_slice %712 {offsets = [0, 128], sizes = [2, 128], strides = [1, 1]} : vector<2x256xf32> to vector<2x128xf32>
    %715 = vector.extract_strided_slice %702 {offsets = [0, 0], sizes = [2, 32], strides = [1, 1]} : vector<2x64xf32> to vector<2x32xf32>
    %716 = vector.extract_strided_slice %713 {offsets = [0, 0], sizes = [2, 32], strides = [1, 1]} : vector<2x128xf32> to vector<2x32xf32>
    %717 = arith.negf %716 : vector<2x32xf32>
    %718 = math.exp %717 : vector<2x32xf32>
    %cst_158 = arith.constant 1.000000e+00 : f32
    %719 = vector.broadcast %cst_158 : f32 to vector<2x32xf32>
    %720 = arith.addf %719, %718 : vector<2x32xf32>
    %721 = arith.divf %719, %720 : vector<2x32xf32>
    %722 = vector.extract_strided_slice %713 {offsets = [0, 32], sizes = [2, 32], strides = [1, 1]} : vector<2x128xf32> to vector<2x32xf32>
    %723 = arith.negf %722 : vector<2x32xf32>
    %724 = math.exp %723 : vector<2x32xf32>
    %cst_159 = arith.constant 1.000000e+00 : f32
    %725 = vector.broadcast %cst_159 : f32 to vector<2x32xf32>
    %726 = arith.addf %725, %724 : vector<2x32xf32>
    %727 = arith.divf %725, %726 : vector<2x32xf32>
    %728 = vector.extract_strided_slice %713 {offsets = [0, 64], sizes = [2, 32], strides = [1, 1]} : vector<2x128xf32> to vector<2x32xf32>
    %729 = math.tanh %728 : vector<2x32xf32>
    %730 = vector.extract_strided_slice %713 {offsets = [0, 96], sizes = [2, 32], strides = [1, 1]} : vector<2x128xf32> to vector<2x32xf32>
    %731 = arith.negf %730 : vector<2x32xf32>
    %732 = math.exp %731 : vector<2x32xf32>
    %cst_160 = arith.constant 1.000000e+00 : f32
    %733 = vector.broadcast %cst_160 : f32 to vector<2x32xf32>
    %734 = arith.addf %733, %732 : vector<2x32xf32>
    %735 = arith.divf %733, %734 : vector<2x32xf32>
    %736 = arith.mulf %727, %715 : vector<2x32xf32>
    %737 = arith.mulf %721, %729 : vector<2x32xf32>
    %738 = arith.addf %736, %737 : vector<2x32xf32>
    %739 = math.tanh %738 : vector<2x32xf32>
    %740 = arith.mulf %735, %739 : vector<2x32xf32>
    %741 = vector.extract_strided_slice %702 {offsets = [0, 32], sizes = [2, 32], strides = [1, 1]} : vector<2x64xf32> to vector<2x32xf32>
    %742 = vector.extract_strided_slice %714 {offsets = [0, 0], sizes = [2, 32], strides = [1, 1]} : vector<2x128xf32> to vector<2x32xf32>
    %743 = arith.negf %742 : vector<2x32xf32>
    %744 = math.exp %743 : vector<2x32xf32>
    %cst_161 = arith.constant 1.000000e+00 : f32
    %745 = vector.broadcast %cst_161 : f32 to vector<2x32xf32>
    %746 = arith.addf %745, %744 : vector<2x32xf32>
    %747 = arith.divf %745, %746 : vector<2x32xf32>
    %748 = vector.extract_strided_slice %714 {offsets = [0, 32], sizes = [2, 32], strides = [1, 1]} : vector<2x128xf32> to vector<2x32xf32>
    %749 = arith.negf %748 : vector<2x32xf32>
    %750 = math.exp %749 : vector<2x32xf32>
    %cst_162 = arith.constant 1.000000e+00 : f32
    %751 = vector.broadcast %cst_162 : f32 to vector<2x32xf32>
    %752 = arith.addf %751, %750 : vector<2x32xf32>
    %753 = arith.divf %751, %752 : vector<2x32xf32>
    %754 = vector.extract_strided_slice %714 {offsets = [0, 64], sizes = [2, 32], strides = [1, 1]} : vector<2x128xf32> to vector<2x32xf32>
    %755 = math.tanh %754 : vector<2x32xf32>
    %756 = vector.extract_strided_slice %714 {offsets = [0, 96], sizes = [2, 32], strides = [1, 1]} : vector<2x128xf32> to vector<2x32xf32>
    %757 = arith.negf %756 : vector<2x32xf32>
    %758 = math.exp %757 : vector<2x32xf32>
    %cst_163 = arith.constant 1.000000e+00 : f32
    %759 = vector.broadcast %cst_163 : f32 to vector<2x32xf32>
    %760 = arith.addf %759, %758 : vector<2x32xf32>
    %761 = arith.divf %759, %760 : vector<2x32xf32>
    %762 = arith.mulf %753, %741 : vector<2x32xf32>
    %763 = arith.mulf %747, %755 : vector<2x32xf32>
    %764 = arith.addf %762, %763 : vector<2x32xf32>
    %765 = math.tanh %764 : vector<2x32xf32>
    %766 = arith.mulf %761, %765 : vector<2x32xf32>
    %767 = vector.broadcast %704 : i32 to vector<2x1xi32>
    %768 = arith.cmpi sgt, %3, %767 : vector<2x1xi32>
    %769 = arith.extui %768 : vector<2x1xi1> to vector<2x1xi32>
    %770 = arith.sitofp %769 : vector<2x1xi32> to vector<2x1xf32>
    %771 = vector.broadcast %705 : i32 to vector<2x1xi32>
    %772 = arith.cmpi sgt, %3, %771 : vector<2x1xi32>
    %773 = arith.extui %772 : vector<2x1xi1> to vector<2x1xi32>
    %774 = arith.sitofp %773 : vector<2x1xi32> to vector<2x1xf32>
    %775 = vector.broadcast %770 : vector<2x1xf32> to vector<2x32xf32>
    %776 = arith.mulf %775, %740 : vector<2x32xf32>
    %c0_164 = arith.constant 0 : index
    %c6_165 = arith.constant 6 : index
    %c0_166 = arith.constant 0 : index
    %777 = vector.load %arg5[%c0_164, %c6_165, %c0_166] : memref<2x8x32xf32, #tpu.memory_space<vmem>>, vector<2x1x32xf32>
    %778 = vector.shape_cast %777 : vector<2x1x32xf32> to vector<2x32xf32>
    %779 = vector.shape_cast %776 : vector<2x32xf32> to vector<2x1x32xf32>
    tpu.vector_store %arg5[%c0_164, %c6_165, %c0_166], %779 {strides = array<i32>} : memref<2x8x32xf32, #tpu.memory_space<vmem>>, vector<2x1x32xf32>,
    %780 = vector.broadcast %774 : vector<2x1xf32> to vector<2x32xf32>
    %781 = arith.mulf %780, %766 : vector<2x32xf32>
    %c0_167 = arith.constant 0 : index
    %c1_168 = arith.constant 1 : index
    %c0_169 = arith.constant 0 : index
    %782 = vector.load %arg6[%c0_167, %c1_168, %c0_169] : memref<2x8x32xf32, #tpu.memory_space<vmem>>, vector<2x1x32xf32>
    %783 = vector.shape_cast %782 : vector<2x1x32xf32> to vector<2x32xf32>
    %784 = vector.shape_cast %781 : vector<2x32xf32> to vector<2x1x32xf32>
    tpu.vector_store %arg6[%c0_167, %c1_168, %c0_169], %784 {strides = array<i32>} : memref<2x8x32xf32, #tpu.memory_space<vmem>>, vector<2x1x32xf32>,
    %785 = vector.broadcast %770 : vector<2x1xf32> to vector<2x32xf32>
    %786 = arith.mulf %785, %740 : vector<2x32xf32>
    %cst_170 = arith.constant 1.000000e+00 : f32
    %787 = vector.broadcast %cst_170 : f32 to vector<2x1xf32>
    %788 = arith.subf %787, %770 : vector<2x1xf32>
    %789 = vector.extract_strided_slice %685 {offsets = [0, 0], sizes = [2, 32], strides = [1, 1]} : vector<2x64xf32> to vector<2x32xf32>
    %790 = vector.broadcast %788 : vector<2x1xf32> to vector<2x32xf32>
    %791 = arith.mulf %790, %789 : vector<2x32xf32>
    %792 = arith.addf %786, %791 : vector<2x32xf32>
    %793 = vector.broadcast %774 : vector<2x1xf32> to vector<2x32xf32>
    %794 = arith.mulf %793, %766 : vector<2x32xf32>
    %cst_171 = arith.constant 1.000000e+00 : f32
    %795 = vector.broadcast %cst_171 : f32 to vector<2x1xf32>
    %796 = arith.subf %795, %774 : vector<2x1xf32>
    %797 = vector.extract_strided_slice %685 {offsets = [0, 32], sizes = [2, 32], strides = [1, 1]} : vector<2x64xf32> to vector<2x32xf32>
    %798 = vector.broadcast %796 : vector<2x1xf32> to vector<2x32xf32>
    %799 = arith.mulf %798, %797 : vector<2x32xf32>
    %800 = arith.addf %794, %799 : vector<2x32xf32>
    %801 = tpu.concatenate %792, %800 in 1 : vector<2x32xf32>, vector<2x32xf32> -> vector<2x64xf32>
    %802 = vector.broadcast %770 : vector<2x1xf32> to vector<2x32xf32>
    %803 = arith.mulf %802, %738 : vector<2x32xf32>
    %cst_172 = arith.constant 1.000000e+00 : f32
    %804 = vector.broadcast %cst_172 : f32 to vector<2x1xf32>
    %805 = arith.subf %804, %770 : vector<2x1xf32>
    %806 = vector.extract_strided_slice %702 {offsets = [0, 0], sizes = [2, 32], strides = [1, 1]} : vector<2x64xf32> to vector<2x32xf32>
    %807 = vector.broadcast %805 : vector<2x1xf32> to vector<2x32xf32>
    %808 = arith.mulf %807, %806 : vector<2x32xf32>
    %809 = arith.addf %803, %808 : vector<2x32xf32>
    %810 = vector.broadcast %774 : vector<2x1xf32> to vector<2x32xf32>
    %811 = arith.mulf %810, %764 : vector<2x32xf32>
    %cst_173 = arith.constant 1.000000e+00 : f32
    %812 = vector.broadcast %cst_173 : f32 to vector<2x1xf32>
    %813 = arith.subf %812, %774 : vector<2x1xf32>
    %814 = vector.extract_strided_slice %702 {offsets = [0, 32], sizes = [2, 32], strides = [1, 1]} : vector<2x64xf32> to vector<2x32xf32>
    %815 = vector.broadcast %813 : vector<2x1xf32> to vector<2x32xf32>
    %816 = arith.mulf %815, %814 : vector<2x32xf32>
    %817 = arith.addf %811, %816 : vector<2x32xf32>
    %818 = tpu.concatenate %809, %817 in 1 : vector<2x32xf32>, vector<2x32xf32> -> vector<2x64xf32>
    %c8_i32_174 = arith.constant 8 : i32
    %819 = arith.muli %arg0, %c8_i32_174 : i32
    %c7_i32_175 = arith.constant 7 : i32
    %820 = arith.addi %819, %c7_i32_175 : i32
    %c7_i32_176 = arith.constant 7 : i32
    %821 = arith.subi %c7_i32_176, %820 : i32
    %c0_177 = arith.constant 0 : index
    %c7_178 = arith.constant 7 : index
    %c0_179 = arith.constant 0 : index
    %822 = vector.load %arg1[%c0_177, %c7_178, %c0_179] : memref<2x8x128xf32, #tpu.memory_space<vmem>>, vector<2x1x128xf32>
    %823 = vector.shape_cast %822 : vector<2x1x128xf32> to vector<2x128xf32>
    %c0_180 = arith.constant 0 : index
    %c0_181 = arith.constant 0 : index
    %c0_182 = arith.constant 0 : index
    %824 = vector.load %arg2[%c0_180, %c0_181, %c0_182] : memref<2x8x128xf32, #tpu.memory_space<vmem>>, vector<2x1x128xf32>
    %825 = vector.shape_cast %824 : vector<2x1x128xf32> to vector<2x128xf32>
    %826 = tpu.concatenate %823, %825 in 1 : vector<2x128xf32>, vector<2x128xf32> -> vector<2x256xf32>
    %cst_183 = arith.constant dense<0.000000e+00> : vector<2x256xf32>
    %827 = tpu.matmul %801, %4, %cst_183 {dimension_numbers = #tpu.dot_dimension_numbers<[1], [0], [0], [1], [0, 0, 1, 1], [], []>} : vector<2x64xf32>, vector<64x256xf32>, vector<2x256xf32> -> vector<2x256xf32>
    %828 = arith.addf %826, %827 : vector<2x256xf32>
    %829 = vector.extract_strided_slice %828 {offsets = [0, 0], sizes = [2, 128], strides = [1, 1]} : vector<2x256xf32> to vector<2x128xf32>
    %830 = vector.extract_strided_slice %828 {offsets = [0, 128], sizes = [2, 128], strides = [1, 1]} : vector<2x256xf32> to vector<2x128xf32>
    %831 = vector.extract_strided_slice %818 {offsets = [0, 0], sizes = [2, 32], strides = [1, 1]} : vector<2x64xf32> to vector<2x32xf32>
    %832 = vector.extract_strided_slice %829 {offsets = [0, 0], sizes = [2, 32], strides = [1, 1]} : vector<2x128xf32> to vector<2x32xf32>
    %833 = arith.negf %832 : vector<2x32xf32>
    %834 = math.exp %833 : vector<2x32xf32>
    %cst_184 = arith.constant 1.000000e+00 : f32
    %835 = vector.broadcast %cst_184 : f32 to vector<2x32xf32>
    %836 = arith.addf %835, %834 : vector<2x32xf32>
    %837 = arith.divf %835, %836 : vector<2x32xf32>
    %838 = vector.extract_strided_slice %829 {offsets = [0, 32], sizes = [2, 32], strides = [1, 1]} : vector<2x128xf32> to vector<2x32xf32>
    %839 = arith.negf %838 : vector<2x32xf32>
    %840 = math.exp %839 : vector<2x32xf32>
    %cst_185 = arith.constant 1.000000e+00 : f32
    %841 = vector.broadcast %cst_185 : f32 to vector<2x32xf32>
    %842 = arith.addf %841, %840 : vector<2x32xf32>
    %843 = arith.divf %841, %842 : vector<2x32xf32>
    %844 = vector.extract_strided_slice %829 {offsets = [0, 64], sizes = [2, 32], strides = [1, 1]} : vector<2x128xf32> to vector<2x32xf32>
    %845 = math.tanh %844 : vector<2x32xf32>
    %846 = vector.extract_strided_slice %829 {offsets = [0, 96], sizes = [2, 32], strides = [1, 1]} : vector<2x128xf32> to vector<2x32xf32>
    %847 = arith.negf %846 : vector<2x32xf32>
    %848 = math.exp %847 : vector<2x32xf32>
    %cst_186 = arith.constant 1.000000e+00 : f32
    %849 = vector.broadcast %cst_186 : f32 to vector<2x32xf32>
    %850 = arith.addf %849, %848 : vector<2x32xf32>
    %851 = arith.divf %849, %850 : vector<2x32xf32>
    %852 = arith.mulf %843, %831 : vector<2x32xf32>
    %853 = arith.mulf %837, %845 : vector<2x32xf32>
    %854 = arith.addf %852, %853 : vector<2x32xf32>
    %855 = math.tanh %854 : vector<2x32xf32>
    %856 = arith.mulf %851, %855 : vector<2x32xf32>
    %857 = vector.extract_strided_slice %818 {offsets = [0, 32], sizes = [2, 32], strides = [1, 1]} : vector<2x64xf32> to vector<2x32xf32>
    %858 = vector.extract_strided_slice %830 {offsets = [0, 0], sizes = [2, 32], strides = [1, 1]} : vector<2x128xf32> to vector<2x32xf32>
    %859 = arith.negf %858 : vector<2x32xf32>
    %860 = math.exp %859 : vector<2x32xf32>
    %cst_187 = arith.constant 1.000000e+00 : f32
    %861 = vector.broadcast %cst_187 : f32 to vector<2x32xf32>
    %862 = arith.addf %861, %860 : vector<2x32xf32>
    %863 = arith.divf %861, %862 : vector<2x32xf32>
    %864 = vector.extract_strided_slice %830 {offsets = [0, 32], sizes = [2, 32], strides = [1, 1]} : vector<2x128xf32> to vector<2x32xf32>
    %865 = arith.negf %864 : vector<2x32xf32>
    %866 = math.exp %865 : vector<2x32xf32>
    %cst_188 = arith.constant 1.000000e+00 : f32
    %867 = vector.broadcast %cst_188 : f32 to vector<2x32xf32>
    %868 = arith.addf %867, %866 : vector<2x32xf32>
    %869 = arith.divf %867, %868 : vector<2x32xf32>
    %870 = vector.extract_strided_slice %830 {offsets = [0, 64], sizes = [2, 32], strides = [1, 1]} : vector<2x128xf32> to vector<2x32xf32>
    %871 = math.tanh %870 : vector<2x32xf32>
    %872 = vector.extract_strided_slice %830 {offsets = [0, 96], sizes = [2, 32], strides = [1, 1]} : vector<2x128xf32> to vector<2x32xf32>
    %873 = arith.negf %872 : vector<2x32xf32>
    %874 = math.exp %873 : vector<2x32xf32>
    %cst_189 = arith.constant 1.000000e+00 : f32
    %875 = vector.broadcast %cst_189 : f32 to vector<2x32xf32>
    %876 = arith.addf %875, %874 : vector<2x32xf32>
    %877 = arith.divf %875, %876 : vector<2x32xf32>
    %878 = arith.mulf %869, %857 : vector<2x32xf32>
    %879 = arith.mulf %863, %871 : vector<2x32xf32>
    %880 = arith.addf %878, %879 : vector<2x32xf32>
    %881 = math.tanh %880 : vector<2x32xf32>
    %882 = arith.mulf %877, %881 : vector<2x32xf32>
    %883 = vector.broadcast %820 : i32 to vector<2x1xi32>
    %884 = arith.cmpi sgt, %3, %883 : vector<2x1xi32>
    %885 = arith.extui %884 : vector<2x1xi1> to vector<2x1xi32>
    %886 = arith.sitofp %885 : vector<2x1xi32> to vector<2x1xf32>
    %887 = vector.broadcast %821 : i32 to vector<2x1xi32>
    %888 = arith.cmpi sgt, %3, %887 : vector<2x1xi32>
    %889 = arith.extui %888 : vector<2x1xi1> to vector<2x1xi32>
    %890 = arith.sitofp %889 : vector<2x1xi32> to vector<2x1xf32>
    %891 = vector.broadcast %886 : vector<2x1xf32> to vector<2x32xf32>
    %892 = arith.mulf %891, %856 : vector<2x32xf32>
    %c0_190 = arith.constant 0 : index
    %c7_191 = arith.constant 7 : index
    %c0_192 = arith.constant 0 : index
    %893 = vector.load %arg5[%c0_190, %c7_191, %c0_192] : memref<2x8x32xf32, #tpu.memory_space<vmem>>, vector<2x1x32xf32>
    %894 = vector.shape_cast %893 : vector<2x1x32xf32> to vector<2x32xf32>
    %895 = vector.shape_cast %892 : vector<2x32xf32> to vector<2x1x32xf32>
    tpu.vector_store %arg5[%c0_190, %c7_191, %c0_192], %895 {strides = array<i32>} : memref<2x8x32xf32, #tpu.memory_space<vmem>>, vector<2x1x32xf32>,
    %896 = vector.broadcast %890 : vector<2x1xf32> to vector<2x32xf32>
    %897 = arith.mulf %896, %882 : vector<2x32xf32>
    %c0_193 = arith.constant 0 : index
    %c0_194 = arith.constant 0 : index
    %c0_195 = arith.constant 0 : index
    %898 = vector.load %arg6[%c0_193, %c0_194, %c0_195] : memref<2x8x32xf32, #tpu.memory_space<vmem>>, vector<2x1x32xf32>
    %899 = vector.shape_cast %898 : vector<2x1x32xf32> to vector<2x32xf32>
    %900 = vector.shape_cast %897 : vector<2x32xf32> to vector<2x1x32xf32>
    tpu.vector_store %arg6[%c0_193, %c0_194, %c0_195], %900 {strides = array<i32>} : memref<2x8x32xf32, #tpu.memory_space<vmem>>, vector<2x1x32xf32>,
    %901 = vector.broadcast %886 : vector<2x1xf32> to vector<2x32xf32>
    %902 = arith.mulf %901, %856 : vector<2x32xf32>
    %cst_196 = arith.constant 1.000000e+00 : f32
    %903 = vector.broadcast %cst_196 : f32 to vector<2x1xf32>
    %904 = arith.subf %903, %886 : vector<2x1xf32>
    %905 = vector.extract_strided_slice %801 {offsets = [0, 0], sizes = [2, 32], strides = [1, 1]} : vector<2x64xf32> to vector<2x32xf32>
    %906 = vector.broadcast %904 : vector<2x1xf32> to vector<2x32xf32>
    %907 = arith.mulf %906, %905 : vector<2x32xf32>
    %908 = arith.addf %902, %907 : vector<2x32xf32>
    %909 = vector.broadcast %890 : vector<2x1xf32> to vector<2x32xf32>
    %910 = arith.mulf %909, %882 : vector<2x32xf32>
    %cst_197 = arith.constant 1.000000e+00 : f32
    %911 = vector.broadcast %cst_197 : f32 to vector<2x1xf32>
    %912 = arith.subf %911, %890 : vector<2x1xf32>
    %913 = vector.extract_strided_slice %801 {offsets = [0, 32], sizes = [2, 32], strides = [1, 1]} : vector<2x64xf32> to vector<2x32xf32>
    %914 = vector.broadcast %912 : vector<2x1xf32> to vector<2x32xf32>
    %915 = arith.mulf %914, %913 : vector<2x32xf32>
    %916 = arith.addf %910, %915 : vector<2x32xf32>
    %917 = tpu.concatenate %908, %916 in 1 : vector<2x32xf32>, vector<2x32xf32> -> vector<2x64xf32>
    %918 = vector.broadcast %886 : vector<2x1xf32> to vector<2x32xf32>
    %919 = arith.mulf %918, %854 : vector<2x32xf32>
    %cst_198 = arith.constant 1.000000e+00 : f32
    %920 = vector.broadcast %cst_198 : f32 to vector<2x1xf32>
    %921 = arith.subf %920, %886 : vector<2x1xf32>
    %922 = vector.extract_strided_slice %818 {offsets = [0, 0], sizes = [2, 32], strides = [1, 1]} : vector<2x64xf32> to vector<2x32xf32>
    %923 = vector.broadcast %921 : vector<2x1xf32> to vector<2x32xf32>
    %924 = arith.mulf %923, %922 : vector<2x32xf32>
    %925 = arith.addf %919, %924 : vector<2x32xf32>
    %926 = vector.broadcast %890 : vector<2x1xf32> to vector<2x32xf32>
    %927 = arith.mulf %926, %880 : vector<2x32xf32>
    %cst_199 = arith.constant 1.000000e+00 : f32
    %928 = vector.broadcast %cst_199 : f32 to vector<2x1xf32>
    %929 = arith.subf %928, %890 : vector<2x1xf32>
    %930 = vector.extract_strided_slice %818 {offsets = [0, 32], sizes = [2, 32], strides = [1, 1]} : vector<2x64xf32> to vector<2x32xf32>
    %931 = vector.broadcast %929 : vector<2x1xf32> to vector<2x32xf32>
    %932 = arith.mulf %931, %930 : vector<2x32xf32>
    %933 = arith.addf %927, %932 : vector<2x32xf32>
    %934 = tpu.concatenate %925, %933 in 1 : vector<2x32xf32>, vector<2x32xf32> -> vector<2x64xf32>
    %c0_200 = arith.constant 0 : index
    %c0_201 = arith.constant 0 : index
    %935 = vector.load %arg7[%c0_200, %c0_201] : memref<2x64xf32, #tpu.memory_space<vmem>>, vector<2x64xf32>
    tpu.vector_store %arg7[%c0_200, %c0_201], %917 {strides = array<i32>} : memref<2x64xf32, #tpu.memory_space<vmem>>, vector<2x64xf32>,
    %c0_202 = arith.constant 0 : index
    %c0_203 = arith.constant 0 : index
    %936 = vector.load %arg8[%c0_202, %c0_203] : memref<2x64xf32, #tpu.memory_space<vmem>>, vector<2x64xf32>
    tpu.vector_store %arg8[%c0_202, %c0_203], %934 {strides = array<i32>} : memref<2x64xf32, #tpu.memory_space<vmem>>, vector<2x64xf32>,
    return
  }
  func.func @transform_0(%arg0: i32) -> (i32, i32, i32) {
    %c0_i32 = arith.constant 0 : i32
    %c0_i32_0 = arith.constant 0 : i32
    %c0_i32_1 = arith.constant 0 : i32
    return %c0_i32, %arg0, %c0_i32_0 : i32, i32, i32
  }
  func.func @transform_1(%arg0: i32) -> (i32, i32, i32) {
    %c0_i32 = arith.constant 0 : i32
    %0 = arith.subi %c0_i32, %arg0 : i32
    %c0_i32_0 = arith.constant 0 : i32
    %c0_i32_1 = arith.constant 0 : i32
    %c0_i32_2 = arith.constant 0 : i32
    return %c0_i32_0, %0, %c0_i32_1 : i32, i32, i32
  }
  func.func @transform_2(%arg0: i32) -> (i32, i32) {
    %c0_i32 = arith.constant 0 : i32
    %c0_i32_0 = arith.constant 0 : i32
    %c0_i32_1 = arith.constant 0 : i32
    return %c0_i32, %c0_i32_0 : i32, i32
  }
  func.func @transform_3(%arg0: i32) -> (i32, i32) {
    %c0_i32 = arith.constant 0 : i32
    %c0_i32_0 = arith.constant 0 : i32
    %c0_i32_1 = arith.constant 0 : i32
    return %c0_i32, %c0_i32_0 : i32, i32
  }
  func.func @transform_4(%arg0: i32) -> (i32, i32, i32) {
    %c0_i32 = arith.constant 0 : i32
    %c0_i32_0 = arith.constant 0 : i32
    %c0_i32_1 = arith.constant 0 : i32
    return %c0_i32, %arg0, %c0_i32_0 : i32, i32, i32
  }
  func.func @transform_5(%arg0: i32) -> (i32, i32, i32) {
    %c0_i32 = arith.constant 0 : i32
    %0 = arith.subi %c0_i32, %arg0 : i32
    %c0_i32_0 = arith.constant 0 : i32
    %c0_i32_1 = arith.constant 0 : i32
    %c0_i32_2 = arith.constant 0 : i32
    return %c0_i32_0, %0, %c0_i32_1 : i32, i32, i32
  }
}

</mosaic_0001>

<bundles_post_ra>
// kernel: bilstm_crf_forward.5
= control target key start
LH: loop header
LB: loop body
LE: loop exit
PB: predicated region body
PF: predicated region fallthrough
CT: control target
= control target key end

     0   :  { %vm35_vm0 = vcmask 261120   ;;  %s353_s21 = smov 8   ;;  %s355_s22 = smov 32   ;;  %vm251_vm1 = vcmask 64512   ;;  %vm254_vm2 = vcmask 130048   ;;  %vm257_vm3 = vcmask 195584   ;;  %s448_s3 = inlined_call_operand.vmem [shape: f32[32,8], index: 3, kind: input, shape index: {}]   ;;  %s449_s2 = inlined_call_operand.vmem [shape: f32[32,8], index: 2, kind: input, shape index: {}]   ;;  %s450_s1 = inlined_call_operand.vmem [shape: f32[16,32], index: 1, kind: input, shape index: {}]   ;;  %s451_s0 = inlined_call_operand.vmem [shape: f32[16,32], index: 0, kind: input, shape index: {}]   ;;  %s452_s4 = inlined_call_operand.vmem [shape: f32[1,8], index: 4, kind: input, shape index: {}]   ;;  %s453_s5 = inlined_call_operand.vmem [shape: f32[1,64], index: 5, kind: input, shape index: {}]   ;;  %s454_s6 = inlined_call_operand.vmem [shape: f32[16,64], index: 6, kind: output, shape index: {}]  }
   0x1   :  { %v31_v0 = vld [vmem:[%s448_s3] sm:$0xff]  ;;  %v32_v1 = vld [vmem:[%s448_s3 + $0x8] sm:$0xff]  ;;  %v33_v5 = vld [vmem:[%s448_s3 + $0x10] sm:$0xff]  ;;  %s356_s23 = smov 40   ;;  %s358_s24 = smov 56   ;;  %vm262_vm4 = vcmask 326656  }
   0x2   :  { %v25_v2 = vld [vmem:[%s449_s2] sm:$0xff]  ;;  %v327_v3 = vpack.c.bf16 %v32_v1, %v31_v0  ;;  %v26_v4 = vld [vmem:[%s449_s2 + $0x8] sm:$0xff]  ;;  %v34_v6 = vld [vmem:[%s448_s3 + $0x18] sm:$0xff]  ;;  %vm265_vm5 = vcmask 392192   ;;  %vm268_vm6 = vcmask 457728   ;;  %vm280_vm7 = vcmask 523264  }
   0x3   :  { %v335_v7 = vpack.c.bf16 %v26_v4, %v25_v2  ;;  %v331_v8 = vpack.c.bf16 %v34_v6, %v33_v5  ;;  %v27_v9 = vld [vmem:[%s449_s2 + $0x10] sm:$0xff]  ;;  %v28_v10 = vld [vmem:[%s449_s2 + $0x18] sm:$0xff]  ;;  %v29_v11 = vld [vmem:[%s450_s1] sm:$0xff] }
   0x4   :  { %328 = vmatprep.subr.bf16.mxu1 %v327_v3  ;;  %v339_v12 = vpack.c.bf16 %v28_v10, %v27_v9  ;;  %313 = vmatprep.mubr.msk.f32.mxu1 %vm35_vm0, %v29_v11  ;;  %v23_v13 = vld [vmem:[%s451_s0] sm:$0xff]  ;;  %v30_v14 = vld [vmem:[%s450_s1 + $0x8] sm:$0xff]  ;;  %s352_s1 = smov 16  }
   0x5   :  { %336 = vmatprep.subr.bf16.mxu0 %v335_v7  ;;  %330 = vmatpush3.bf16.msra.mxu1 %v327_v3  ;;  %v24_v15 = vld [vmem:[%s451_s0 + $0x8] sm:$0xff]  ;;  %v291_v18 = vld [vmem:[%s452_s4] ss:$0 sm:$0xff]  ;;  %s354_s0 = smov 24   ;;  %s357_s4 = smov 48  }
   0x6   :  { %338 = vmatpush3.bf16.msra.mxu0 %v335_v7  ;;  %332 = vmatprep.subr.bf16.mxu1 %v331_v8  ;;  %v292_v47 = vld [vmem:[%s453_s5] ss:$0 sm:$0xff] }
   0x7   :  { %340 = vmatprep.subr.bf16.mxu0 %v339_v12  ;;  %324 = vmatprep.mubr.msk.f32.mxu0 %vm35_vm0, %v23_v13 }
   0x9   :  { %334 = vmatpush3.bf16.msra.mxu1 %v331_v8 }
   0xa   :  { %342 = vmatpush3.bf16.msra.mxu0 %v339_v12 }
   0xc   :  { %314 = vmatmul.mubr.msk.f32.vlgmr.msra.gmra.mrb[0].mxu1 %vm35_vm0, %v30_v14 }
   0xd   :  { %325 = vmatmul.mubr.msk.f32.vlgmr.msra.gmra.mrb[0].mxu0 %vm35_vm0, %v24_v15 }
  0xdf   :  { %v315_v16 = vpop.f32.mrb[0].mxu1 }
  0xe0   :  { %v326_v17 = vpop.f32.mrb[0].mxu0  ;;  %v108_v19 = vpop.f32.mrb[1].mxu1 }
  0xe1   :  { %v195_v20 = vadd.f32 %v326_v17, %v315_v16  ;;  %v189_v21 = vpop.f32.mrb[1].mxu0 }
  0xe2   :  { %v190_v22 = vadd.f32 %v189_v21, %v108_v19 }
  0xe3   :  { %v206_v23 = vadd.f32 %v291_v18, %v195_v20 }
  0xe4   :  { %v205_v24 = vadd.f32 %v291_v18, %v190_v22 }
  0xe5   :  { %217 = vrot.lane.b32.xlu1 %v206_v23, %s352_s1  ;;  %211 = vrot.lane.b32.xlu0 %v206_v23, %s353_s21 }
  0xe9   :  { %223 = vrot.lane.b32.xlu1 %v206_v23, %s354_s0  ;;  %209 = vrot.lane.b32.xlu0 %v205_v24, %s353_s21 }
  0xed   :  { %229 = vrot.lane.b32.xlu1 %v206_v23, %s355_s22  ;;  %221 = vrot.lane.b32.xlu0 %v205_v24, %s354_s0 }
  0xf1   :  { %235 = vrot.lane.b32.xlu1 %v206_v23, %s356_s23  ;;  %227 = vrot.lane.b32.xlu0 %v205_v24, %s355_s22 }
  0xf5   :  { %215 = vrot.lane.b32.xlu1 %v205_v24, %s352_s1  ;;  %233 = vrot.lane.b32.xlu0 %v205_v24, %s356_s23 }
  0xf9   :  { %241 = vrot.lane.b32.xlu1 %v206_v23, %s357_s4  ;;  %239 = vrot.lane.b32.xlu0 %v205_v24, %s357_s4 }
  0xfd   :  { %247 = vrot.lane.b32.xlu1 %v206_v23, %s358_s24  ;;  %245 = vrot.lane.b32.xlu0 %v205_v24, %s358_s24 }
 0x157   :  { %v218_v25 = vpop.permute.xlu1 %217  ;;  %v212_v26 = vpop.permute.xlu0 %211 }
 0x158   :  { %v253_v36 = vsel %vm251_vm1, %v206_v23, %v212_v26 }
 0x159   :  { %v256_v40 = vsel %vm254_vm2, %v253_v36, %v218_v25 }
 0x15b   :  { %v224_v27 = vpop.permute.xlu1 %223  ;;  %v210_v28 = vpop.permute.xlu0 %209 }
 0x15c   :  { %v252_v33 = vsel %vm251_vm1, %v205_v24, %v210_v28  ;;  %v259_v43 = vsel %vm257_vm3, %v256_v40, %v224_v27 }
 0x15f   :  { %v230_v29 = vpop.permute.xlu1 %229  ;;  %v222_v30 = vpop.permute.xlu0 %221 }
 0x160   :  { %v261_v45 = vsel %vm35_vm0, %v259_v43, %v230_v29 }
 0x163   :  { %v236_v31 = vpop.permute.xlu1 %235  ;;  %v228_v32 = vpop.permute.xlu0 %227 }
 0x164   :  { %v264_v46 = vsel %vm262_vm4, %v261_v45, %v236_v31 }
 0x167   :  { %v216_v34 = vpop.permute.xlu1 %215  ;;  %v234_v35 = vpop.permute.xlu0 %233 }
 0x168   :  { %v255_v37 = vsel %vm254_vm2, %v252_v33, %v216_v34 }
 0x169   :  { %v258_v38 = vsel %vm257_vm3, %v255_v37, %v222_v30 }
 0x16a   :  { %v260_v39 = vsel %vm35_vm0, %v258_v38, %v228_v32 }
 0x16b   :  { %v242_v41 = vpop.permute.xlu1 %241  ;;  %v240_v42 = vpop.permute.xlu0 %239  ;;  %v263_v44 = vsel %vm262_vm4, %v260_v39, %v234_v35 }
 0x16c   :  { %v267_v48 = vsel %vm265_vm5, %v264_v46, %v242_v41  ;;  %v266_v49 = vsel %vm265_vm5, %v263_v44, %v240_v42 }
 0x16f   :  { %v248_v50 = vpop.permute.xlu1 %247  ;;  %v246_v51 = vpop.permute.xlu0 %245 }
 0x170   :  { %v270_v52 = vsel %vm268_vm6, %v267_v48, %v248_v50  ;;  %v269_v53 = vsel %vm268_vm6, %v266_v49, %v246_v51 }
 0x171   :  { %v279_v54 = vadd.f32 %v292_v47, %v270_v52  ;;  %v278_v55 = vadd.f32 %v292_v47, %v269_v53 }
 0x173   :  { %282 = vst.msk [vmem:[%s454_s6 + $0x8] sm:$0xff] %vm280_vm7, %v279_v54  ;;  %281 = vst.msk [vmem:[%s454_s6] sm:$0xff] %vm280_vm7, %v278_v55 }

// kernel: bilstm_crf_forward.3
= control target key start
LH: loop header
LB: loop body
LE: loop exit
PB: predicated region body
PF: predicated region fallthrough
CT: control target
= control target key end

     0   :  { %v139_v3 = vmov 0.0   ;;  %vm34_vm0 = vcmask 130048   ;;  %v24_v9 = vlaneseq  ;;  %s198_s1 = inlined_call_operand.vmem [shape: f32[16,256], index: 1, kind: input, shape index: {}]   ;;  %s199_s0 = inlined_call_operand.vmem [shape: f32[16,16], index: 0, kind: input, shape index: {}]   ;;  %s200_s2 = inlined_call_operand.vmem [shape: f32[1,256], index: 2, kind: input, shape index: {}]   ;;  %s201_s3 = inlined_call_operand.vmem [shape: f32[16,128], index: 3, kind: output, shape index: {0}]   ;;  %s202_s4 = inlined_call_operand.vmem [shape: f32[16,128], index: 4, kind: output, shape index: {1}]  }
   0x1   :  { %v19_v0 = vld [vmem:[%s198_s1 + $0x8] sm:$0xff]  ;;  %v21_v1 = vld [vmem:[%s198_s1 + $0x18] sm:$0xff]  ;;  %v18_v2 = vld [vmem:[%s198_s1] sm:$0xff]  ;;  %105 = vmatprep.mubr.f32.mxu0 %v139_v3  ;;  %111 = vmatprep.mubr.f32.mxu1 %v139_v3 }
   0x2   :  { %v132_v4 = vpack.c.bf16 %v21_v1, %v19_v0  ;;  %v20_v5 = vld [vmem:[%s198_s1 + $0x10] sm:$0xff]  ;;  %v16_v7 = vld [vmem:[%s199_s0] sm:$0xff]  ;;  %v17_v8 = vld [vmem:[%s199_s0 + $0x8] sm:$0xff]  ;;  %v25_v10 = vshrl.u32 %v24_v9, 7 }
   0x3   :  { %v134_v6 = vpack.c.bf16 %v20_v5, %v18_v2  ;;  %v22_v12 = vld [vmem:[%s200_s2] sm:$0x3] }
   0x4   :  { %133 = vmatprep.subr.bf16.mxu0 %v132_v4  ;;  %136 = vmatprep.subr.bf16.mxu1 %v132_v4  ;;  %v26_v11 = vsub.s32 0, %v25_v10  ;;  %v30_v13 = vsub.s32 1, %v25_v10 }
   0x5   :  { %135 = vmatpush1.bf16.msra.mxu0 %v134_v6  ;;  %137 = vmatpush1.bf16.msra.mxu1 %v134_v6 }
   0x6   :  { %v27_v14 = vrot.slane %v22_v12, %v26_v11  ;;  %v31_v15 = vrot.slane %v22_v12, %v30_v13 }
   0x8   :  { %130 = vmatmul.mubr.msk.f32.vlgmr.msra.gmra.mrb[0].mxu0 %vm34_vm0, %v16_v7  ;;  %131 = vmatmul.mubr.msk.f32.vlgmr.msra.gmra.mrb[0].mxu1 %vm34_vm0, %v17_v8 }
  0xdb   :  { %v107_v16 = vpop.f32.mrb[0].mxu0  ;;  %v113_v17 = vpop.f32.mrb[0].mxu1 }
  0xdc   :  { %v108_v18 = vadd.f32 %v107_v16, %v27_v14  ;;  %v114_v19 = vadd.f32 %v113_v17, %v27_v14  ;;  %v109_v20 = vpop.f32.mrb[1].mxu0  ;;  %v115_v21 = vpop.f32.mrb[1].mxu1 }
  0xdd   :  { %v110_v22 = vadd.f32 %v109_v20, %v31_v15  ;;  %v116_v23 = vadd.f32 %v115_v21, %v31_v15 }
  0xde   :  { %118 = vst [vmem:[%s201_s3] sm:$0xff] %v108_v18  ;;  %119 = vst [vmem:[%s201_s3 + $0x8] sm:$0xff] %v114_v19 }
  0xdf   :  { %120 = vst [vmem:[%s202_s4] sm:$0xff] %v110_v22  ;;  %121 = vst [vmem:[%s202_s4 + $0x8] sm:$0xff] %v116_v23 }

// kernel: bilstm_crf_forward.4
= control target key start
LH: loop header
LB: loop body
LE: loop exit
PB: predicated region body
PF: predicated region fallthrough
CT: control target
= control target key end

     0   :  { %vm51_vm0 = vcmask 517120   ;;  %v2777_v3 = vmov 0.0   ;;  %s2778_s21 = smov 32   ;;  %vm90_vm1 = vcmask 523264   ;;  %vm82_vm2 = vcmask 1041409   ;;  %s2780_s8 = smov 64   ;;  %s3778_s3 = inlined_call_operand.vmem [shape: f32[64,256], index: 3, kind: input, shape index: {}]   ;;  %s3779_s0 = inlined_call_operand.vmem [shape: f32[2,8,128], index: 0, kind: input, shape index: {}]   ;;  %s3780_s1 = inlined_call_operand.vmem [shape: f32[2,8,128], index: 1, kind: input, shape index: {}]   ;;  %s3781_s2 = inlined_call_operand.vmem [shape: s32[2,1], index: 2, kind: input, shape index: {}]   ;;  %s3782_s4 = inlined_call_operand.vmem [shape: f32[2,8,32], index: 4, kind: output, shape index: {0}]   ;;  %s3783_s5 = inlined_call_operand.vmem [shape: f32[2,8,32], index: 5, kind: output, shape index: {1}]  }
   0x1   :  { %v56_v0 = vld [vmem:[%s3778_s3 + $0x8] sm:$0xff]  ;;  %v58_v1 = vld [vmem:[%s3778_s3 + $0x18] sm:$0xff]  ;;  %v55_v2 = vld [vmem:[%s3778_s3] sm:$0xff]  ;;  %158 = vmatprep.mubr.f32.mxu0 %v2777_v3  ;;  %52 = vst.msk [vmem:[#allocation2] sm:$0x3] %vm51_vm0, %v2777_v3  ;;  %450 = vmatprep.mubr.f32.mxu1 %v2777_v3  ;;  %v2779_v39 = vmov 0  }
   0x2   :  { %53 = vst.msk [vmem:[#allocation3] sm:$0x3] %vm51_vm0, %v2777_v3  ;;  %v2828_v4 = vpack.c.bf16 %v58_v1, %v56_v0  ;;  %v57_v5 = vld [vmem:[%s3778_s3 + $0x10] sm:$0xff]  ;;  %v60_v6 = vld [vmem:[%s3778_s3 + $0x28] sm:$0xff]  ;;  %v62_v7 = vld [vmem:[%s3778_s3 + $0x38] sm:$0xff]  ;;  %2607 = vset.pattern.permute.xlu1 %v2779_v39  ;;  %2608 = vset.pattern.permute.xlu0 %v2779_v39  ;;  %vm350_vm5 = vcmask 261120  }
   0x3   :  { %v2839_v8 = vpack.c.bf16 %v57_v5, %v55_v2  ;;  %v2841_v9 = vpack.c.bf16 %v62_v7, %v60_v6  ;;  %v59_v10 = vld [vmem:[%s3778_s3 + $0x20] sm:$0xff]  ;;  %v61_v11 = vld [vmem:[%s3778_s3 + $0x30] sm:$0xff]  ;;  %v64_v12 = vld [vmem:[%s3778_s3 + $0x48] sm:$0xff]  ;;  %vm270_vm12 = vcmask 253952  }
   0x4   :  { %2474 = vmatprep.subr.bf16.mxu0 %v2828_v4  ;;  %v66_v13 = vld [vmem:[%s3778_s3 + $0x58] sm:$0xff]  ;;  %2490 = vmatprep.subr.bf16.mxu1 %v2828_v4  ;;  %v2858_v14 = vpack.c.bf16 %v61_v11, %v59_v10  ;;  %v63_v16 = vld [vmem:[%s3778_s3 + $0x40] sm:$0xff]  ;;  %v65_v17 = vld [vmem:[%s3778_s3 + $0x50] sm:$0xff] }
   0x5   :  { %2476 = vmatpush1.bf16.msra.mxu0 %v2839_v8  ;;  %2492 = vmatpush1.bf16.msra.mxu1 %v2839_v8  ;;  %v2862_v15 = vpack.c.bf16 %v66_v13, %v64_v12  ;;  %v68_v18 = vld [vmem:[%s3778_s3 + $0x68] sm:$0xff]  ;;  %v70_v19 = vld [vmem:[%s3778_s3 + $0x78] sm:$0xff]  ;;  %v2880_v21 = vpack.c.bf16 %v65_v17, %v63_v16  ;;  %v67_v23 = vld [vmem:[%s3778_s3 + $0x60] sm:$0xff] }
   0x6   :  { %2478 = vmatprep.subr.bf16.mxu0 %v2841_v9  ;;  %2494 = vmatprep.subr.bf16.mxu1 %v2841_v9  ;;  %v2885_v22 = vpack.c.bf16 %v70_v19, %v68_v18  ;;  %v69_v24 = vld [vmem:[%s3778_s3 + $0x70] sm:$0xff]  ;;  %v76_v27 = vld [vmem:[%s3779_s0 + $0x8] sm:$0x1]  ;;  %v78_v28 = vld [vmem:[%s3780_s1 + $0xf] sm:$0x1] }
   0x7   :  { %v2896_v25 = vpack.c.bf16 %v69_v24, %v67_v23  ;;  %v81_v29 = vrot.slane %v76_v27, 7  ;;  %v75_v30 = vld [vmem:[%s3779_s0] sm:$0x1]  ;;  %v87_v31 = vrot.slane %v78_v28, 7  ;;  %v77_v32 = vld [vmem:[%s3780_s1 + $0x7] sm:$0x1] }
   0x8   :  { %v2902_v26 = vld [vmem:[#allocation2] sm:$0x3]  ;;  %v370_v39 = vld [vmem:[%s3779_s0 + $0x9] sm:$0x1] }
   0x9   :  { %v2877_v20 = vld [vmem:[#allocation3] sm:$0x3]  ;;  %2480 = vmatpush1.bf16.msra.mxu0 %v2858_v14  ;;  %2496 = vmatpush1.bf16.msra.mxu1 %v2858_v14  ;;  %v83_v33 = vsel %vm82_vm2, %v81_v29, %v75_v30  ;;  %v88_v35 = vsel %vm82_vm2, %v87_v31, %v77_v32  ;;  %v2937_v48 = vld [vmem:[%s3781_s2] sm:$0x3]  ;;  %s2781_s2 = smov 96  }
   0xa   :  { %175 = vrot.lane.b32.xlu1 %v2877_v20, %s2778_s21  ;;  %2482 = vmatprep.subr.bf16.mxu0 %v2862_v15  ;;  %vm220_vm3 = vcmp.gt.s32.totalorder %v2937_v48, 0  ;;  %vm224_vm4 = vcmp.gt.s32.totalorder %v2937_v48, 7  ;;  %vm512_vm6 = vcmp.gt.s32.totalorder %v2937_v48, 1  ;;  %vm516_vm7 = vcmp.gt.s32.totalorder %v2937_v48, 6 }
   0xb   :  { %2498 = vmatprep.subr.bf16.mxu1 %v2862_v15  ;;  %v2941_v51 = vsel %vm220_vm3, 1.0, %v2777_v3  ;;  %v2947_v56 = vsel %vm224_vm4, 1.0, %v2777_v3  ;;  %vm802_vm8 = vcmp.gt.s32.totalorder %v2937_v48, 2  ;;  %vm806_vm9 = vcmp.gt.s32.totalorder %v2937_v48, 5 }
   0xc   :  { %v318_v53 = vsub.f32 1.0, %v2941_v51  ;;  %v330_v58 = vsub.f32 1.0, %v2947_v56  ;;  %v2609_v59 = vpack.i.bf16 %v2947_v56, %v2941_v51  ;;  %vm1092_vm10 = vcmp.gt.s32.totalorder %v2937_v48, 3 }
   0xd   :  { %2484 = vmatpush1.bf16.msra.mxu0 %v2880_v21  ;;  %2500 = vmatpush1.bf16.msra.mxu1 %v2880_v21  ;;  %vm1096_vm11 = vcmp.gt.s32.totalorder %v2937_v48, 4 }
   0xe   :  { %2486 = vmatprep.subr.bf16.mxu0 %v2885_v22  ;;  %2502 = vmatprep.subr.bf16.mxu1 %v2885_v22 }
  0x11   :  { %2488 = vmatpush1.bf16.msra.mxu0 %v2896_v25  ;;  %2504 = vmatpush1.bf16.msra.mxu1 %v2896_v25 }
  0x12   :  { %2506 = vmatprep.subr.bf16.mxu0 %v2828_v4  ;;  %2522 = vmatprep.subr.bf16.mxu1 %v2828_v4 }
  0x14   :  { %2433 = vmatmul.mubr.msk.f32.vlgmr.msra.gmra.mrb[0].mxu0 %vm90_vm1, %v2902_v26 }
  0x15   :  { %2508 = vmatpush1.bf16.msra.mxu0 %v2839_v8  ;;  %740 = vmatprep.mubr.f32.mxu0 %v2777_v3 }
  0x16   :  { %2510 = vmatprep.subr.bf16.mxu0 %v2841_v9 }
  0x19   :  { %2512 = vmatpush1.bf16.msra.mxu0 %v2858_v14 }
  0x1a   :  { %2514 = vmatprep.subr.bf16.mxu0 %v2862_v15 }
  0x1d   :  { %2516 = vmatpush1.bf16.msra.mxu0 %v2880_v21 }
  0x1e   :  { %2518 = vmatprep.subr.bf16.mxu0 %v2885_v22 }
  0x21   :  { %2520 = vmatpush1.bf16.msra.mxu0 %v2896_v25 }
  0x22   :  { %2538 = vmatprep.subr.bf16.mxu0 %v2828_v4 }
  0x7c   :  { %v176_v60 = vpop.permute.xlu1 %175 }
  0xe7   :  { %v160_v34 = vpop.f32.mrb[0].mxu0 }
  0xe8   :  { %v165_v36 = vadd.f32 %v160_v34, %v83_v33  ;;  %v162_v37 = vpop.f32.mrb[1].mxu0 }
  0xe9   :  { %v166_v38 = vadd.f32 %v162_v37, %v88_v35 }
  0xea   :  { %2649 = vtanh.f32 %v165_v36  ;;  %v2434_v42 = vmul.f32 -1.442695, %v165_v36 }
  0xeb   :  { %2651 = vtanh.f32 %v166_v38  ;;  %v2435_v43 = vmul.f32 -1.442695, %v166_v38 }
  0xec   :  { %2653 = vpow2.f32 %v2434_v42  ;;  %v369_v42 = vld [vmem:[%s3779_s0 + $0x1] sm:$0x1] }
  0xed   :  { %2655 = vpow2.f32 %v2435_v43 }
  0xf4   :  { %v2650_v40 = vpop.eup %2649 }
  0xf5   :  { %180 = vrot.lane.b32.xlu0 %v2650_v40, %s2780_s8  ;;  %v2652_v41 = vpop.eup %2651  ;;  %v372_v40 = vld [vmem:[%s3780_s1 + $0xe] sm:$0x1] }
  0xf6   :  { %v2654_v44 = vpop.eup %2653  ;;  %v380_v43 = vrot.slane %v372_v40, 7 }
  0xf7   :  { %v170_v45 = vadd.f32 1.0, %v2654_v44  ;;  %v2656_v46 = vpop.eup %2655  ;;  %v371_v44 = vld [vmem:[%s3780_s1 + $0x6] sm:$0x1] }
  0xf8   :  { %v198_v47 = vadd.f32 1.0, %v2656_v46  ;;  %v381_v46 = vsel %vm82_vm2, %v380_v43, %v371_v44 }
  0xf9   :  { %204 = vrot.lane.b32.xlu0 %v2652_v41, %s2780_s8  ;;  %2657 = vrcp.f32 %v170_v45  ;;  %v375_v41 = vrot.slane %v370_v39, 7 }
  0xfa   :  { %2659 = vrcp.f32 %v198_v47 }
  0xfb   :  { %v376_v45 = vsel %vm82_vm2, %v375_v41, %v369_v42 }
 0x103   :  { %v2658_v49 = vpop.eup %2657 }
 0x104   :  { %v2660_v54 = vpop.eup %2659  ;;  %v178_v61 = vmul.f32 %v2658_v49, %v176_v60 }
 0x105   :  { %v202_v0 = vmul.f32 %v2660_v54, %v2877_v20 }
 0x167   :  { %v181_v50 = vpop.permute.xlu0 %180 }
 0x168   :  { %v183_v52 = vmul.f32 %v2658_v49, %v181_v50 }
 0x16a   :  { %185 = vrot.lane.b32.xlu1 %v183_v52, %s2778_s21 }
 0x16b   :  { %v205_v55 = vpop.permute.xlu0 %204 }
 0x16c   :  { %v207_v57 = vmul.f32 %v2660_v54, %v205_v55 }
 0x16e   :  { %209 = vrot.lane.b32.xlu0 %v207_v57, %s2778_s21  ;;  %321 = vperm.xlu1 %2607, %v318_v53  }
 0x172   :  { %333 = vperm.xlu0 %2608, %v330_v58   ;;  %2610 = vperm.xlu1 %2607, %v2609_v59  }
 0x1dc   :  { %v186_v62 = vpop.permute.xlu1 %185 }
 0x1dd   :  { %v188_v63 = vadd.f32 %v186_v62, %v178_v61 }
 0x1df   :  { %2661 = vtanh.f32 %v188_v63 }
 0x1e0   :  { %v210_v1 = vpop.permute.xlu0 %209 }
 0x1e1   :  { %v212_v2 = vadd.f32 %v210_v1, %v202_v0 }
 0x1e3   :  { %2663 = vtanh.f32 %v212_v2 }
 0x1e9   :  { %v2662_v5 = vpop.eup %2661 }
 0x1ea   :  { %191 = vrot.lane.b32.xlu1 %v2662_v5, %s2780_s8 }
 0x1ed   :  { %v2664_v6 = vpop.eup %2663  ;;  %v322_v7 = vpop.permute.xlu1 %321 }
 0x1ee   :  { %v324_v10 = vmul.f32 %v322_v7, %v2902_v26  ;;  %215 = vrot.lane.b32.xlu0 %v2664_v6, %s2780_s8 }
 0x1f0   :  { %326 = vrot.lane.b32.xlu1 %v324_v10, %s2781_s2  ;;  %v3014_v10 = vsel %vm512_vm6, 1.0, %v2777_v3 }
 0x1f1   :  { %v334_v11 = vpop.permute.xlu0 %333  ;;  %v2611_v13 = vpop.permute.xlu1 %2610 }
 0x1f2   :  { %v336_v12 = vmul.f32 %v334_v11, %v2902_v26  ;;  %v2612_v18 = vunpack.i.l.bf16 %v2611_v13  ;;  %v2613_v28 = vunpack.i.h.bf16 %v2611_v13  ;;  %v353_v26 = vmul.f32 %v322_v7, %v2877_v20 }
 0x1f3   :  { %v360_v57 = vmul.f32 %v334_v11, %v2877_v20 }
 0x1f4   :  { %338 = vrot.lane.b32.xlu0 %v336_v12, %s2780_s8  ;;  %v352_v34 = vmul.f32 %v2612_v18, %v188_v63 }
 0x25c   :  { %v192_v16 = vpop.permute.xlu1 %191 }
 0x25d   :  { %v194_v17 = vmul.f32 %v2658_v49, %v192_v16  ;;  %v3017_v16 = vsel %vm516_vm7, 1.0, %v2777_v3 }
 0x25f   :  { %v2964_v24 = vmul.f32 %v2612_v18, %v194_v17  ;;  %v609_v18 = vsub.f32 1.0, %v3014_v10 }
 0x260   :  { %v216_v19 = vpop.permute.xlu0 %215 }
 0x261   :  { %v218_v23 = vmul.f32 %v2660_v54, %v216_v19  ;;  %v359_v54 = vmul.f32 %v2613_v28, %v212_v2  ;;  %v621_v19 = vsub.f32 1.0, %v3017_v16 }
 0x262   :  { %v327_v27 = vpop.permute.xlu1 %326 }
 0x263   :  { %v329_v29 = vadd.f32 %v327_v27, %v2964_v24  ;;  %v2968_v30 = vmul.f32 %v2613_v28, %v218_v23  ;;  %v361_v61 = vadd.f32 %v360_v57, %v359_v54  ;;  %v2614_v23 = vpack.i.bf16 %v3017_v16, %v3014_v10 }
 0x265   :  { %343 = vrot.lane.b32.xlu1 %v329_v29, %s2778_s21 }
 0x266   :  { %v339_v31 = vpop.permute.xlu0 %338 }
 0x267   :  { %v341_v32 = vadd.f32 %v339_v31, %v2968_v30 }
 0x269   :  { %347 = vrot.lane.b32.xlu0 %v341_v32, %s2780_s8  ;;  %355 = vrot.lane.b32.xlu1 %v353_v26, %s2778_s21 }
 0x2d7   :  { %v344_v33 = vpop.permute.xlu1 %343 }
 0x2db   :  { %v348_v35 = vpop.permute.xlu0 %347  ;;  %v356_v36 = vpop.permute.xlu1 %355 }
 0x2dc   :  { %v2975_v37 = vsel %vm350_vm5, %v344_v33, %v348_v35  ;;  %v358_v38 = vadd.f32 %v356_v36, %v352_v34 }
 0x2dd   :  { %2438 = vmatmul.mubr.msk.f32.vlgmr.msra.gmra.mrb[0].mxu1 %vm90_vm1, %v2975_v37 }
 0x2de   :  { %363 = vrot.lane.b32.xlu0 %v358_v38, %s2781_s2  ;;  %2524 = vmatpush1.bf16.msra.mxu1 %v2839_v8 }
 0x2df   :  { %2526 = vmatprep.subr.bf16.mxu1 %v2841_v9  ;;  %1030 = vmatprep.mubr.f32.mxu1 %v2777_v3 }
 0x2e2   :  { %2528 = vmatpush1.bf16.msra.mxu1 %v2858_v14 }
 0x2e3   :  { %2530 = vmatprep.subr.bf16.mxu1 %v2862_v15 }
 0x2e6   :  { %2532 = vmatpush1.bf16.msra.mxu1 %v2880_v21 }
 0x2e7   :  { %2534 = vmatprep.subr.bf16.mxu1 %v2885_v22 }
 0x2ea   :  { %2536 = vmatpush1.bf16.msra.mxu1 %v2896_v25 }
 0x2eb   :  { %2554 = vmatprep.subr.bf16.mxu1 %v2828_v4 }
 0x350   :  { %v364_v60 = vpop.permute.xlu0 %363 }
 0x351   :  { %v3007_v62 = vsel %vm350_vm5, %v364_v60, %v361_v61 }
 0x3b0   :  { %v452_v47 = vpop.f32.mrb[0].mxu1 }
 0x3b1   :  { %v457_v49 = vadd.f32 %v452_v47, %v376_v45  ;;  %v454_v50 = vpop.f32.mrb[1].mxu1 }
 0x3b2   :  { %v458_v52 = vadd.f32 %v454_v50, %v381_v46 }
 0x3b3   :  { %2665 = vtanh.f32 %v457_v49  ;;  %v2439_v63 = vmul.f32 -1.442695, %v457_v49 }
 0x3b4   :  { %2667 = vtanh.f32 %v458_v52  ;;  %v2440_v0 = vmul.f32 -1.442695, %v458_v52 }
 0x3b5   :  { %2669 = vpow2.f32 %v2439_v63 }
 0x3b6   :  { %2671 = vpow2.f32 %v2440_v0 }
 0x3bd   :  { %v2666_v55 = vpop.eup %2665 }
 0x3be   :  { %v2668_v59 = vpop.eup %2667  ;;  %472 = vrot.lane.b32.xlu1 %v2666_v55, %s2780_s8 }
 0x3bf   :  { %496 = vrot.lane.b32.xlu0 %v2668_v59, %s2780_s8  ;;  %v2670_v1 = vpop.eup %2669 }
 0x3c0   :  { %v2672_v2 = vpop.eup %2671  ;;  %v462_v20 = vadd.f32 1.0, %v2670_v1 }
 0x3c1   :  { %v490_v5 = vadd.f32 1.0, %v2672_v2  ;;  %v660_v2 = vld [vmem:[%s3779_s0 + $0xa] sm:$0x1] }
 0x3c2   :  { %467 = vrot.lane.b32.xlu1 %v3007_v62, %s2778_s21  ;;  %2673 = vrcp.f32 %v462_v20  ;;  %v662_v20 = vld [vmem:[%s3780_s1 + $0xd] sm:$0x1] }
 0x3c3   :  { %2675 = vrcp.f32 %v490_v5  ;;  %v665_v5 = vrot.slane %v660_v2, 7 }
 0x3cc   :  { %v2674_v6 = vpop.eup %2673 }
 0x3cd   :  { %v2676_v11 = vpop.eup %2675 }
 0x3ce   :  { %v494_v31 = vmul.f32 %v2676_v11, %v3007_v62 }
 0x430   :  { %v473_v7 = vpop.permute.xlu1 %472 }
 0x431   :  { %v475_v12 = vmul.f32 %v2674_v6, %v473_v7  ;;  %v497_v13 = vpop.permute.xlu0 %496  ;;  %v670_v7 = vrot.slane %v662_v20, 7 }
 0x432   :  { %v499_v17 = vmul.f32 %v2676_v11, %v497_v13 }
 0x433   :  { %477 = vrot.lane.b32.xlu0 %v475_v12, %s2778_s21 }
 0x434   :  { %501 = vrot.lane.b32.xlu1 %v499_v17, %s2778_s21  ;;  %v468_v27 = vpop.permute.xlu1 %467 }
 0x435   :  { %v470_v28 = vmul.f32 %v2674_v6, %v468_v27 }
 0x437   :  { %612 = vperm.xlu0 %2608, %v609_v18  }
 0x438   :  { %624 = vperm.xlu1 %2607, %v621_v19  }
 0x43b   :  { %2615 = vperm.xlu0 %2608, %v2614_v23  }
 0x4a5   :  { %v478_v29 = vpop.permute.xlu0 %477 }
 0x4a6   :  { %v480_v26 = vadd.f32 %v478_v29, %v470_v28  ;;  %v502_v32 = vpop.permute.xlu1 %501 }
 0x4a7   :  { %v504_v33 = vadd.f32 %v502_v32, %v494_v31 }
 0x4a8   :  { %2677 = vtanh.f32 %v480_v26 }
 0x4a9   :  { %2679 = vtanh.f32 %v504_v33 }
 0x4b2   :  { %v2678_v34 = vpop.eup %2677 }
 0x4b3   :  { %v2680_v35 = vpop.eup %2679  ;;  %483 = vrot.lane.b32.xlu1 %v2678_v34, %s2780_s8 }
 0x4b4   :  { %507 = vrot.lane.b32.xlu0 %v2680_v35, %s2780_s8 }
 0x4b6   :  { %v613_v36 = vpop.permute.xlu0 %612 }
 0x4b7   :  { %v615_v38 = vmul.f32 %v613_v36, %v2975_v37  ;;  %v625_v39 = vpop.permute.xlu1 %624  ;;  %v643_v57 = vmul.f32 %v613_v36, %v3007_v62 }
 0x4b8   :  { %v627_v40 = vmul.f32 %v625_v39, %v2975_v37 }
 0x4b9   :  { %617 = vrot.lane.b32.xlu1 %v615_v38, %s2781_s2 }
 0x4ba   :  { %629 = vrot.lane.b32.xlu0 %v627_v40, %s2780_s8  ;;  %v2616_v41 = vpop.permute.xlu0 %2615 }
 0x4bb   :  { %v2617_v46 = vunpack.i.l.bf16 %v2616_v41  ;;  %v2618_v47 = vunpack.i.h.bf16 %v2616_v41 }
 0x4bd   :  { %v642_v63 = vmul.f32 %v2617_v46, %v480_v26  ;;  %v649_v29 = vmul.f32 %v2618_v47, %v504_v33  ;;  %v650_v26 = vmul.f32 %v625_v39, %v3007_v62 }
 0x4bf   :  { %v651_v35 = vadd.f32 %v650_v26, %v649_v29 }
 0x525   :  { %v484_v42 = vpop.permute.xlu1 %483 }
 0x526   :  { %v486_v43 = vmul.f32 %v2674_v6, %v484_v42  ;;  %v508_v44 = vpop.permute.xlu0 %507  ;;  %v659_v6 = vld [vmem:[%s3779_s0 + $0x2] sm:$0x1] }
 0x527   :  { %v510_v45 = vmul.f32 %v2676_v11, %v508_v44  ;;  %v661_v11 = vld [vmem:[%s3780_s1 + $0x5] sm:$0x1]  ;;  %v666_v12 = vsel %vm82_vm2, %v665_v5, %v659_v6  ;;  %v3086_v44 = vsel %vm802_vm8, 1.0, %v2777_v3 }
 0x528   :  { %v3036_v49 = vmul.f32 %v2617_v46, %v486_v43  ;;  %v671_v13 = vsel %vm82_vm2, %v670_v7, %v661_v11 }
 0x529   :  { %v3038_v52 = vmul.f32 %v2618_v47, %v510_v45 }
 0x52b   :  { %v618_v50 = vpop.permute.xlu1 %617 }
 0x52c   :  { %v620_v54 = vadd.f32 %v618_v50, %v3036_v49  ;;  %v630_v55 = vpop.permute.xlu0 %629  ;;  %v3089_v50 = vsel %vm806_vm9, 1.0, %v2777_v3 }
 0x52d   :  { %v632_v37 = vadd.f32 %v630_v55, %v3038_v52  ;;  %v899_v55 = vsub.f32 1.0, %v3086_v44 }
 0x52e   :  { %634 = vrot.lane.b32.xlu1 %v620_v54, %s2778_s21 }
 0x52f   :  { %638 = vrot.lane.b32.xlu0 %v632_v37, %s2780_s8  ;;  %v911_v37 = vsub.f32 1.0, %v3089_v50 }
 0x532   :  { %645 = vrot.lane.b32.xlu1 %v643_v57, %s2778_s21  ;;  %v2619_v57 = vpack.i.bf16 %v3089_v50, %v3086_v44 }
 0x5a0   :  { %v635_v59 = vpop.permute.xlu1 %634 }
 0x5a1   :  { %v639_v60 = vpop.permute.xlu0 %638 }
 0x5a2   :  { %v3047_v61 = vsel %vm350_vm5, %v635_v59, %v639_v60 }
 0x5a3   :  { %2443 = vmatmul.mubr.msk.f32.vlgmr.msra.gmra.mrb[2].mxu0 %vm90_vm1, %v3047_v61 }
 0x5a4   :  { %v646_v0 = vpop.permute.xlu1 %645  ;;  %2540 = vmatpush1.bf16.msra.mxu0 %v2839_v8  ;;  %1320 = vmatprep.mubr.f32.mxu0 %v2777_v3 }
 0x5a5   :  { %v648_v1 = vadd.f32 %v646_v0, %v642_v63  ;;  %2542 = vmatprep.subr.bf16.mxu0 %v2841_v9 }
 0x5a7   :  { %653 = vrot.lane.b32.xlu0 %v648_v1, %s2781_s2 }
 0x5a8   :  { %2544 = vmatpush1.bf16.msra.mxu0 %v2858_v14 }
 0x5a9   :  { %2546 = vmatprep.subr.bf16.mxu0 %v2862_v15 }
 0x5ac   :  { %2548 = vmatpush1.bf16.msra.mxu0 %v2880_v21 }
 0x5ad   :  { %2550 = vmatprep.subr.bf16.mxu0 %v2885_v22 }
 0x5b0   :  { %2552 = vmatpush1.bf16.msra.mxu0 %v2896_v25 }
 0x5b1   :  { %2570 = vmatprep.subr.bf16.mxu0 %v2828_v4 }
 0x619   :  { %v654_v34 = vpop.permute.xlu0 %653 }
 0x61a   :  { %v3079_v36 = vsel %vm350_vm5, %v654_v34, %v651_v35 }
 0x676   :  { %v742_v17 = vpop.f32.mrb[2].mxu0 }
 0x677   :  { %v747_v23 = vadd.f32 %v742_v17, %v666_v12  ;;  %v744_v27 = vpop.f32.mrb[3].mxu0 }
 0x678   :  { %v748_v28 = vadd.f32 %v744_v27, %v671_v13 }
 0x679   :  { %2681 = vtanh.f32 %v747_v23  ;;  %v2444_v38 = vmul.f32 -1.442695, %v747_v23 }
 0x67a   :  { %2683 = vtanh.f32 %v748_v28  ;;  %v2445_v40 = vmul.f32 -1.442695, %v748_v28 }
 0x67b   :  { %2685 = vpow2.f32 %v2444_v38 }
 0x67c   :  { %2687 = vpow2.f32 %v2445_v40 }
 0x683   :  { %v2682_v31 = vpop.eup %2681 }
 0x684   :  { %v2684_v32 = vpop.eup %2683  ;;  %762 = vrot.lane.b32.xlu1 %v2682_v31, %s2780_s8 }
 0x685   :  { %786 = vrot.lane.b32.xlu0 %v2684_v32, %s2780_s8  ;;  %v2686_v33 = vpop.eup %2685 }
 0x686   :  { %v2688_v41 = vpop.eup %2687  ;;  %v752_v62 = vadd.f32 1.0, %v2686_v33 }
 0x687   :  { %v780_v39 = vadd.f32 1.0, %v2688_v41 }
 0x688   :  { %757 = vrot.lane.b32.xlu1 %v3079_v36, %s2778_s21  ;;  %2689 = vrcp.f32 %v752_v62 }
 0x689   :  { %2691 = vrcp.f32 %v780_v39 }
 0x692   :  { %v2690_v42 = vpop.eup %2689 }
 0x693   :  { %v2692_v45 = vpop.eup %2691 }
 0x694   :  { %v784_v0 = vmul.f32 %v2692_v45, %v3079_v36 }
 0x6f6   :  { %v763_v43 = vpop.permute.xlu1 %762 }
 0x6f7   :  { %v765_v46 = vmul.f32 %v2690_v42, %v763_v43  ;;  %v787_v47 = vpop.permute.xlu0 %786 }
 0x6f8   :  { %v789_v54 = vmul.f32 %v2692_v45, %v787_v47  ;;  %v952_v47 = vld [vmem:[%s3780_s1 + $0xc] sm:$0x1] }
 0x6f9   :  { %767 = vrot.lane.b32.xlu0 %v765_v46, %s2778_s21  ;;  %v950_v46 = vld [vmem:[%s3779_s0 + $0xb] sm:$0x1] }
 0x6fa   :  { %791 = vrot.lane.b32.xlu1 %v789_v54, %s2778_s21  ;;  %v758_v59 = vpop.permute.xlu1 %757  ;;  %v955_v54 = vrot.slane %v950_v46, 7 }
 0x6fb   :  { %v760_v60 = vmul.f32 %v2690_v42, %v758_v59  ;;  %v960_v59 = vrot.slane %v952_v47, 7 }
 0x6fd   :  { %902 = vperm.xlu0 %2608, %v899_v55  }
 0x6fe   :  { %914 = vperm.xlu1 %2607, %v911_v37  }
 0x701   :  { %2620 = vperm.xlu0 %2608, %v2619_v57   ;;  %v949_v57 = vld [vmem:[%s3779_s0 + $0x3] sm:$0x1] }
 0x76b   :  { %v768_v63 = vpop.permute.xlu0 %767 }
 0x76c   :  { %v770_v1 = vadd.f32 %v768_v63, %v760_v60  ;;  %v792_v2 = vpop.permute.xlu1 %791  ;;  %v951_v60 = vld [vmem:[%s3780_s1 + $0x4] sm:$0x1] }
 0x76d   :  { %v794_v20 = vadd.f32 %v792_v2, %v784_v0  ;;  %v961_v63 = vsel %vm82_vm2, %v960_v59, %v951_v60 }
 0x76e   :  { %2693 = vtanh.f32 %v770_v1 }
 0x76f   :  { %2695 = vtanh.f32 %v794_v20 }
 0x778   :  { %v2694_v5 = vpop.eup %2693 }
 0x779   :  { %v2696_v6 = vpop.eup %2695  ;;  %773 = vrot.lane.b32.xlu1 %v2694_v5, %s2780_s8 }
 0x77a   :  { %797 = vrot.lane.b32.xlu0 %v2696_v6, %s2780_s8 }
 0x77c   :  { %v903_v7 = vpop.permute.xlu0 %902 }
 0x77d   :  { %v905_v11 = vmul.f32 %v903_v7, %v3047_v61  ;;  %v915_v12 = vpop.permute.xlu1 %914  ;;  %v933_v33 = vmul.f32 %v903_v7, %v3079_v36 }
 0x77e   :  { %v917_v13 = vmul.f32 %v915_v12, %v3047_v61 }
 0x77f   :  { %907 = vrot.lane.b32.xlu1 %v905_v11, %s2781_s2  ;;  %v940_v11 = vmul.f32 %v915_v12, %v3079_v36 }
 0x780   :  { %919 = vrot.lane.b32.xlu0 %v917_v13, %s2780_s8  ;;  %v2621_v17 = vpop.permute.xlu0 %2620 }
 0x781   :  { %v2622_v31 = vunpack.i.l.bf16 %v2621_v17  ;;  %v2623_v26 = vunpack.i.h.bf16 %v2621_v17 }
 0x783   :  { %v939_v6 = vmul.f32 %v2623_v26, %v794_v20 }
 0x7eb   :  { %v774_v23 = vpop.permute.xlu1 %773 }
 0x7ec   :  { %v776_v27 = vmul.f32 %v2690_v42, %v774_v23  ;;  %v798_v28 = vpop.permute.xlu0 %797  ;;  %v932_v42 = vmul.f32 %v2622_v31, %v770_v1  ;;  %v941_v23 = vadd.f32 %v940_v11, %v939_v6 }
 0x7ed   :  { %v800_v29 = vmul.f32 %v2692_v45, %v798_v28 }
 0x7ee   :  { %v3108_v32 = vmul.f32 %v2622_v31, %v776_v27 }
 0x7ef   :  { %v3110_v35 = vmul.f32 %v2623_v26, %v800_v29 }
 0x7f1   :  { %v908_v34 = vpop.permute.xlu1 %907 }
 0x7f2   :  { %v910_v38 = vadd.f32 %v908_v34, %v3108_v32  ;;  %v920_v40 = vpop.permute.xlu0 %919 }
 0x7f3   :  { %v922_v61 = vadd.f32 %v920_v40, %v3110_v35 }
 0x7f4   :  { %924 = vrot.lane.b32.xlu1 %v910_v38, %s2778_s21  ;;  %v3158_v38 = vsel %vm1092_vm10, 1.0, %v2777_v3 }
 0x7f5   :  { %928 = vrot.lane.b32.xlu0 %v922_v61, %s2780_s8 }
 0x7f8   :  { %935 = vrot.lane.b32.xlu1 %v933_v33, %s2778_s21 }
 0x866   :  { %v925_v41 = vpop.permute.xlu1 %924 }
 0x867   :  { %v929_v62 = vpop.permute.xlu0 %928 }
 0x868   :  { %v3119_v39 = vsel %vm350_vm5, %v925_v41, %v929_v62  ;;  %v3161_v41 = vsel %vm1096_vm11, 1.0, %v2777_v3 }
 0x869   :  { %2448 = vmatmul.mubr.msk.f32.vlgmr.msra.gmra.mrb[2].mxu1 %vm90_vm1, %v3119_v39  ;;  %v1201_v48 = vsub.f32 1.0, %v3161_v41 }
 0x86a   :  { %v936_v43 = vpop.permute.xlu1 %935  ;;  %2556 = vmatpush1.bf16.msra.mxu1 %v2839_v8  ;;  %1610 = vmatprep.mubr.f32.mxu1 %v2777_v3 }
 0x86b   :  { %v938_v45 = vadd.f32 %v936_v43, %v932_v42  ;;  %2558 = vmatprep.subr.bf16.mxu1 %v2841_v9  ;;  %v1189_v42 = vsub.f32 1.0, %v3158_v38  ;;  %v2624_v43 = vpack.i.bf16 %v3161_v41, %v3158_v38 }
 0x86d   :  { %943 = vrot.lane.b32.xlu0 %v938_v45, %s2781_s2 }
 0x86e   :  { %2560 = vmatpush1.bf16.msra.mxu1 %v2858_v14 }
 0x86f   :  { %2562 = vmatprep.subr.bf16.mxu1 %v2862_v15 }
 0x872   :  { %2564 = vmatpush1.bf16.msra.mxu1 %v2880_v21 }
 0x873   :  { %2566 = vmatprep.subr.bf16.mxu1 %v2885_v22 }
 0x876   :  { %2568 = vmatpush1.bf16.msra.mxu1 %v2896_v25 }
 0x877   :  { %2586 = vmatprep.subr.bf16.mxu1 %v2828_v4  ;;  %v956_v4 = vsel %vm82_vm2, %v955_v54, %v949_v57 }
 0x8df   :  { %v944_v17 = vpop.permute.xlu0 %943 }
 0x8e0   :  { %v3151_v27 = vsel %vm350_vm5, %v944_v17, %v941_v23 }
 0x93c   :  { %v1032_v0 = vpop.f32.mrb[2].mxu1 }
 0x93d   :  { %v1037_v1 = vadd.f32 %v1032_v0, %v956_v4  ;;  %v1034_v2 = vpop.f32.mrb[3].mxu1 }
 0x93e   :  { %v1038_v5 = vadd.f32 %v1034_v2, %v961_v63 }
 0x93f   :  { %2697 = vtanh.f32 %v1037_v1  ;;  %v2449_v28 = vmul.f32 -1.442695, %v1037_v1 }
 0x940   :  { %2699 = vtanh.f32 %v1038_v5  ;;  %v2450_v29 = vmul.f32 -1.442695, %v1038_v5 }
 0x941   :  { %2701 = vpow2.f32 %v2449_v28 }
 0x942   :  { %2703 = vpow2.f32 %v2450_v29 }
 0x949   :  { %v2698_v7 = vpop.eup %2697 }
 0x94a   :  { %v2700_v13 = vpop.eup %2699  ;;  %1052 = vrot.lane.b32.xlu1 %v2698_v7, %s2780_s8 }
 0x94b   :  { %1076 = vrot.lane.b32.xlu0 %v2700_v13, %s2780_s8  ;;  %v2702_v20 = vpop.eup %2701 }
 0x94c   :  { %v2704_v31 = vpop.eup %2703  ;;  %v1042_v36 = vadd.f32 1.0, %v2702_v20 }
 0x94d   :  { %v1070_v12 = vadd.f32 1.0, %v2704_v31 }
 0x94e   :  { %1047 = vrot.lane.b32.xlu1 %v3151_v27, %s2778_s21  ;;  %2705 = vrcp.f32 %v1042_v36 }
 0x94f   :  { %2707 = vrcp.f32 %v1070_v12 }
 0x958   :  { %v2706_v26 = vpop.eup %2705 }
 0x959   :  { %v2708_v40 = vpop.eup %2707 }
 0x95a   :  { %v1074_v54 = vmul.f32 %v2708_v40, %v3151_v27 }
 0x9bc   :  { %v1053_v34 = vpop.permute.xlu1 %1052 }
 0x9bd   :  { %v1055_v61 = vmul.f32 %v2706_v26, %v1053_v34  ;;  %v1077_v33 = vpop.permute.xlu0 %1076 }
 0x9be   :  { %v1079_v62 = vmul.f32 %v2708_v40, %v1077_v33 }
 0x9bf   :  { %1057 = vrot.lane.b32.xlu0 %v1055_v61, %s2778_s21 }
 0x9c0   :  { %1081 = vrot.lane.b32.xlu1 %v1079_v62, %s2778_s21  ;;  %v1048_v45 = vpop.permute.xlu1 %1047 }
 0x9c1   :  { %v1050_v46 = vmul.f32 %v2706_v26, %v1048_v45  ;;  %v1240_v45 = vld [vmem:[%s3779_s0 + $0xc] sm:$0x1] }
 0x9c3   :  { %1192 = vperm.xlu0 %2608, %v1189_v42  }
 0x9c4   :  { %1204 = vperm.xlu1 %2607, %v1201_v48  }
 0x9c7   :  { %2625 = vperm.xlu0 %2608, %v2624_v43  }
 0xa31   :  { %v1058_v47 = vpop.permute.xlu0 %1057 }
 0xa32   :  { %v1060_v57 = vadd.f32 %v1058_v47, %v1050_v46  ;;  %v1082_v59 = vpop.permute.xlu1 %1081  ;;  %v1242_v46 = vld [vmem:[%s3780_s1 + $0xb] sm:$0x1]  ;;  %v1245_v47 = vrot.slane %v1240_v45, 7  ;;  %v2629_v45 = vpack.i.bf16 %v3158_v38, %v3161_v41 }
 0xa33   :  { %v1084_v60 = vadd.f32 %v1082_v59, %v1074_v54  ;;  %v1239_v54 = vld [vmem:[%s3779_s0 + $0x4] sm:$0x1]  ;;  %v1241_v59 = vld [vmem:[%s3780_s1 + $0x3] sm:$0x1] }
 0xa34   :  { %2709 = vtanh.f32 %v1060_v57 }
 0xa35   :  { %2711 = vtanh.f32 %v1084_v60 }
 0xa3e   :  { %v2710_v4 = vpop.eup %2709 }
 0xa3f   :  { %v2712_v63 = vpop.eup %2711  ;;  %1063 = vrot.lane.b32.xlu1 %v2710_v4, %s2780_s8  ;;  %v1246_v4 = vsel %vm82_vm2, %v1245_v47, %v1239_v54 }
 0xa40   :  { %1087 = vrot.lane.b32.xlu0 %v2712_v63, %s2780_s8 }
 0xa42   :  { %v1193_v0 = vpop.permute.xlu0 %1192 }
 0xa43   :  { %v1195_v1 = vmul.f32 %v1193_v0, %v3119_v39  ;;  %v1205_v2 = vpop.permute.xlu1 %1204 }
 0xa44   :  { %v1207_v5 = vmul.f32 %v1205_v2, %v3119_v39 }
 0xa45   :  { %1197 = vrot.lane.b32.xlu1 %v1195_v1, %s2781_s2 }
 0xa46   :  { %1209 = vrot.lane.b32.xlu0 %v1207_v5, %s2780_s8  ;;  %v2626_v6 = vpop.permute.xlu0 %2625 }
 0xa47   :  { %v2627_v23 = vunpack.i.l.bf16 %v2626_v6  ;;  %v2628_v28 = vunpack.i.h.bf16 %v2626_v6 }
 0xa49   :  { %v1222_v33 = vmul.f32 %v2627_v23, %v1060_v57  ;;  %v1250_v57 = vrot.slane %v1242_v46, 7 }
 0xa4b   :  { %v1251_v63 = vsel %vm82_vm2, %v1250_v57, %v1241_v59 }
 0xab1   :  { %v1064_v7 = vpop.permute.xlu1 %1063 }
 0xab2   :  { %v1066_v11 = vmul.f32 %v2706_v26, %v1064_v7  ;;  %v1088_v13 = vpop.permute.xlu0 %1087  ;;  %v1223_v26 = vmul.f32 %v1193_v0, %v3151_v27  ;;  %v1229_v7 = vmul.f32 %v2628_v28, %v1084_v60 }
 0xab3   :  { %v1090_v17 = vmul.f32 %v2708_v40, %v1088_v13  ;;  %v1230_v13 = vmul.f32 %v1205_v2, %v3151_v27 }
 0xab4   :  { %v3180_v29 = vmul.f32 %v2627_v23, %v1066_v11 }
 0xab5   :  { %v3182_v31 = vmul.f32 %v2628_v28, %v1090_v17 }
 0xab7   :  { %v1198_v20 = vpop.permute.xlu1 %1197 }
 0xab8   :  { %v1200_v36 = vadd.f32 %v1198_v20, %v3180_v29  ;;  %v1210_v12 = vpop.permute.xlu0 %1209  ;;  %v1231_v20 = vadd.f32 %v1230_v13, %v1229_v7 }
 0xab9   :  { %v1212_v39 = vadd.f32 %v1210_v12, %v3182_v31 }
 0xaba   :  { %1214 = vrot.lane.b32.xlu1 %v1200_v36, %s2778_s21 }
 0xabb   :  { %1218 = vrot.lane.b32.xlu0 %v1212_v39, %s2780_s8 }
 0xabe   :  { %1225 = vrot.lane.b32.xlu1 %v1223_v26, %s2778_s21 }
 0xb2c   :  { %v1215_v34 = vpop.permute.xlu1 %1214 }
 0xb2d   :  { %v1219_v40 = vpop.permute.xlu0 %1218 }
 0xb2e   :  { %v3191_v61 = vsel %vm350_vm5, %v1215_v34, %v1219_v40 }
 0xb2f   :  { %2453 = vmatmul.mubr.msk.f32.vlgmr.msra.gmra.mrb[4].mxu0 %vm90_vm1, %v3191_v61 }
 0xb30   :  { %v1226_v62 = vpop.permute.xlu1 %1225  ;;  %2572 = vmatpush1.bf16.msra.mxu0 %v2839_v8  ;;  %1900 = vmatprep.mubr.f32.mxu0 %v2777_v3 }
 0xb31   :  { %v1228_v43 = vadd.f32 %v1226_v62, %v1222_v33  ;;  %2574 = vmatprep.subr.bf16.mxu0 %v2841_v9 }
 0xb33   :  { %1233 = vrot.lane.b32.xlu0 %v1228_v43, %s2781_s2 }
 0xb34   :  { %2576 = vmatpush1.bf16.msra.mxu0 %v2858_v14 }
 0xb35   :  { %2578 = vmatprep.subr.bf16.mxu0 %v2862_v15 }
 0xb38   :  { %2580 = vmatpush1.bf16.msra.mxu0 %v2880_v21 }
 0xb39   :  { %2582 = vmatprep.subr.bf16.mxu0 %v2885_v22 }
 0xb3c   :  { %2584 = vmatpush1.bf16.msra.mxu0 %v2896_v25 }
 0xba5   :  { %v1234_v23 = vpop.permute.xlu0 %1233 }
 0xba6   :  { %v3222_v36 = vsel %vm350_vm5, %v1234_v23, %v1231_v20 }
 0xc02   :  { %v1322_v0 = vpop.f32.mrb[4].mxu0 }
 0xc03   :  { %v1327_v1 = vadd.f32 %v1322_v0, %v1246_v4  ;;  %v1324_v5 = vpop.f32.mrb[5].mxu0 }
 0xc04   :  { %v1328_v6 = vadd.f32 %v1324_v5, %v1251_v63 }
 0xc05   :  { %2713 = vtanh.f32 %v1327_v1  ;;  %v2454_v12 = vmul.f32 -1.442695, %v1327_v1 }
 0xc06   :  { %2715 = vtanh.f32 %v1328_v6  ;;  %v2455_v39 = vmul.f32 -1.442695, %v1328_v6 }
 0xc07   :  { %2717 = vpow2.f32 %v2454_v12 }
 0xc08   :  { %2719 = vpow2.f32 %v2455_v39 }
 0xc0f   :  { %v2714_v11 = vpop.eup %2713 }
 0xc10   :  { %v2716_v17 = vpop.eup %2715  ;;  %1342 = vrot.lane.b32.xlu1 %v2714_v11, %s2780_s8 }
 0xc11   :  { %1366 = vrot.lane.b32.xlu0 %v2716_v17, %s2780_s8  ;;  %v2718_v60 = vpop.eup %2717 }
 0xc12   :  { %v2720_v28 = vpop.eup %2719  ;;  %v1332_v27 = vadd.f32 1.0, %v2718_v60 }
 0xc13   :  { %v1360_v2 = vadd.f32 1.0, %v2720_v28 }
 0xc14   :  { %1337 = vrot.lane.b32.xlu1 %v3222_v36, %s2778_s21  ;;  %2721 = vrcp.f32 %v1332_v27 }
 0xc15   :  { %2723 = vrcp.f32 %v1360_v2 }
 0xc1e   :  { %v2722_v26 = vpop.eup %2721 }
 0xc1f   :  { %v2724_v40 = vpop.eup %2723 }
 0xc20   :  { %v1364_v57 = vmul.f32 %v2724_v40, %v3222_v36 }
 0xc82   :  { %v1343_v34 = vpop.permute.xlu1 %1342 }
 0xc83   :  { %v1345_v33 = vmul.f32 %v2722_v26, %v1343_v34  ;;  %v1367_v62 = vpop.permute.xlu0 %1366 }
 0xc84   :  { %v1369_v43 = vmul.f32 %v2724_v40, %v1367_v62 }
 0xc85   :  { %1347 = vrot.lane.b32.xlu0 %v1345_v33, %s2778_s21 }
 0xc86   :  { %1371 = vrot.lane.b32.xlu1 %v1369_v43, %s2778_s21  ;;  %v1338_v46 = vpop.permute.xlu1 %1337 }
 0xc87   :  { %v1340_v47 = vmul.f32 %v2722_v26, %v1338_v46 }
 0xc89   :  { %1482 = vperm.xlu0 %2608, %v1201_v48  }
 0xc8a   :  { %1494 = vperm.xlu1 %2607, %v1189_v42  }
 0xc8d   :  { %2630 = vperm.xlu0 %2608, %v2629_v45  }
 0xcf7   :  { %v1348_v54 = vpop.permute.xlu0 %1347 }
 0xcf8   :  { %v1350_v59 = vadd.f32 %v1348_v54, %v1340_v47  ;;  %v1372_v4 = vpop.permute.xlu1 %1371 }
 0xcf9   :  { %v1374_v63 = vadd.f32 %v1372_v4, %v1364_v57 }
 0xcfa   :  { %2725 = vtanh.f32 %v1350_v59 }
 0xcfb   :  { %2727 = vtanh.f32 %v1374_v63 }
 0xd04   :  { %v2726_v0 = vpop.eup %2725 }
 0xd05   :  { %v2728_v1 = vpop.eup %2727  ;;  %1353 = vrot.lane.b32.xlu1 %v2726_v0, %s2780_s8 }
 0xd06   :  { %1377 = vrot.lane.b32.xlu0 %v2728_v1, %s2780_s8 }
 0xd08   :  { %v1483_v41 = vpop.permute.xlu0 %1482 }
 0xd09   :  { %v1485_v38 = vmul.f32 %v1483_v41, %v3191_v61  ;;  %v1495_v42 = vpop.permute.xlu1 %1494  ;;  %v1513_v27 = vmul.f32 %v1483_v41, %v3222_v36 }
 0xd0a   :  { %v1497_v48 = vmul.f32 %v1495_v42, %v3191_v61 }
 0xd0b   :  { %1487 = vrot.lane.b32.xlu1 %v1485_v38, %s2781_s2 }
 0xd0c   :  { %1499 = vrot.lane.b32.xlu0 %v1497_v48, %s2780_s8  ;;  %v2631_v5 = vpop.permute.xlu0 %2630 }
 0xd0d   :  { %v2632_v17 = vunpack.i.l.bf16 %v2631_v5  ;;  %v2633_v23 = vunpack.i.h.bf16 %v2631_v5 }
 0xd0f   :  { %v1519_v54 = vmul.f32 %v2633_v23, %v1374_v63 }
 0xd77   :  { %v1354_v6 = vpop.permute.xlu1 %1353 }
 0xd78   :  { %v1356_v7 = vmul.f32 %v2722_v26, %v1354_v6  ;;  %v1378_v11 = vpop.permute.xlu0 %1377 }
 0xd79   :  { %v1380_v13 = vmul.f32 %v2724_v40, %v1378_v11  ;;  %v1512_v40 = vmul.f32 %v2632_v17, %v1350_v59  ;;  %v1520_v59 = vmul.f32 %v1495_v42, %v3222_v36 }
 0xd7a   :  { %v3241_v20 = vmul.f32 %v2632_v17, %v1356_v7 }
 0xd7b   :  { %v3243_v39 = vmul.f32 %v2633_v23, %v1380_v13  ;;  %v1521_v1 = vadd.f32 %v1520_v59, %v1519_v54 }
 0xd7d   :  { %v1488_v12 = vpop.permute.xlu1 %1487 }
 0xd7e   :  { %v1490_v60 = vadd.f32 %v1488_v12, %v3241_v20  ;;  %v1500_v28 = vpop.permute.xlu0 %1499  ;;  %v2634_v12 = vpack.i.bf16 %v3086_v44, %v3089_v50 }
 0xd7f   :  { %v1502_v61 = vadd.f32 %v1500_v28, %v3243_v39 }
 0xd80   :  { %1504 = vrot.lane.b32.xlu1 %v1490_v60, %s2778_s21 }
 0xd81   :  { %1508 = vrot.lane.b32.xlu0 %v1502_v61, %s2780_s8 }
 0xd84   :  { %1515 = vrot.lane.b32.xlu1 %v1513_v27, %s2778_s21 }
 0xdf2   :  { %v1505_v2 = vpop.permute.xlu1 %1504 }
 0xdf3   :  { %v1509_v26 = vpop.permute.xlu0 %1508 }
 0xdf4   :  { %v3252_v34 = vsel %vm350_vm5, %v1505_v2, %v1509_v26 }
 0xdf5   :  { %2458 = vmatmul.mubr.msk.f32.vlgmr.msra.gmra.mrb[4].mxu1 %vm90_vm1, %v3252_v34 }
 0xdf6   :  { %v1516_v33 = vpop.permute.xlu1 %1515  ;;  %2588 = vmatpush1.bf16.msra.mxu1 %v2839_v8  ;;  %2190 = vmatprep.mubr.f32.mxu1 %v2777_v3  ;;  %v1530_v8 = vld [vmem:[%s3779_s0 + $0xd] sm:$0x1]  ;;  %v1532_v3 = vld [vmem:[%s3780_s1 + $0xa] sm:$0x1] }
 0xdf7   :  { %v1518_v62 = vadd.f32 %v1516_v33, %v1512_v40  ;;  %2590 = vmatprep.subr.bf16.mxu1 %v2841_v9  ;;  %v1535_v9 = vrot.slane %v1530_v8, 7 }
 0xdf9   :  { %1523 = vrot.lane.b32.xlu0 %v1518_v62, %s2781_s2 }
 0xdfa   :  { %2592 = vmatpush1.bf16.msra.mxu1 %v2858_v14  ;;  %v1529_v14 = vld [vmem:[%s3779_s0 + $0x5] sm:$0x1] }
 0xdfb   :  { %2594 = vmatprep.subr.bf16.mxu1 %v2862_v15  ;;  %v1540_v15 = vrot.slane %v1532_v3, 7 }
 0xdfe   :  { %2596 = vmatpush1.bf16.msra.mxu1 %v2880_v21  ;;  %v1531_v21 = vld [vmem:[%s3780_s1 + $0x2] sm:$0x1] }
 0xdff   :  { %2598 = vmatprep.subr.bf16.mxu1 %v2885_v22  ;;  %v1536_v22 = vsel %vm82_vm2, %v1535_v9, %v1529_v14 }
 0xe02   :  { %2600 = vmatpush1.bf16.msra.mxu1 %v2896_v25  ;;  %v1541_v25 = vsel %vm82_vm2, %v1540_v15, %v1531_v21 }
 0xe6b   :  { %v1524_v0 = vpop.permute.xlu0 %1523 }
 0xe6c   :  { %v3283_v41 = vsel %vm350_vm5, %v1524_v0, %v1521_v1 }
 0xec8   :  { %v1612_v43 = vpop.f32.mrb[4].mxu1 }
 0xec9   :  { %v1617_v45 = vadd.f32 %v1612_v43, %v1536_v22  ;;  %v1614_v46 = vpop.f32.mrb[5].mxu1 }
 0xeca   :  { %v1618_v47 = vadd.f32 %v1614_v46, %v1541_v25 }
 0xecb   :  { %2729 = vtanh.f32 %v1617_v45  ;;  %v2459_v38 = vmul.f32 -1.442695, %v1617_v45 }
 0xecc   :  { %2731 = vtanh.f32 %v1618_v47  ;;  %v2460_v48 = vmul.f32 -1.442695, %v1618_v47 }
 0xecd   :  { %2733 = vpow2.f32 %v2459_v38 }
 0xece   :  { %2735 = vpow2.f32 %v2460_v48  ;;  %v1820_v48 = vld [vmem:[%s3779_s0 + $0xe] sm:$0x1] }
 0xed5   :  { %v2730_v57 = vpop.eup %2729 }
 0xed6   :  { %v2732_v4 = vpop.eup %2731  ;;  %1632 = vrot.lane.b32.xlu1 %v2730_v57, %s2780_s8 }
 0xed7   :  { %1656 = vrot.lane.b32.xlu0 %v2732_v4, %s2780_s8  ;;  %v2734_v63 = vpop.eup %2733 }
 0xed8   :  { %v2736_v5 = vpop.eup %2735  ;;  %v1622_v36 = vadd.f32 1.0, %v2734_v63  ;;  %v1822_v63 = vld [vmem:[%s3780_s1 + $0x9] sm:$0x1] }
 0xed9   :  { %v1650_v42 = vadd.f32 1.0, %v2736_v5  ;;  %v1825_v5 = vrot.slane %v1820_v48, 7 }
 0xeda   :  { %1627 = vrot.lane.b32.xlu1 %v3283_v41, %s2778_s21  ;;  %2737 = vrcp.f32 %v1622_v36  ;;  %v1819_v36 = vld [vmem:[%s3779_s0 + $0x6] sm:$0x1] }
 0xedb   :  { %2739 = vrcp.f32 %v1650_v42  ;;  %v1830_v42 = vrot.slane %v1822_v63, 7 }
 0xee4   :  { %v2738_v6 = vpop.eup %2737 }
 0xee5   :  { %v2740_v11 = vpop.eup %2739 }
 0xee6   :  { %v1654_v27 = vmul.f32 %v2740_v11, %v3283_v41 }
 0xf48   :  { %v1633_v7 = vpop.permute.xlu1 %1632 }
 0xf49   :  { %v1635_v13 = vmul.f32 %v2738_v6, %v1633_v7  ;;  %v1657_v17 = vpop.permute.xlu0 %1656  ;;  %v1826_v7 = vsel %vm82_vm2, %v1825_v5, %v1819_v36 }
 0xf4a   :  { %v1659_v23 = vmul.f32 %v2740_v11, %v1657_v17 }
 0xf4b   :  { %1637 = vrot.lane.b32.xlu0 %v1635_v13, %s2778_s21 }
 0xf4c   :  { %1661 = vrot.lane.b32.xlu1 %v1659_v23, %s2778_s21  ;;  %v1628_v60 = vpop.permute.xlu1 %1627 }
 0xf4d   :  { %v1630_v28 = vmul.f32 %v2738_v6, %v1628_v60 }
 0xf4f   :  { %1772 = vperm.xlu0 %2608, %v911_v37  }
 0xf50   :  { %1784 = vperm.xlu1 %2607, %v899_v55  }
 0xf53   :  { %2635 = vperm.xlu0 %2608, %v2634_v12  }
 0xfbd   :  { %v1638_v61 = vpop.permute.xlu0 %1637 }
 0xfbe   :  { %v1640_v2 = vadd.f32 %v1638_v61, %v1630_v28  ;;  %v1662_v26 = vpop.permute.xlu1 %1661 }
 0xfbf   :  { %v1664_v40 = vadd.f32 %v1662_v26, %v1654_v27 }
 0xfc0   :  { %2741 = vtanh.f32 %v1640_v2 }
 0xfc1   :  { %2743 = vtanh.f32 %v1664_v40 }
 0xfca   :  { %v2742_v33 = vpop.eup %2741 }
 0xfcb   :  { %v2744_v62 = vpop.eup %2743  ;;  %1643 = vrot.lane.b32.xlu1 %v2742_v33, %s2780_s8 }
 0xfcc   :  { %1667 = vrot.lane.b32.xlu0 %v2744_v62, %s2780_s8 }
 0xfce   :  { %v1773_v50 = vpop.permute.xlu0 %1772 }
 0xfcf   :  { %v1775_v44 = vmul.f32 %v1773_v50, %v3252_v34  ;;  %v1785_v55 = vpop.permute.xlu1 %1784  ;;  %v1803_v54 = vmul.f32 %v1773_v50, %v3283_v41 }
 0xfd0   :  { %v1787_v37 = vmul.f32 %v1785_v55, %v3252_v34  ;;  %v1810_v61 = vmul.f32 %v1785_v55, %v3283_v41 }
 0xfd1   :  { %1777 = vrot.lane.b32.xlu1 %v1775_v44, %s2781_s2 }
 0xfd2   :  { %1789 = vrot.lane.b32.xlu0 %v1787_v37, %s2780_s8  ;;  %v2636_v8 = vpop.permute.xlu0 %2635 }
 0xfd3   :  { %v2637_v21 = vunpack.i.l.bf16 %v2636_v8  ;;  %v2638_v22 = vunpack.i.h.bf16 %v2636_v8 }
 0xfd5   :  { %v1802_v0 = vmul.f32 %v2637_v21, %v1640_v2  ;;  %v1809_v60 = vmul.f32 %v2638_v22, %v1664_v40 }
 0xfd7   :  { %v1811_v26 = vadd.f32 %v1810_v61, %v1809_v60 }
0x103d   :  { %v1644_v3 = vpop.permute.xlu1 %1643 }
0x103e   :  { %v1646_v9 = vmul.f32 %v2738_v6, %v1644_v3  ;;  %v1668_v14 = vpop.permute.xlu0 %1667  ;;  %v1821_v6 = vld [vmem:[%s3780_s1 + $0x1] sm:$0x1] }
0x103f   :  { %v1670_v15 = vmul.f32 %v2740_v11, %v1668_v14  ;;  %v1831_v11 = vsel %vm82_vm2, %v1830_v42, %v1821_v6 }
0x1040   :  { %v3302_v25 = vmul.f32 %v2637_v21, %v1646_v9  ;;  %v2639_v21 = vpack.i.bf16 %v3014_v10, %v3017_v16 }
0x1041   :  { %v3304_v45 = vmul.f32 %v2638_v22, %v1670_v15 }
0x1043   :  { %v1778_v43 = vpop.permute.xlu1 %1777 }
0x1044   :  { %v1780_v46 = vadd.f32 %v1778_v43, %v3302_v25  ;;  %v1790_v47 = vpop.permute.xlu0 %1789 }
0x1045   :  { %v1792_v34 = vadd.f32 %v1790_v47, %v3304_v45 }
0x1046   :  { %1794 = vrot.lane.b32.xlu1 %v1780_v46, %s2778_s21 }
0x1047   :  { %1798 = vrot.lane.b32.xlu0 %v1792_v34, %s2780_s8 }
0x104a   :  { %1805 = vrot.lane.b32.xlu1 %v1803_v54, %s2778_s21 }
0x10b8   :  { %v1795_v57 = vpop.permute.xlu1 %1794 }
0x10b9   :  { %v1799_v59 = vpop.permute.xlu0 %1798 }
0x10ba   :  { %v3313_v4 = vsel %vm350_vm5, %v1795_v57, %v1799_v59 }
0x10bb   :  { %2463 = vmatmul.mubr.msk.f32.vlgmr.msra.gmra.mrb[6].mxu0 %vm90_vm1, %v3313_v4 }
0x10bc   :  { %v1806_v1 = vpop.permute.xlu1 %1805 }
0x10bd   :  { %v1808_v38 = vadd.f32 %v1806_v1, %v1802_v0 }
0x10bf   :  { %1813 = vrot.lane.b32.xlu0 %v1808_v38, %s2781_s2 }
0x1131   :  { %v1814_v2 = vpop.permute.xlu0 %1813 }
0x1132   :  { %v3336_v33 = vsel %vm350_vm5, %v1814_v2, %v1811_v26  ;;  %v2110_v26 = vld [vmem:[%s3779_s0 + $0xf] sm:$0x1] }
0x118e   :  { %v1902_v13 = vpop.f32.mrb[6].mxu0 }
0x118f   :  { %v1907_v17 = vadd.f32 %v1902_v13, %v1826_v7  ;;  %v1904_v23 = vpop.f32.mrb[7].mxu0 }
0x1190   :  { %v1908_v12 = vadd.f32 %v1904_v23, %v1831_v11 }
0x1191   :  { %2745 = vtanh.f32 %v1907_v17  ;;  %v2464_v62 = vmul.f32 -1.442695, %v1907_v17 }
0x1192   :  { %2747 = vtanh.f32 %v1908_v12  ;;  %v2465_v50 = vmul.f32 -1.442695, %v1908_v12 }
0x1193   :  { %2749 = vpow2.f32 %v2464_v62  ;;  %v2112_v62 = vld [vmem:[%s3780_s1 + $0x8] sm:$0x1] }
0x1194   :  { %2751 = vpow2.f32 %v2465_v50  ;;  %v2115_v50 = vrot.slane %v2110_v26, 7 }
0x119b   :  { %v2746_v28 = vpop.eup %2745 }
0x119c   :  { %v2748_v27 = vpop.eup %2747  ;;  %1922 = vrot.lane.b32.xlu1 %v2746_v28, %s2780_s8 }
0x119d   :  { %1946 = vrot.lane.b32.xlu0 %v2748_v27, %s2780_s8  ;;  %v2750_v40 = vpop.eup %2749 }
0x119e   :  { %v2752_v44 = vpop.eup %2751  ;;  %v1912_v41 = vadd.f32 1.0, %v2750_v40  ;;  %v2109_v40 = vld [vmem:[%s3779_s0 + $0x7] sm:$0x1] }
0x119f   :  { %v1940_v55 = vadd.f32 1.0, %v2752_v44  ;;  %v2120_v44 = vrot.slane %v2112_v62, 7 }
0x11a0   :  { %1917 = vrot.lane.b32.xlu1 %v3336_v33, %s2778_s21  ;;  %2753 = vrcp.f32 %v1912_v41  ;;  %v2111_v41 = vld [vmem:[%s3780_s1] sm:$0x1] }
0x11a1   :  { %2755 = vrcp.f32 %v1940_v55  ;;  %v2116_v55 = vsel %vm82_vm2, %v2115_v50, %v2109_v40 }
0x11aa   :  { %v2754_v37 = vpop.eup %2753 }
0x11ab   :  { %v2756_v3 = vpop.eup %2755 }
0x11ac   :  { %v1944_v47 = vmul.f32 %v2756_v3, %v3336_v33 }
0x120e   :  { %v1923_v8 = vpop.permute.xlu1 %1922 }
0x120f   :  { %v1925_v9 = vmul.f32 %v2754_v37, %v1923_v8  ;;  %v1947_v14 = vpop.permute.xlu0 %1946 }
0x1210   :  { %v1949_v15 = vmul.f32 %v2756_v3, %v1947_v14 }
0x1211   :  { %1927 = vrot.lane.b32.xlu0 %v1925_v9, %s2778_s21 }
0x1212   :  { %1951 = vrot.lane.b32.xlu1 %v1949_v15, %s2778_s21  ;;  %v1918_v22 = vpop.permute.xlu1 %1917 }
0x1213   :  { %v1920_v43 = vmul.f32 %v2754_v37, %v1918_v22 }
0x1215   :  { %2062 = vperm.xlu0 %2608, %v621_v19  }
0x1216   :  { %2074 = vperm.xlu1 %2607, %v609_v18  }
0x1219   :  { %2640 = vperm.xlu0 %2608, %v2639_v21  }
0x1283   :  { %v1928_v46 = vpop.permute.xlu0 %1927 }
0x1284   :  { %v1930_v34 = vadd.f32 %v1928_v46, %v1920_v43  ;;  %v1952_v54 = vpop.permute.xlu1 %1951 }
0x1285   :  { %v1954_v57 = vadd.f32 %v1952_v54, %v1944_v47 }
0x1286   :  { %2757 = vtanh.f32 %v1930_v34 }
0x1287   :  { %2759 = vtanh.f32 %v1954_v57 }
0x1290   :  { %v2758_v59 = vpop.eup %2757 }
0x1291   :  { %v2760_v0 = vpop.eup %2759  ;;  %1933 = vrot.lane.b32.xlu1 %v2758_v59, %s2780_s8 }
0x1292   :  { %1957 = vrot.lane.b32.xlu0 %v2760_v0, %s2780_s8 }
0x1294   :  { %v2063_v16 = vpop.permute.xlu0 %2062 }
0x1295   :  { %v2065_v10 = vmul.f32 %v2063_v16, %v3313_v4  ;;  %v2075_v18 = vpop.permute.xlu1 %2074  ;;  %v2093_v23 = vmul.f32 %v2063_v16, %v3336_v33 }
0x1296   :  { %v2077_v19 = vmul.f32 %v2075_v18, %v3313_v4  ;;  %v2100_v22 = vmul.f32 %v2075_v18, %v3336_v33 }
0x1297   :  { %2067 = vrot.lane.b32.xlu1 %v2065_v10, %s2781_s2 }
0x1298   :  { %2079 = vrot.lane.b32.xlu0 %v2077_v19, %s2780_s8  ;;  %v2641_v1 = vpop.permute.xlu0 %2640 }
0x1299   :  { %v2642_v36 = vunpack.i.l.bf16 %v2641_v1  ;;  %v2643_v42 = vunpack.i.h.bf16 %v2641_v1 }
0x129b   :  { %v2092_v61 = vmul.f32 %v2642_v36, %v1930_v34  ;;  %v2099_v15 = vmul.f32 %v2643_v42, %v1954_v57 }
0x129d   :  { %v2101_v47 = vadd.f32 %v2100_v22, %v2099_v15 }
0x1303   :  { %v1934_v38 = vpop.permute.xlu1 %1933 }
0x1304   :  { %v1936_v48 = vmul.f32 %v2754_v37, %v1934_v38  ;;  %v1958_v63 = vpop.permute.xlu0 %1957  ;;  %v2121_v37 = vsel %vm82_vm2, %v2120_v44, %v2111_v41 }
0x1305   :  { %v1960_v5 = vmul.f32 %v2756_v3, %v1958_v63  ;;  %v2644_v63 = vpack.i.bf16 %v2941_v51, %v2947_v56 }
0x1306   :  { %v3355_v6 = vmul.f32 %v2642_v36, %v1936_v48  ;;  %v2782_v36 = vmov 1966171168  }
0x1307   :  { %v3357_v11 = vmul.f32 %v2643_v42, %v1960_v5  ;;  %v235_v42 = vunpack.c.l.s4 %v2782_v36 }
0x1309   :  { %v2068_v7 = vpop.permute.xlu1 %2067 }
0x130a   :  { %v2070_v13 = vadd.f32 %v2068_v7, %v3355_v6  ;;  %v2080_v17 = vpop.permute.xlu0 %2079  ;;  %v237_v7 = vlaneseq }
0x130b   :  { %v2082_v4 = vadd.f32 %v2080_v17, %v3357_v11 }
0x130c   :  { %2084 = vrot.lane.b32.xlu1 %v2070_v13, %s2778_s21 }
0x130d   :  { %2088 = vrot.lane.b32.xlu0 %v2082_v4, %s2780_s8 }
0x1310   :  { %2095 = vrot.lane.b32.xlu1 %v2093_v23, %s2778_s21 }
0x137e   :  { %v2085_v12 = vpop.permute.xlu1 %2084 }
0x137f   :  { %v2089_v60 = vpop.permute.xlu0 %2088 }
0x1380   :  { %v3366_v28 = vsel %vm350_vm5, %v2085_v12, %v2089_v60  ;;  %v238_v60 = vshrl.u32 %v237_v7, 7 }
0x1381   :  { %2468 = vmatmul.mubr.msk.f32.vlgmr.msra.gmra.mrb[6].mxu1 %vm90_vm1, %v3366_v28 }
0x1382   :  { %v2096_v27 = vpop.permute.xlu1 %2095  ;;  %v3430_v41 = vsub.s32 0, %v238_v60 }
0x1383   :  { %v2098_v2 = vadd.f32 %v2096_v27, %v2092_v61 }
0x1385   :  { %2103 = vrot.lane.b32.xlu0 %v2098_v2, %s2781_s2 }
0x13f7   :  { %v2104_v46 = vpop.permute.xlu0 %2103 }
0x13f8   :  { %v3389_v34 = vsel %vm350_vm5, %v2104_v46, %v2101_v47 }
0x1454   :  { %v2192_v8 = vpop.f32.mrb[6].mxu1 }
0x1455   :  { %v2197_v3 = vadd.f32 %v2192_v8, %v2116_v55  ;;  %v2194_v9 = vpop.f32.mrb[7].mxu1 }
0x1456   :  { %v2198_v14 = vadd.f32 %v2194_v9, %v2121_v37 }
0x1457   :  { %2761 = vtanh.f32 %v2197_v3  ;;  %v2469_v54 = vmul.f32 -1.442695, %v2197_v3 }
0x1458   :  { %2763 = vtanh.f32 %v2198_v14  ;;  %v2470_v59 = vmul.f32 -1.442695, %v2198_v14 }
0x1459   :  { %2765 = vpow2.f32 %v2469_v54 }
0x145a   :  { %2767 = vpow2.f32 %v2470_v59 }
0x1461   :  { %v2762_v21 = vpop.eup %2761 }
0x1462   :  { %v2764_v43 = vpop.eup %2763  ;;  %2212 = vrot.lane.b32.xlu1 %v2762_v21, %s2780_s8 }
0x1463   :  { %2236 = vrot.lane.b32.xlu0 %v2764_v43, %s2780_s8  ;;  %v2766_v57 = vpop.eup %2765 }
0x1464   :  { %v2768_v0 = vpop.eup %2767  ;;  %v2202_v33 = vadd.f32 1.0, %v2766_v57 }
0x1465   :  { %v2230_v16 = vadd.f32 1.0, %v2768_v0 }
0x1466   :  { %2207 = vrot.lane.b32.xlu1 %v3389_v34, %s2778_s21  ;;  %2769 = vrcp.f32 %v2202_v33 }
0x1467   :  { %2771 = vrcp.f32 %v2230_v16 }
0x1470   :  { %v3393_v10 = vpop.eup %2769 }
0x1471   :  { %v3395_v19 = vpop.eup %2771 }
0x1472   :  { %v2234_v23 = vmul.f32 %v3395_v19, %v3389_v34 }
0x14d4   :  { %v2213_v18 = vpop.permute.xlu1 %2212 }
0x14d5   :  { %v2215_v1 = vmul.f32 %v3393_v10, %v2213_v18  ;;  %v2237_v38 = vpop.permute.xlu0 %2236 }
0x14d6   :  { %v2239_v48 = vmul.f32 %v3395_v19, %v2237_v38 }
0x14d7   :  { %2217 = vrot.lane.b32.xlu0 %v2215_v1, %s2778_s21 }
0x14d8   :  { %2241 = vrot.lane.b32.xlu1 %v2239_v48, %s2778_s21  ;;  %v2208_v5 = vpop.permute.xlu1 %2207 }
0x14d9   :  { %v2210_v17 = vmul.f32 %v3393_v10, %v2208_v5 }
0x14db   :  { %2352 = vperm.xlu0 %2608, %v330_v58   ;;  %v236_v58 = vunpack.c.0.s8 %v235_v42 }
0x14dc   :  { %2364 = vperm.xlu1 %2607, %v318_v53  }
0x14dd   :  { %v3415_v51 = vsub.s32 %v236_v58, %v238_v60 }
0x14df   :  { %2645 = vperm.xlu0 %2608, %v2644_v63   ;;  %v240_v61 = vrot.slane %v2964_v24, %v3415_v51  ;;  %v286_v50 = vrot.slane %v2968_v30, %v3415_v51  ;;  %v3450_v22 = vrot.slane %v3038_v52, %v3415_v51  ;;  %v3461_v59 = vrot.slane %v3108_v32, %v3415_v51 }
0x14e0   :  { %v3469_v0 = vrot.slane %v3110_v35, %v3415_v51  ;;  %v3477_v32 = vrot.slane %v3180_v29, %v3415_v51  ;;  %v3485_v35 = vrot.slane %v3182_v31, %v3415_v51  ;;  %v3493_v29 = vrot.slane %v3241_v20, %v3415_v51 }
0x14e1   :  { %v241_v62 = vcombine.high %v240_v61, %v240_v61  ;;  %v248_v44 = vrot.slane %v240_v61, %v3415_v51  ;;  %v287_v55 = vcombine.high %v286_v50, %v286_v50  ;;  %v294_v30 = vrot.slane %v286_v50, %v3415_v51 }
0x14e2   :  { %v585_v54 = vrot.slane %v3450_v22, %v3415_v51  ;;  %v830_v57 = vrot.slane %v3461_v59, %v3415_v51  ;;  %v875_v16 = vrot.slane %v3469_v0, %v3415_v51  ;;  %v1120_v1 = vrot.slane %v3477_v32, %v3415_v51 }
0x14e3   :  { %v255_v8 = vrot.slane %v241_v62, %v3415_v51  ;;  %v259_v3 = vrot.slane %v248_v44, %v3430_v41  ;;  %v301_v15 = vrot.slane %v287_v55, %v3415_v51  ;;  %v1165_v48 = vrot.slane %v3485_v35, %v3415_v51 }
0x14e4   :  { %v596_v33 = vrot.slane %v585_v54, %v3430_v41  ;;  %v841_v18 = vrot.slane %v830_v57, %v3430_v41  ;;  %v886_v38 = vrot.slane %v875_v16, %v3430_v41  ;;  %v1131_v63 = vrot.slane %v1120_v1, %v3430_v41 }
0x14e5   :  { %v263_v14 = vrot.slane %v255_v8, %v3430_v41  ;;  %v309_v43 = vrot.slane %v301_v15, %v3430_v41  ;;  %v1410_v5 = vrot.slane %v3493_v29, %v3415_v51  ;;  %v3501_v31 = vrot.slane %v3243_v39, %v3415_v51 }
0x14e6   :  { %v1176_v36 = vrot.slane %v1165_v48, %v3430_v41  ;;  %v3509_v20 = vrot.slane %v3302_v25, %v3415_v51  ;;  %v3517_v39 = vrot.slane %v3304_v45, %v3415_v51  ;;  %v3525_v25 = vrot.slane %v3355_v6, %v3415_v51 }
0x14e7   :  { %v1455_v42 = vrot.slane %v3501_v31, %v3415_v51  ;;  %v1421_v7 = vrot.slane %v1410_v5, %v3430_v41  ;;  %v3533_v45 = vrot.slane %v3357_v11, %v3415_v51 }
0x14e8   :  { %v1990_v58 = vrot.slane %v3525_v25, %v3415_v51 }
0x14ea   :  { %v2001_v6 = vrot.slane %v1990_v58, %v3430_v41  ;;  %v1693_v58 = vcombine.high %v3509_v20, %v3509_v20 }
0x1549   :  { %v2218_v13 = vpop.permute.xlu0 %2217 }
0x154a   :  { %v2242_v4 = vpop.permute.xlu1 %2241  ;;  %v3410_v12 = vadd.f32 %v2218_v13, %v2210_v17  ;;  %v1700_v13 = vrot.slane %v3509_v20, %v3415_v51  ;;  %v1466_v17 = vrot.slane %v1455_v42, %v3430_v41 }
0x154b   :  { %v3412_v56 = vadd.f32 %v2242_v4, %v2234_v23  ;;  %v1745_v4 = vrot.slane %v3517_v39, %v3415_v51 }
0x154c   :  { %2773 = vtanh.f32 %v3410_v12  ;;  %v1711_v23 = vrot.slane %v1700_v13, %v3430_v41 }
0x154d   :  { %2775 = vtanh.f32 %v3412_v56  ;;  %v1756_v60 = vrot.slane %v1745_v4, %v3430_v41 }
0x1556   :  { %v2774_v40 = vpop.eup %2773 }
0x1557   :  { %v2776_v24 = vpop.eup %2775 }
0x155a   :  { %v2353_v53 = vpop.permute.xlu0 %2352 }
0x155b   :  { %v2355_v27 = vmul.f32 %v2353_v53, %v3366_v28  ;;  %v3421_v2 = vpop.permute.xlu1 %2364  ;;  %v2383_v37 = vmul.f32 %v2353_v53, %v3389_v34  ;;  %v2035_v53 = vrot.slane %v3533_v45, %v3415_v51 }
0x155c   :  { %v2367_v26 = vmul.f32 %v3421_v2, %v3366_v28  ;;  %v532_v28 = vrot.slane %v3036_v49, %v3415_v51  ;;  %v305_v49 = vrot.slane %v294_v30, %v3430_v41 }
0x155d   :  { %2357 = vrot.lane.b32.xlu1 %v2355_v27, %s2781_s2  ;;  %v2046_v61 = vrot.slane %v2035_v53, %v3430_v41  ;;  %v1707_v53 = vrot.slane %v1693_v58, %v3415_v51 }
0x155e   :  { %2369 = vrot.lane.b32.xlu0 %v2367_v26, %s2780_s8  ;;  %v533_v9 = vcombine.high %v532_v28, %v532_v28  ;;  %v540_v21 = vrot.slane %v532_v28, %v3415_v51  ;;  %v3543_v27 = vpop.permute.xlu0 %2645 }
0x155f   :  { %v2647_v62 = vunpack.i.l.bf16 %v3543_v27  ;;  %v2648_v55 = vunpack.i.h.bf16 %v3543_v27 }
0x1560   :  { %v547_v46 = vrot.slane %v533_v9, %v3415_v51  ;;  %v551_v47 = vrot.slane %v540_v21, %v3430_v41  ;;  %v823_v9 = vcombine.high %v3461_v59, %v3461_v59 }
0x1561   :  { %2223 = vrot.lane.b32.xlu1 %v2774_v40, %s2780_s8  ;;  %v578_v40 = vcombine.high %v3450_v22, %v3450_v22  ;;  %v2382_v8 = vmul.f32 %v2647_v62, %v3410_v12 }
0x1562   :  { %2247 = vrot.lane.b32.xlu0 %v2776_v24, %s2780_s8  ;;  %v555_v52 = vrot.slane %v547_v46, %v3430_v41  ;;  %v837_v59 = vrot.slane %v823_v9, %v3415_v51 }
0x1564   :  { %v845_v16 = vrot.slane %v837_v59, %v3430_v41 }
0x1565   :  { %2385 = vrot.lane.b32.xlu1 %v2383_v37, %s2778_s21 }
0x1566   :  { %264 = vrot.lane.b32.xlu0 %v259_v3, %s2778_s21 }
0x1569   :  { %266 = vrot.lane.b32.xlu1 %v263_v14, %s2778_s21 }
0x156a   :  { %310 = vrot.lane.b32.xlu0 %v305_v49, %s2778_s21 }
0x156d   :  { %312 = vrot.lane.b32.xlu1 %v309_v43, %s2778_s21  ;;  %v868_v43 = vcombine.high %v3469_v0, %v3469_v0  ;;  %v1113_v0 = vcombine.high %v3477_v32, %v3477_v32 }
0x156e   :  { %556 = vrot.lane.b32.xlu0 %v551_v47, %s2778_s21 }
0x1571   :  { %558 = vrot.lane.b32.xlu1 %v555_v52, %s2778_s21 }
0x1575   :  { %601 = vrot.lane.b32.xlu1 %v596_v33, %s2778_s21 }
0x1579   :  { %846 = vrot.lane.b32.xlu1 %v841_v18, %s2778_s21  ;;  %v882_v18 = vrot.slane %v868_v43, %v3415_v51 }
0x157b   :  { %v890_v48 = vrot.slane %v882_v18, %v3430_v41 }
0x157d   :  { %891 = vrot.lane.b32.xlu1 %v886_v38, %s2778_s21  ;;  %v1158_v38 = vcombine.high %v3485_v35, %v3485_v35 }
0x157f   :  { %v1172_v42 = vrot.slane %v1158_v38, %v3415_v51 }
0x1581   :  { %1136 = vrot.lane.b32.xlu1 %v1131_v63, %s2778_s21  ;;  %v1127_v63 = vrot.slane %v1113_v0, %v3415_v51 }
0x1583   :  { %v1135_v35 = vrot.slane %v1127_v63, %v3430_v41 }
0x1585   :  { %1181 = vrot.lane.b32.xlu1 %v1176_v36, %s2778_s21  ;;  %v1403_v36 = vcombine.high %v3493_v29, %v3493_v29  ;;  %v1180_v29 = vrot.slane %v1172_v42, %v3430_v41 }
0x1587   :  { %v1417_v13 = vrot.slane %v1403_v36, %v3415_v51 }
0x1589   :  { %1426 = vrot.lane.b32.xlu1 %v1421_v7, %s2778_s21 }
0x158d   :  { %1471 = vrot.lane.b32.xlu1 %v1466_v17, %s2778_s21  ;;  %v1448_v17 = vcombine.high %v3501_v31, %v3501_v31  ;;  %v1425_v31 = vrot.slane %v1417_v13, %v3430_v41 }
0x1591   :  { %1716 = vrot.lane.b32.xlu1 %v1711_v23, %s2778_s21  ;;  %v1462_v23 = vrot.slane %v1448_v17, %v3415_v51 }
0x1593   :  { %v1470_v20 = vrot.slane %v1462_v23, %v3430_v41 }
0x1595   :  { %1761 = vrot.lane.b32.xlu1 %v1756_v60, %s2778_s21 }
0x1599   :  { %2006 = vrot.lane.b32.xlu1 %v2001_v6, %s2778_s21  ;;  %v1738_v6 = vcombine.high %v3517_v39, %v3517_v39  ;;  %v1715_v39 = vrot.slane %v1707_v53, %v3430_v41 }
0x159d   :  { %2051 = vrot.lane.b32.xlu1 %v2046_v61, %s2778_s21 }
0x15cf   :  { %v3545_v26 = vpop.permute.xlu1 %2357 }
0x15d0   :  { %v2370_v11 = vpop.permute.xlu0 %2369 }
0x15d3   :  { %v2224_v50 = vpop.permute.xlu1 %2223 }
0x15d4   :  { %v2226_v44 = vmul.f32 %v3393_v10, %v2224_v50  ;;  %v2248_v24 = vpop.permute.xlu0 %2247 }
0x15d5   :  { %v2250_v28 = vmul.f32 %v3395_v19, %v2248_v24  ;;  %v592_v19 = vrot.slane %v578_v40, %v3415_v51 }
0x15d6   :  { %v3553_v37 = vmul.f32 %v2647_v62, %v2226_v44  ;;  %v1983_v62 = vcombine.high %v3525_v25, %v3525_v25  ;;  %v2028_v44 = vcombine.high %v3533_v45, %v3533_v45 }
0x15d7   :  { %v2309_v30 = vmul.f32 %v2648_v55, %v2250_v28  ;;  %v2386_v3 = vpop.permute.xlu1 %2385  ;;  %v600_v47 = vrot.slane %v592_v19, %v3430_v41 }
0x15d8   :  { %v3562_v10 = vrot.slane %v3553_v37, %v3415_v51  ;;  %v2388_v14 = vadd.f32 %v2386_v3, %v2382_v8  ;;  %v265_v15 = vpop.permute.xlu0 %264  ;;  %v1997_v40 = vrot.slane %v1983_v62, %v3415_v51  ;;  %v2042_v28 = vrot.slane %v2028_v44, %v3415_v51 }
0x15d9   :  { %v3566_v21 = vrot.slane %v2309_v30, %v3415_v51  ;;  %v2372_v12 = vadd.f32 %v2370_v11, %v2309_v30  ;;  %271 = vst.msk [vmem:[%s3782_s4] sm:$0x1] %vm270_vm12, %v265_v15  ;;  %v1752_v11 = vrot.slane %v1738_v6, %v3415_v51  ;;  %v2360_v15 = vadd.f32 %v3545_v26, %v3553_v37 }
0x15da   :  { %v2280_v49 = vrot.slane %v3562_v10, %v3415_v51  ;;  %2393 = vrot.lane.b32.xlu0 %v2388_v14, %s2781_s2  ;;  %v2005_v8 = vrot.slane %v1997_v40, %v3430_v41  ;;  %v2273_v30 = vcombine.high %v3562_v10, %v3562_v10  ;;  %v2050_v3 = vrot.slane %v2042_v28, %v3430_v41 }
0x15db   :  { %2378 = vrot.lane.b32.xlu1 %v2372_v12, %s2780_s8  ;;  %v267_v22 = vpop.permute.xlu1 %266  ;;  %v2325_v52 = vrot.slane %v3566_v21, %v3415_v51  ;;  %v1760_v25 = vrot.slane %v1752_v11, %v3430_v41  ;;  %v2318_v19 = vcombine.high %v3566_v21, %v3566_v21 }
0x15dc   :  { %272 = vst.msk [vmem:[%s3782_s4 + $0x8] sm:$0x1] %vm270_vm12, %v267_v22  ;;  %v311_v46 = vpop.permute.xlu0 %310  ;;  %v2291_v54 = vrot.slane %v2280_v49, %v3430_v41  ;;  %v2287_v14 = vrot.slane %v2273_v30, %v3415_v51  ;;  %v2390_v49 = vmul.f32 %v3421_v2, %v3389_v34 }
0x15dd   :  { %316 = vst.msk [vmem:[%s3783_s5 + $0x7] sm:$0x1] %vm270_vm12, %v311_v46  ;;  %v2336_v1 = vrot.slane %v2325_v52, %v3430_v41  ;;  %v2332_v12 = vrot.slane %v2318_v19, %v3415_v51  ;;  %v2389_v51 = vmul.f32 %v2648_v55, %v3412_v56 }
0x15de   :  { %603 = vrot.lane.b32.xlu0 %v600_v47, %s2778_s21  ;;  %v2295_v26 = vrot.slane %v2287_v14, %v3430_v41 }
0x15df   :  { %2296 = vrot.lane.b32.xlu1 %v2291_v54, %s2778_s21  ;;  %v313_v57 = vpop.permute.xlu1 %312  ;;  %v2340_v21 = vrot.slane %v2332_v12, %v3430_v41  ;;  %v2391_v22 = vadd.f32 %v2390_v49, %v2389_v51 }
0x15e0   :  { %317 = vst.msk [vmem:[%s3783_s5 + $0xf] sm:$0x1] %vm270_vm12, %v313_v57  ;;  %v557_v33 = vpop.permute.xlu0 %556 }
0x15e1   :  { %562 = vst.msk [vmem:[%s3782_s4 + $0x1] sm:$0x1] %vm270_vm12, %v557_v33 }
0x15e2   :  { %848 = vrot.lane.b32.xlu0 %v845_v16, %s2778_s21 }
0x15e3   :  { %2341 = vrot.lane.b32.xlu1 %v2336_v1, %s2778_s21  ;;  %v559_v32 = vpop.permute.xlu1 %558 }
0x15e4   :  { %563 = vst.msk [vmem:[%s3782_s4 + $0x9] sm:$0x1] %vm270_vm12, %v559_v32 }
0x15e6   :  { %893 = vrot.lane.b32.xlu0 %v890_v48, %s2778_s21 }
0x15e7   :  { %v602_v5 = vpop.permute.xlu1 %601 }
0x15e8   :  { %607 = vst.msk [vmem:[%s3783_s5 + $0x6] sm:$0x1] %vm270_vm12, %v602_v5 }
0x15ea   :  { %1138 = vrot.lane.b32.xlu0 %v1135_v35, %s2778_s21 }
0x15eb   :  { %v847_v7 = vpop.permute.xlu1 %846 }
0x15ec   :  { %852 = vst.msk [vmem:[%s3782_s4 + $0x2] sm:$0x1] %vm270_vm12, %v847_v7 }
0x15ee   :  { %1183 = vrot.lane.b32.xlu0 %v1180_v29, %s2778_s21 }
0x15ef   :  { %v892_v4 = vpop.permute.xlu1 %891 }
0x15f0   :  { %897 = vst.msk [vmem:[%s3783_s5 + $0x5] sm:$0x1] %vm270_vm12, %v892_v4 }
0x15f2   :  { %1428 = vrot.lane.b32.xlu0 %v1425_v31, %s2778_s21 }
0x15f3   :  { %v1137_v60 = vpop.permute.xlu1 %1136 }
0x15f4   :  { %1142 = vst.msk [vmem:[%s3782_s4 + $0x3] sm:$0x1] %vm270_vm12, %v1137_v60 }
0x15f6   :  { %1473 = vrot.lane.b32.xlu0 %v1470_v20, %s2778_s21 }
0x15f7   :  { %v1182_v61 = vpop.permute.xlu1 %1181 }
0x15f8   :  { %1187 = vst.msk [vmem:[%s3783_s5 + $0x4] sm:$0x1] %vm270_vm12, %v1182_v61 }
0x15fa   :  { %1718 = vrot.lane.b32.xlu0 %v1715_v39, %s2778_s21 }
0x15fb   :  { %v1427_v50 = vpop.permute.xlu1 %1426 }
0x15fc   :  { %1432 = vst.msk [vmem:[%s3782_s4 + $0x4] sm:$0x1] %vm270_vm12, %v1427_v50 }
0x15fe   :  { %1763 = vrot.lane.b32.xlu0 %v1760_v25, %s2778_s21 }
0x15ff   :  { %v1472_v24 = vpop.permute.xlu1 %1471 }
0x1600   :  { %1477 = vst.msk [vmem:[%s3783_s5 + $0x3] sm:$0x1] %vm270_vm12, %v1472_v24 }
0x1602   :  { %2008 = vrot.lane.b32.xlu0 %v2005_v8, %s2778_s21 }
0x1603   :  { %v1717_v45 = vpop.permute.xlu1 %1716 }
0x1604   :  { %1722 = vst.msk [vmem:[%s3782_s4 + $0x5] sm:$0x1] %vm270_vm12, %v1717_v45 }
0x1606   :  { %2053 = vrot.lane.b32.xlu0 %v2050_v3, %s2778_s21 }
0x1607   :  { %v1762_v9 = vpop.permute.xlu1 %1761 }
0x1608   :  { %1767 = vst.msk [vmem:[%s3783_s5 + $0x2] sm:$0x1] %vm270_vm12, %v1762_v9 }
0x160a   :  { %2374 = vrot.lane.b32.xlu0 %v2360_v15, %s2778_s21 }
0x160b   :  { %v2007_v10 = vpop.permute.xlu1 %2006 }
0x160c   :  { %2012 = vst.msk [vmem:[%s3782_s4 + $0x6] sm:$0x1] %vm270_vm12, %v2007_v10 }
0x160e   :  { %2298 = vrot.lane.b32.xlu0 %v2295_v26, %s2778_s21 }
0x160f   :  { %v2052_v37 = vpop.permute.xlu1 %2051 }
0x1610   :  { %2057 = vst.msk [vmem:[%s3783_s5 + $0x1] sm:$0x1] %vm270_vm12, %v2052_v37 }
0x1612   :  { %2343 = vrot.lane.b32.xlu0 %v2340_v21, %s2778_s21 }
0x164c   :  { %v2394_v43 = vpop.permute.xlu0 %2393 }
0x164d   :  { %v2396_v46 = vsel %vm350_vm5, %v2394_v43, %v2391_v22  ;;  %v2379_v47 = vpop.permute.xlu1 %2378 }
0x164e   :  { %2399 = vst.msk [vmem:[#allocation3] sm:$0x3] %vm51_vm0, %v2396_v46 }
0x1650   :  { %v604_v54 = vpop.permute.xlu0 %603 }
0x1651   :  { %608 = vst.msk [vmem:[%s3783_s5 + $0xe] sm:$0x1] %vm270_vm12, %v604_v54  ;;  %v2297_v41 = vpop.permute.xlu1 %2296 }
0x1652   :  { %2302 = vst.msk [vmem:[%s3782_s4 + $0x7] sm:$0x1] %vm270_vm12, %v2297_v41 }
0x1654   :  { %v849_v34 = vpop.permute.xlu0 %848 }
0x1655   :  { %853 = vst.msk [vmem:[%s3782_s4 + $0xa] sm:$0x1] %vm270_vm12, %v849_v34  ;;  %v2342_v56 = vpop.permute.xlu1 %2341 }
0x1656   :  { %2347 = vst.msk [vmem:[%s3783_s5] sm:$0x1] %vm270_vm12, %v2342_v56 }
0x1658   :  { %v894_v2 = vpop.permute.xlu0 %893 }
0x1659   :  { %898 = vst.msk [vmem:[%s3783_s5 + $0xd] sm:$0x1] %vm270_vm12, %v894_v2 }
0x165c   :  { %v1139_v27 = vpop.permute.xlu0 %1138 }
0x165d   :  { %1143 = vst.msk [vmem:[%s3782_s4 + $0xb] sm:$0x1] %vm270_vm12, %v1139_v27 }
0x1660   :  { %v1184_v55 = vpop.permute.xlu0 %1183 }
0x1661   :  { %1188 = vst.msk [vmem:[%s3783_s5 + $0xc] sm:$0x1] %vm270_vm12, %v1184_v55 }
0x1664   :  { %v1429_v59 = vpop.permute.xlu0 %1428 }
0x1665   :  { %1433 = vst.msk [vmem:[%s3782_s4 + $0xc] sm:$0x1] %vm270_vm12, %v1429_v59 }
0x1668   :  { %v1474_v52 = vpop.permute.xlu0 %1473 }
0x1669   :  { %1478 = vst.msk [vmem:[%s3783_s5 + $0xb] sm:$0x1] %vm270_vm12, %v1474_v52 }
0x166c   :  { %v1719_v57 = vpop.permute.xlu0 %1718 }
0x166d   :  { %1723 = vst.msk [vmem:[%s3782_s4 + $0xd] sm:$0x1] %vm270_vm12, %v1719_v57 }
0x1670   :  { %v1764_v0 = vpop.permute.xlu0 %1763 }
0x1671   :  { %1768 = vst.msk [vmem:[%s3783_s5 + $0xa] sm:$0x1] %vm270_vm12, %v1764_v0 }
0x1674   :  { %v2009_v33 = vpop.permute.xlu0 %2008 }
0x1675   :  { %2013 = vst.msk [vmem:[%s3782_s4 + $0xe] sm:$0x1] %vm270_vm12, %v2009_v33 }
0x1678   :  { %v2054_v16 = vpop.permute.xlu0 %2053 }
0x1679   :  { %2058 = vst.msk [vmem:[%s3783_s5 + $0x9] sm:$0x1] %vm270_vm12, %v2054_v16 }
0x167c   :  { %v2375_v18 = vpop.permute.xlu0 %2374 }
0x167d   :  { %v2381_v1 = vsel %vm350_vm5, %v2375_v18, %v2379_v47 }
0x167e   :  { %2398 = vst.msk [vmem:[#allocation2] sm:$0x3] %vm51_vm0, %v2381_v1 }
0x1680   :  { %v2299_v32 = vpop.permute.xlu0 %2298 }
0x1681   :  { %2303 = vst.msk [vmem:[%s3782_s4 + $0xf] sm:$0x1] %vm270_vm12, %v2299_v32 }
0x1684   :  { %v2344_v38 = vpop.permute.xlu0 %2343 }
0x1685   :  { %2348 = vst.msk [vmem:[%s3783_s5 + $0x8] sm:$0x1] %vm270_vm12, %v2344_v38 }

</bundles_post_ra>
